<compile_context>
chip_gen: v7x
topology: tpu7x:2x2x1
jax: 0.10.0
libtpu: 0.0.40
codegen_flags: <defaults>
</compile_context>

<pallas_src>
import functools

import jax
import jax.numpy as jnp
from jax import lax
from jax.experimental import pallas as pl
from jax.experimental.pallas import tpu as pltpu

_LANE = 128


def _round_up(x, m):
    return (x + m - 1) // m * m


# ----------------------------------------------------------------------------
# Generation-aware VMEM sizing (v5e/v6e: 128 MiB, v7x: 64 MiB).
# ----------------------------------------------------------------------------
def _vmem_capacity_bytes():
    try:
        return int(pltpu.get_tpu_info().vmem_capacity_bytes)
    except Exception:
        return 64 * 1024 * 1024          # conservative (v7x-sized) fallback

_VMEM_CAP = _vmem_capacity_bytes()
_VMEM_LIMIT = min(_VMEM_CAP * 3 // 4, 100 * 1024 * 1024)   # ~96MiB v5e/v6e, ~48MiB v7x
_TILE_BUDGET = _VMEM_LIMIT // 3


def _pick_tile(dim, bytes_fn, budget, min_tiles=1):
    """Largest divisor of `dim` whose block footprint fits the budget, preferring
    >=min_tiles grid steps (so v7x's two TensorCores both get work)."""
    divs = sorted((d for d in range(1, dim + 1) if dim % d == 0), reverse=True)
    for want in sorted({min_tiles, 1}, reverse=True):
        for d in divs:
            if dim // d >= want and bytes_fn(d) <= budget:
                return d
    return 1


# ----------------------------------------------------------------------------
# Kernel 1: ConvTranspose2d(k=2, s=2) as a tiled matmul + bias.
#   x_ref: (1, TH, W, Cinp) bf16   w_ref: (Cinp, 4*Cp) bf16   b_ref: (1, 4*Cp) f32
#   o_ref: (1, TH, W, 4*Cp)        4*Cp lanes = (di, dj, c) sub-pixel packing
# ----------------------------------------------------------------------------
def _deconv2x2_kernel(x_ref, w_ref, b_ref, o_ref):
    _, th, w_in, cinp = x_ref.shape
    cp4 = w_ref.shape[-1]
    xm = x_ref[...].reshape(th * w_in, cinp)
    y = jnp.dot(xm, w_ref[...], preferred_element_type=jnp.float32) + b_ref[...]
    o_ref[...] = y.reshape(1, th, w_in, cp4).astype(o_ref.dtype)


def _transposed_conv2x2(x_nchw, w_iodd, b, cp):
    """ConvTranspose2d(Cin, Cout, kernel_size=2, stride=2).
    Returns the upsampled activation as a column-padded NHWC array
    (N, 2H, 2W+2, Cp) in bf16, ready for the first 3x3 conv."""
    n, cin, h, w = x_nchw.shape
    cout = b.shape[0]
    cinp = _round_up(cin, _LANE)

    # NCHW -> NHWC, bf16, channel pad to a lane multiple (one small XLA pass).
    x = jnp.transpose(x_nchw, (0, 2, 3, 1)).astype(jnp.bfloat16)
    x = jnp.pad(x, ((0, 0), (0, 0), (0, 0), (0, cinp - cin)))

    # (Cin, Cout, 2, 2) -> (Cinp, 4*Cp), columns ordered (di, dj, c).
    # TODO(synk): tile K for very large Cin instead of holding the whole weight.
    wk = jnp.transpose(w_iodd, (0, 2, 3, 1))                        # (Cin, di, dj, Cout)
    wk = jnp.pad(wk, ((0, cinp - cin), (0, 0), (0, 0), (0, cp - cout)))
    wk = wk.reshape(cinp, 4 * cp).astype(jnp.bfloat16)
    bk = jnp.tile(jnp.pad(b, (0, cp - cout)), 4).reshape(1, 4 * cp).astype(jnp.float32)

    def bytes_fn(th):
        blk_in = 2 * th * w * cinp * 2                  # double-buffered bf16 input
        blk_out = 2 * th * w * 4 * cp * 2               # double-buffered bf16 output
        wgt = cinp * 4 * cp * 2 + 4 * cp * 4            # single-buffered weight + bias
        tmp = th * w * cinp * 2 + 2 * th * w * 4 * cp * 4   # flat copy + f32 result
        return blk_in + blk_out + wgt + tmp

    th = _pick_tile(h, bytes_fn, _TILE_BUDGET, min_tiles=(1 if n >= 2 else 2))
    nh = h // th

    ym = pl.pallas_call(
        _deconv2x2_kernel,
        out_shape=jax.ShapeDtypeStruct((n, h, w, 4 * cp), jnp.bfloat16),
        grid=(n, nh),
        in_specs=[
            pl.BlockSpec((1, th, w, cinp), lambda ni, hi: (ni, hi, 0, 0)),
            pl.BlockSpec((cinp, 4 * cp), lambda ni, hi: (0, 0),
                         pipeline_mode=pl.Buffered(1)),       # weight stays resident
            pl.BlockSpec((1, 4 * cp), lambda ni, hi: (0, 0),
                         pipeline_mode=pl.Buffered(1)),
        ],
        out_specs=pl.BlockSpec((1, th, w, 4 * cp), lambda ni, hi: (ni, hi, 0, 0)),
        compiler_params=pltpu.CompilerParams(
            dimension_semantics=("parallel", "parallel"),
            vmem_limit_bytes=_VMEM_LIMIT),
    )(x, wk, bk)

    # 2x2 sub-pixel interleave (N,H,W,2,2,Cp) -> (N,2H,2W,Cp) plus the 1-column
    # zero border for the first conv, done as one fused XLA copy pass.
    # TODO(synk): fold this relayout into the deconv kernel's output store
    # (needs a Mosaic reshape across the sublane/lane split); it is the single
    # remaining XLA round-trip of the activation.
    up = ym.reshape(n, h, w, 2, 2, cp)
    up = jnp.transpose(up, (0, 1, 3, 2, 4, 5)).reshape(n, 2 * h, 2 * w, cp)
    return jnp.pad(up, ((0, 0), (0, 0), (1, 1), (0, 0)))


# ----------------------------------------------------------------------------
# Kernel 2: fused Conv3x3 (SAME) + bias + ReLU + BatchNorm2d (eval).
#   xm_ref:          (1, TH,  Wc+2, C)  main row block (columns zero-padded)
#   xt_ref / xb_ref: (1, 1,   Wc+2, C)  halo rows above / below the block
#   w_ref:           (3, 3*C, Cp)       taps K-packed; b/s/t: (1, Cp)
#   o_ref:           (1, TH, Wc+2, Cp)  if pad_out_cols else (1, TH, Wc, Co)
# ----------------------------------------------------------------------------
def _conv3x3_relu_bn_kernel(xm_ref, xt_ref, xb_ref, w_ref, b_ref, s_ref, t_ref,
                            o_ref, *, pad_out_cols):
    _, th, wcp, c = xm_ref.shape
    wc = wcp - 2
    cp = w_ref.shape[-1]
    co = o_ref.shape[-1]
    hi = pl.program_id(1)
    nh = pl.num_programs(1)

    # Row halo: rows -1 / +TH of the (row-unpadded) input; zero at the image edge.
    tmask = jnp.where(hi > 0, 1.0, 0.0).astype(xm_ref.dtype)
    bmask = jnp.where(hi < nh - 1, 1.0, 0.0).astype(xm_ref.dtype)
    xp = jnp.concatenate([xt_ref[0] * tmask, xm_ref[0], xb_ref[0] * bmask], axis=0)

    # K-pack the three column taps: 3 matmuls with K = 3*C (fills the 256-deep
    # MXU on v6e/v7x) instead of 9 with K = C; row taps are free row-offset
    # slices of the flattened view (Wc is kept a multiple of 8).
    x3 = jnp.concatenate(
        [xp[:, 0:wc, :], xp[:, 1:wc + 1, :], xp[:, 2:wc + 2, :]], axis=-1,
    ).reshape((th + 2) * wc, 3 * c)

    acc = jnp.zeros((th * wc, cp), jnp.float32)
    for di in range(3):
        acc = acc + jnp.dot(x3[di * wc:(di + th) * wc], w_ref[di],
                            preferred_element_type=jnp.float32)

    y = jnp.maximum(acc + b_ref[...], 0.0)     # conv bias + ReLU          (f32)
    y = y * s_ref[...] + t_ref[...]            # BatchNorm (eval, folded)
    # TODO(synk): nn.Dropout2d(p=0.1) is identity in eval mode; no RNG applied.
    if co < cp:
        y = y[:, :co]                          # drop padded output channels
    y = y.reshape(th, wc, co).astype(o_ref.dtype)

    if pad_out_cols:
        # Emit a column-padded output so the next conv needs no XLA pad pass.
        zcol = jnp.zeros((th, 1, co), o_ref.dtype)
        o_ref[0, :, 0:1, :] = zcol
        o_ref[0, :, wc + 1:wc + 2, :] = zcol
        o_ref[0, :, 1:wc + 1, :] = y
    else:
        o_ref[...] = y.reshape(1, th, wc, co)


def _conv3x3_relu_bn(x, w_hwio, b, bn_scale, bn_shift, *, cp, co_out, out_dtype,
                     pad_out_cols):
    """Fused Conv2d(3x3, SAME) + bias + ReLU + BatchNorm2d(eval).
    x is (N, Hc, Wc+2, C): channel-padded to C (lane multiple) and zero-padded
    by one column on each side.  Row halos are fetched via two extra 1-row
    BlockSpecs, so no windowed / padded copy of the activation hits HBM."""
    n, hc, wcp, c = x.shape
    wc = wcp - 2
    cin = w_hwio.shape[2]
    cout = w_hwio.shape[3]

    wk = jnp.pad(w_hwio, ((0, 0), (0, 0), (0, c - cin), (0, cp - cout)))
    wk = wk.reshape(3, 3 * c, cp).astype(jnp.bfloat16)             # rows = (dj, ci)
    bk = jnp.pad(b, (0, cp - cout)).reshape(1, cp).astype(jnp.float32)
    sk = jnp.pad(bn_scale, (0, cp - cout)).reshape(1, cp).astype(jnp.float32)
    tk = jnp.pad(bn_shift, (0, cp - cout)).reshape(1, cp).astype(jnp.float32)

    out_w = wcp if pad_out_cols else wc
    osize = jnp.dtype(out_dtype).itemsize

    def bytes_fn(th):
        blk_in = 2 * th * wcp * c * 2 + 2 * 2 * wcp * c * 2     # main + halo rows
        blk_out = 2 * th * out_w * co_out * osize
        wgt = 3 * 3 * c * cp * 2 + 3 * cp * 4                   # single-buffered
        tmp = ((th + 2) * wcp * c * 2                           # row-assembled block
               + (th + 2) * wc * 3 * c * 2                      # K-packed copy
               + 2 * th * wc * cp * 4)                          # f32 acc + epilogue
        return blk_in + blk_out + wgt + tmp

    th = _pick_tile(hc, bytes_fn, _TILE_BUDGET, min_tiles=(1 if n >= 2 else 2))
    nh = hc // th
    # TODO(synk): add a column tile (with a 1-column halo) for very large Wc.

    kernel = functools.partial(_conv3x3_relu_bn_kernel, pad_out_cols=pad_out_cols)

    return pl.pallas_call(
        kernel,
        out_shape=jax.ShapeDtypeStruct((n, hc, out_w, co_out), out_dtype),
        grid=(n, nh),
        in_specs=[
            pl.BlockSpec((1, th, wcp, c), lambda ni, hi: (ni, hi, 0, 0)),
            pl.BlockSpec((1, 1, wcp, c),
                         lambda ni, hi: (ni, jnp.maximum(hi * th - 1, 0), 0, 0)),
            pl.BlockSpec((1, 1, wcp, c),
                         lambda ni, hi: (ni, jnp.minimum(hi * th + th, hc - 1), 0, 0)),
            pl.BlockSpec((3, 3 * c, cp), lambda ni, hi: (0, 0, 0),
                         pipeline_mode=pl.Buffered(1)),         # weights resident
            pl.BlockSpec((1, cp), lambda ni, hi: (0, 0),
                         pipeline_mode=pl.Buffered(1)),
            pl.BlockSpec((1, cp), lambda ni, hi: (0, 0),
                         pipeline_mode=pl.Buffered(1)),
            pl.BlockSpec((1, cp), lambda ni, hi: (0, 0),
                         pipeline_mode=pl.Buffered(1)),
        ],
        out_specs=pl.BlockSpec((1, th, out_w, co_out),
                               lambda ni, hi: (ni, hi, 0, 0)),
        compiler_params=pltpu.CompilerParams(
            dimension_semantics=("parallel", "parallel"),
            vmem_limit_bytes=_VMEM_LIMIT),
    )(x, x, x, wk, bk, sk, tk)


# ----------------------------------------------------------------------------
# Forward
# ----------------------------------------------------------------------------
def up_block_forward(x_nchw, bridge_ncdhw, params):
    """Matches UpBlock.forward(x, bridge) (up_mode='upconv', padding=True,
    batch_norm=True, eval mode). Inputs NCHW / NCDHW, output NCHW f32."""
    # The bridge slice / max_pool3d / concat in the reference forward is
    # immediately overwritten by conv_block(up) -> dead code, skipped entirely.
    del bridge_ncdhw

    out_size = params["deconv_b"].shape[0]
    cp = _round_up(out_size, _LANE)

    # --- up = self.up(x): ConvTranspose2d(in_size, out_size, 2, stride=2) ----
    up = _transposed_conv2x2(x_nchw, params["deconv_w"], params["deconv_b"], cp)

    # --- out = self.conv_block(up): two fused Conv3x3+ReLU+BN stages ---------
    eps = 1e-5
    s1 = params["bn1_gamma"] / jnp.sqrt(params["bn1_var"] + eps)
    t1 = params["bn1_beta"] - params["bn1_mean"] * s1
    s2 = params["bn2_gamma"] / jnp.sqrt(params["bn2_var"] + eps)
    t2 = params["bn2_beta"] - params["bn2_mean"] * s2

    # Stage 1 keeps the 128-padded channels (zero in the pad lanes) in bf16.
    h1 = _conv3x3_relu_bn(up, params["conv1_w"], params["conv1_b"], s1, t1,
                          cp=cp, co_out=cp, out_dtype=jnp.bfloat16,
                          pad_out_cols=True)
    # Stage 2 writes only the true output channels (no padded-channel writeback).
    h2 = _conv3x3_relu_bn(h1, params["conv2_w"], params["conv2_b"], s2, t2,
                          cp=cp, co_out=out_size, out_dtype=jnp.float32,
                          pad_out_cols=False)

    # TODO(synk): fold the NHWC->NCHW transpose into the second conv's output
    # store; it is one pass over the true-sized (unpadded) output only.
    return jnp.transpose(h2, (0, 3, 1, 2))


# ----------------------------------------------------------------------------
# Pure-XLA reference (same bf16-operand / f32-accumulate recipe) for checking.
# ----------------------------------------------------------------------------
def _reference_forward(x_nchw, params):
    bf16 = jnp.bfloat16
    eps = 1e-5
    x = jnp.transpose(x_nchw, (0, 2, 3, 1))
    n, h, w, _ = x.shape
    cout = params["deconv_b"].shape[0]

    t = jnp.einsum("nhwi,iojk->nhwjko", x.astype(bf16),
                   params["deconv_w"].astype(bf16),
                   preferred_element_type=jnp.float32)
    up = jnp.transpose(t, (0, 1, 3, 2, 4, 5)).reshape(n, 2 * h, 2 * w, cout)
    up = up + params["deconv_b"]

    def conv_relu_bn(a, w_hwio, b, gamma, beta, mean, var):
        y = lax.conv_general_dilated(
            a.astype(bf16), w_hwio.astype(bf16), (1, 1), "SAME",
            dimension_numbers=("NHWC", "HWIO", "NHWC"),
            preferred_element_type=jnp.float32)
        y = jnp.maximum(y + b, 0.0)
        scale = gamma / jnp.sqrt(var + eps)
        return y * scale + (beta - mean * scale)

    a = conv_relu_bn(up, params["conv1_w"], params["conv1_b"],
                     params["bn1_gamma"], params["bn1_beta"],
                     params["bn1_mean"], params["bn1_var"])
    a = conv_relu_bn(a, params["conv2_w"], params["conv2_b"],
                     params["bn2_gamma"], params["bn2_beta"],
                     params["bn2_mean"], params["bn2_var"])
    return jnp.transpose(a, (0, 3, 1, 2))


# ----------------------------------------------------------------------------
# Deterministic parameter init (shapes follow the nn.Module __init__)
# ----------------------------------------------------------------------------
def init_params(key, in_size, out_size):
    ks = jax.random.split(key, 8)

    def u(k, shape, fan_in):
        bound = 1.0 / jnp.sqrt(float(fan_in))
        return jax.random.uniform(k, shape, jnp.float32, -bound, bound)

    # ConvTranspose2d(in_size, out_size, k=2, s=2): weight (Cin, Cout, 2, 2)
    deconv_w = u(ks[0], (in_size, out_size, 2, 2), in_size * 4)
    deconv_b = u(ks[1], (out_size,), in_size * 4)

    # Conv2d(out_size, out_size, 3, padding=1): PyTorch OIHW -> HWIO
    c1 = u(ks[2], (out_size, out_size, 3, 3), out_size * 9)
    conv1_w = jnp.transpose(c1, (2, 3, 1, 0))
    conv1_b = u(ks[3], (out_size,), out_size * 9)
    c2 = u(ks[4], (out_size, out_size, 3, 3), out_size * 9)
    conv2_w = jnp.transpose(c2, (2, 3, 1, 0))
    conv2_b = u(ks[5], (out_size,), out_size * 9)

    # BatchNorm2d (eval-mode statistics), deterministic non-trivial values
    bn1_gamma = 1.0 + 0.1 * jax.random.normal(ks[6], (out_size,), jnp.float32)
    bn2_gamma = 1.0 + 0.1 * jax.random.normal(ks[7], (out_size,), jnp.float32)

    return dict(
        deconv_w=deconv_w, deconv_b=deconv_b,
        conv1_w=conv1_w, conv1_b=conv1_b,
        conv2_w=conv2_w, conv2_b=conv2_b,
        bn1_gamma=bn1_gamma, bn1_beta=jnp.full((out_size,), 0.05, jnp.float32),
        bn1_mean=jnp.full((out_size,), 0.1, jnp.float32),
        bn1_var=jnp.full((out_size,), 0.9, jnp.float32),
        bn2_gamma=bn2_gamma, bn2_beta=jnp.full((out_size,), -0.05, jnp.float32),
        bn2_mean=jnp.full((out_size,), -0.1, jnp.float32),
        bn2_var=jnp.full((out_size,), 1.1, jnp.float32),
    )


if __name__ == "__main__":
    key = jax.random.PRNGKey(0)
    k_x, k_b, k_p = jax.random.split(key, 3)

    in_size, out_size = 8, 4
    n, h, w = 2, 8, 8

    # PyTorch-layout inputs: x is NCHW, bridge is NCDHW (depth=3 branch; dead).
    x = jax.random.normal(k_x, (n, in_size, h, w), jnp.float32)
    bridge = jax.random.normal(k_b, (n, out_size, 3, 2 * h, 2 * w), jnp.float32)
    params = init_params(k_p, in_size, out_size)

    out = jax.jit(up_block_forward)(x, bridge, params)
    out = jax.block_until_ready(out)

    assert out.shape == (n, out_size, 2 * h, 2 * w), out.shape
    ref = _reference_forward(x, params)
    err = float(jnp.max(jnp.abs(out - ref)))
    assert err < 2e-2, f"max abs err vs reference: {err}"
    print("KERNEL_OK")
</pallas_src>

<mosaic_0001>
module attributes {stable_mosaic.version = 11 : i64} {
  func.func @_deconv2x2_kernel(%arg0: i32, %arg1: i32, %arg2: memref<1x8x8x128xbf16, #tpu.memory_space<vmem>>, %arg3: memref<128x512xbf16, #tpu.memory_space<vmem>>, %arg4: memref<1x512xf32, #tpu.memory_space<vmem>>, %arg5: memref<1x8x8x512xbf16, #tpu.memory_space<vmem>>) attributes {dimension_semantics = [#tpu.dimension_semantics<parallel>, #tpu.dimension_semantics<parallel>], iteration_bounds = array<i64: 2, 1>, scalar_prefetch = 0 : i64, scratch_operands = 0 : i64, tpu.core_type = #tpu.core_type<tc>, window_params = [{transform_indices = @transform_0, window_bounds = array<i64: 1, 8, 8, 128>}, {pipeline_mode = #tpu.pipeline_mode<synchronous>, transform_indices = @transform_1, window_bounds = array<i64: 128, 512>}, {pipeline_mode = #tpu.pipeline_mode<synchronous>, transform_indices = @transform_2, window_bounds = array<i64: 1, 512>}, {transform_indices = @transform_3, window_bounds = array<i64: 1, 8, 8, 512>}]} {
    %c0 = arith.constant 0 : index
    %c0_0 = arith.constant 0 : index
    %c0_1 = arith.constant 0 : index
    %c0_2 = arith.constant 0 : index
    %0 = vector.load %arg2[%c0, %c0_0, %c0_1, %c0_2] : memref<1x8x8x128xbf16, #tpu.memory_space<vmem>>, vector<1x8x8x128xbf16>
    %1 = vector.shape_cast %0 : vector<1x8x8x128xbf16> to vector<64x128xbf16>
    %c0_3 = arith.constant 0 : index
    %c0_4 = arith.constant 0 : index
    %2 = vector.load %arg3[%c0_3, %c0_4] : memref<128x512xbf16, #tpu.memory_space<vmem>>, vector<128x512xbf16>
    %cst = arith.constant dense<0.000000e+00> : vector<64x512xf32>
    %3 = tpu.matmul %1, %2, %cst {dimension_numbers = #tpu.dot_dimension_numbers<[1], [0], [0], [1], [0, 0, 1, 1], [], []>} : vector<64x128xbf16>, vector<128x512xbf16>, vector<64x512xf32> -> vector<64x512xf32>
    %c0_5 = arith.constant 0 : index
    %c0_6 = arith.constant 0 : index
    %4 = vector.load %arg4[%c0_5, %c0_6] : memref<1x512xf32, #tpu.memory_space<vmem>>, vector<1x512xf32>
    %5 = vector.broadcast %4 : vector<1x512xf32> to vector<64x512xf32>
    %6 = arith.addf %3, %5 : vector<64x512xf32>
    %7 = vector.shape_cast %6 : vector<64x512xf32> to vector<1x8x8x512xf32>
    %8 = arith.truncf %7 : vector<1x8x8x512xf32> to vector<1x8x8x512xbf16>
    %c0_7 = arith.constant 0 : index
    %c0_8 = arith.constant 0 : index
    %c0_9 = arith.constant 0 : index
    %c0_10 = arith.constant 0 : index
    %9 = vector.load %arg5[%c0_7, %c0_8, %c0_9, %c0_10] : memref<1x8x8x512xbf16, #tpu.memory_space<vmem>>, vector<1x8x8x512xbf16>
    tpu.vector_store %arg5[%c0_7, %c0_8, %c0_9, %c0_10], %8 {strides = array<i32>} : memref<1x8x8x512xbf16, #tpu.memory_space<vmem>>, vector<1x8x8x512xbf16>,
    return
  }
  func.func @transform_0(%arg0: i32, %arg1: i32) -> (i32, i32, i32, i32) {
    %c0_i32 = arith.constant 0 : i32
    %c0_i32_0 = arith.constant 0 : i32
    %c0_i32_1 = arith.constant 0 : i32
    return %arg0, %arg1, %c0_i32, %c0_i32_0 : i32, i32, i32, i32
  }
  func.func @transform_1(%arg0: i32, %arg1: i32) -> (i32, i32) {
    %c0_i32 = arith.constant 0 : i32
    %c0_i32_0 = arith.constant 0 : i32
    %c0_i32_1 = arith.constant 0 : i32
    return %c0_i32, %c0_i32_0 : i32, i32
  }
  func.func @transform_2(%arg0: i32, %arg1: i32) -> (i32, i32) {
    %c0_i32 = arith.constant 0 : i32
    %c0_i32_0 = arith.constant 0 : i32
    %c0_i32_1 = arith.constant 0 : i32
    return %c0_i32, %c0_i32_0 : i32, i32
  }
  func.func @transform_3(%arg0: i32, %arg1: i32) -> (i32, i32, i32, i32) {
    %c0_i32 = arith.constant 0 : i32
    %c0_i32_0 = arith.constant 0 : i32
    %c0_i32_1 = arith.constant 0 : i32
    return %arg0, %arg1, %c0_i32, %c0_i32_0 : i32, i32, i32, i32
  }
}

module attributes {stable_mosaic.version = 11 : i64} {
  func.func @_conv3x3_relu_bn_kernel(%arg0: i32, %arg1: i32, %arg2: memref<1x16x18x128xbf16, #tpu.memory_space<vmem>>, %arg3: memref<1x1x18x128xbf16, #tpu.memory_space<vmem>>, %arg4: memref<1x1x18x128xbf16, #tpu.memory_space<vmem>>, %arg5: memref<3x384x128xbf16, #tpu.memory_space<vmem>>, %arg6: memref<1x128xf32, #tpu.memory_space<vmem>>, %arg7: memref<1x128xf32, #tpu.memory_space<vmem>>, %arg8: memref<1x128xf32, #tpu.memory_space<vmem>>, %arg9: memref<1x16x16x4xf32, #tpu.memory_space<vmem>>) attributes {dimension_semantics = [#tpu.dimension_semantics<parallel>, #tpu.dimension_semantics<parallel>], iteration_bounds = array<i64: 2, 1>, scalar_prefetch = 0 : i64, scratch_operands = 0 : i64, tpu.core_type = #tpu.core_type<tc>, window_params = [{transform_indices = @transform_0, window_bounds = array<i64: 1, 16, 18, 128>}, {transform_indices = @transform_1, window_bounds = array<i64: 1, 1, 18, 128>}, {transform_indices = @transform_2, window_bounds = array<i64: 1, 1, 18, 128>}, {pipeline_mode = #tpu.pipeline_mode<synchronous>, transform_indices = @transform_3, window_bounds = array<i64: 3, 384, 128>}, {pipeline_mode = #tpu.pipeline_mode<synchronous>, transform_indices = @transform_4, window_bounds = array<i64: 1, 128>}, {pipeline_mode = #tpu.pipeline_mode<synchronous>, transform_indices = @transform_5, window_bounds = array<i64: 1, 128>}, {pipeline_mode = #tpu.pipeline_mode<synchronous>, transform_indices = @transform_6, window_bounds = array<i64: 1, 128>}, {transform_indices = @transform_7, window_bounds = array<i64: 1, 16, 16, 4>}]} {
    %c0_i32 = arith.constant 0 : i32
    %0 = arith.cmpi sgt, %arg1, %c0_i32 : i32
    %cst = arith.constant 1.000000e+00 : f32
    %cst_0 = arith.constant 0.000000e+00 : f32
    %1 = arith.select %0, %cst, %cst_0 : f32
    %2 = arith.truncf %1 : f32 to bf16
    %c0_i32_1 = arith.constant 0 : i32
    %3 = arith.cmpi slt, %arg1, %c0_i32_1 : i32
    %cst_2 = arith.constant 1.000000e+00 : f32
    %cst_3 = arith.constant 0.000000e+00 : f32
    %4 = arith.select %3, %cst_2, %cst_3 : f32
    %5 = arith.truncf %4 : f32 to bf16
    %c0 = arith.constant 0 : index
    %c0_4 = arith.constant 0 : index
    %c0_5 = arith.constant 0 : index
    %c0_6 = arith.constant 0 : index
    %6 = vector.load %arg3[%c0, %c0_4, %c0_5, %c0_6] : memref<1x1x18x128xbf16, #tpu.memory_space<vmem>>, vector<1x1x18x128xbf16>
    %7 = vector.shape_cast %6 : vector<1x1x18x128xbf16> to vector<1x18x128xbf16>
    %8 = vector.broadcast %2 : bf16 to vector<1x18x128xbf16>
    %9 = arith.mulf %7, %8 : vector<1x18x128xbf16>
    %c0_7 = arith.constant 0 : index
    %c0_8 = arith.constant 0 : index
    %c0_9 = arith.constant 0 : index
    %c0_10 = arith.constant 0 : index
    %10 = vector.load %arg2[%c0_7, %c0_8, %c0_9, %c0_10] : memref<1x16x18x128xbf16, #tpu.memory_space<vmem>>, vector<1x16x18x128xbf16>
    %11 = vector.shape_cast %10 : vector<1x16x18x128xbf16> to vector<16x18x128xbf16>
    %c0_11 = arith.constant 0 : index
    %c0_12 = arith.constant 0 : index
    %c0_13 = arith.constant 0 : index
    %c0_14 = arith.constant 0 : index
    %12 = vector.load %arg4[%c0_11, %c0_12, %c0_13, %c0_14] : memref<1x1x18x128xbf16, #tpu.memory_space<vmem>>, vector<1x1x18x128xbf16>
    %13 = vector.shape_cast %12 : vector<1x1x18x128xbf16> to vector<1x18x128xbf16>
    %14 = vector.broadcast %5 : bf16 to vector<1x18x128xbf16>
    %15 = arith.mulf %13, %14 : vector<1x18x128xbf16>
    %16 = tpu.concatenate %9, %11, %15 in 0 : vector<1x18x128xbf16>, vector<16x18x128xbf16>, vector<1x18x128xbf16> -> vector<18x18x128xbf16>
    %17 = vector.extract_strided_slice %16 {offsets = [0, 0, 0], sizes = [18, 16, 128], strides = [1, 1, 1]} : vector<18x18x128xbf16> to vector<18x16x128xbf16>
    %18 = vector.extract_strided_slice %16 {offsets = [0, 1, 0], sizes = [18, 16, 128], strides = [1, 1, 1]} : vector<18x18x128xbf16> to vector<18x16x128xbf16>
    %19 = vector.extract_strided_slice %16 {offsets = [0, 2, 0], sizes = [18, 16, 128], strides = [1, 1, 1]} : vector<18x18x128xbf16> to vector<18x16x128xbf16>
    %20 = tpu.concatenate %17, %18, %19 in 2 : vector<18x16x128xbf16>, vector<18x16x128xbf16>, vector<18x16x128xbf16> -> vector<18x16x384xbf16>
    %21 = vector.shape_cast %20 : vector<18x16x384xbf16> to vector<288x384xbf16>
    %cst_15 = arith.constant 0.000000e+00 : f32
    %22 = vector.broadcast %cst_15 : f32 to vector<256x128xf32>
    %23 = vector.extract_strided_slice %21 {offsets = [0, 0], sizes = [256, 384], strides = [1, 1]} : vector<288x384xbf16> to vector<256x384xbf16>
    %c0_16 = arith.constant 0 : index
    %c0_17 = arith.constant 0 : index
    %c0_18 = arith.constant 0 : index
    %24 = vector.load %arg5[%c0_16, %c0_17, %c0_18] : memref<3x384x128xbf16, #tpu.memory_space<vmem>>, vector<1x384x128xbf16>
    %25 = vector.shape_cast %24 : vector<1x384x128xbf16> to vector<384x128xbf16>
    %cst_19 = arith.constant dense<0.000000e+00> : vector<256x128xf32>
    %26 = tpu.matmul %23, %25, %cst_19 {dimension_numbers = #tpu.dot_dimension_numbers<[1], [0], [0], [1], [0, 0, 1, 1], [], []>} : vector<256x384xbf16>, vector<384x128xbf16>, vector<256x128xf32> -> vector<256x128xf32>
    %27 = arith.addf %22, %26 : vector<256x128xf32>
    %28 = vector.extract_strided_slice %21 {offsets = [16, 0], sizes = [256, 384], strides = [1, 1]} : vector<288x384xbf16> to vector<256x384xbf16>
    %c1 = arith.constant 1 : index
    %c0_20 = arith.constant 0 : index
    %c0_21 = arith.constant 0 : index
    %29 = vector.load %arg5[%c1, %c0_20, %c0_21] : memref<3x384x128xbf16, #tpu.memory_space<vmem>>, vector<1x384x128xbf16>
    %30 = vector.shape_cast %29 : vector<1x384x128xbf16> to vector<384x128xbf16>
    %cst_22 = arith.constant dense<0.000000e+00> : vector<256x128xf32>
    %31 = tpu.matmul %28, %30, %cst_22 {dimension_numbers = #tpu.dot_dimension_numbers<[1], [0], [0], [1], [0, 0, 1, 1], [], []>} : vector<256x384xbf16>, vector<384x128xbf16>, vector<256x128xf32> -> vector<256x128xf32>
    %32 = arith.addf %27, %31 : vector<256x128xf32>
    %33 = vector.extract_strided_slice %21 {offsets = [32, 0], sizes = [256, 384], strides = [1, 1]} : vector<288x384xbf16> to vector<256x384xbf16>
    %c2 = arith.constant 2 : index
    %c0_23 = arith.constant 0 : index
    %c0_24 = arith.constant 0 : index
    %34 = vector.load %arg5[%c2, %c0_23, %c0_24] : memref<3x384x128xbf16, #tpu.memory_space<vmem>>, vector<1x384x128xbf16>
    %35 = vector.shape_cast %34 : vector<1x384x128xbf16> to vector<384x128xbf16>
    %cst_25 = arith.constant dense<0.000000e+00> : vector<256x128xf32>
    %36 = tpu.matmul %33, %35, %cst_25 {dimension_numbers = #tpu.dot_dimension_numbers<[1], [0], [0], [1], [0, 0, 1, 1], [], []>} : vector<256x384xbf16>, vector<384x128xbf16>, vector<256x128xf32> -> vector<256x128xf32>
    %37 = arith.addf %32, %36 : vector<256x128xf32>
    %c0_26 = arith.constant 0 : index
    %c0_27 = arith.constant 0 : index
    %38 = vector.load %arg6[%c0_26, %c0_27] : memref<1x128xf32, #tpu.memory_space<vmem>>, vector<1x128xf32>
    %39 = vector.broadcast %38 : vector<1x128xf32> to vector<256x128xf32>
    %40 = arith.addf %37, %39 : vector<256x128xf32>
    %cst_28 = arith.constant 0.000000e+00 : f32
    %41 = vector.broadcast %cst_28 : f32 to vector<256x128xf32>
    %42 = arith.maximumf %40, %41 : vector<256x128xf32>
    %c0_29 = arith.constant 0 : index
    %c0_30 = arith.constant 0 : index
    %43 = vector.load %arg7[%c0_29, %c0_30] : memref<1x128xf32, #tpu.memory_space<vmem>>, vector<1x128xf32>
    %44 = vector.broadcast %43 : vector<1x128xf32> to vector<256x128xf32>
    %45 = arith.mulf %42, %44 : vector<256x128xf32>
    %c0_31 = arith.constant 0 : index
    %c0_32 = arith.constant 0 : index
    %46 = vector.load %arg8[%c0_31, %c0_32] : memref<1x128xf32, #tpu.memory_space<vmem>>, vector<1x128xf32>
    %47 = vector.broadcast %46 : vector<1x128xf32> to vector<256x128xf32>
    %48 = arith.addf %45, %47 : vector<256x128xf32>
    %49 = vector.extract_strided_slice %48 {offsets = [0, 0], sizes = [256, 4], strides = [1, 1]} : vector<256x128xf32> to vector<256x4xf32>
    %50 = vector.shape_cast %49 : vector<256x4xf32> to vector<16x16x4xf32>
    %51 = vector.shape_cast %50 : vector<16x16x4xf32> to vector<1x16x16x4xf32>
    %c0_33 = arith.constant 0 : index
    %c0_34 = arith.constant 0 : index
    %c0_35 = arith.constant 0 : index
    %c0_36 = arith.constant 0 : index
    %52 = vector.load %arg9[%c0_33, %c0_34, %c0_35, %c0_36] : memref<1x16x16x4xf32, #tpu.memory_space<vmem>>, vector<1x16x16x4xf32>
    tpu.vector_store %arg9[%c0_33, %c0_34, %c0_35, %c0_36], %51 {strides = array<i32>} : memref<1x16x16x4xf32, #tpu.memory_space<vmem>>, vector<1x16x16x4xf32>,
    return
  }
  func.func @transform_0(%arg0: i32, %arg1: i32) -> (i32, i32, i32, i32) {
    %c0_i32 = arith.constant 0 : i32
    %c0_i32_0 = arith.constant 0 : i32
    %c0_i32_1 = arith.constant 0 : i32
    return %arg0, %arg1, %c0_i32, %c0_i32_0 : i32, i32, i32, i32
  }
  func.func @transform_1(%arg0: i32, %arg1: i32) -> (i32, i32, i32, i32) {
    %c16_i32 = arith.constant 16 : i32
    %0 = arith.muli %arg1, %c16_i32 : i32
    %c1_i32 = arith.constant 1 : i32
    %1 = arith.subi %0, %c1_i32 : i32
    %c0_i32 = arith.constant 0 : i32
    %2 = arith.maxsi %1, %c0_i32 : i32
    %c0_i32_0 = arith.constant 0 : i32
    %c0_i32_1 = arith.constant 0 : i32
    %c0_i32_2 = arith.constant 0 : i32
    return %arg0, %2, %c0_i32_0, %c0_i32_1 : i32, i32, i32, i32
  }
  func.func @transform_2(%arg0: i32, %arg1: i32) -> (i32, i32, i32, i32) {
    %c16_i32 = arith.constant 16 : i32
    %0 = arith.muli %arg1, %c16_i32 : i32
    %c16_i32_0 = arith.constant 16 : i32
    %1 = arith.addi %0, %c16_i32_0 : i32
    %c15_i32 = arith.constant 15 : i32
    %2 = arith.minsi %1, %c15_i32 : i32
    %c0_i32 = arith.constant 0 : i32
    %c0_i32_1 = arith.constant 0 : i32
    %c0_i32_2 = arith.constant 0 : i32
    return %arg0, %2, %c0_i32, %c0_i32_1 : i32, i32, i32, i32
  }
  func.func @transform_3(%arg0: i32, %arg1: i32) -> (i32, i32, i32) {
    %c0_i32 = arith.constant 0 : i32
    %c0_i32_0 = arith.constant 0 : i32
    %c0_i32_1 = arith.constant 0 : i32
    %c0_i32_2 = arith.constant 0 : i32
    return %c0_i32, %c0_i32_0, %c0_i32_1 : i32, i32, i32
  }
  func.func @transform_4(%arg0: i32, %arg1: i32) -> (i32, i32) {
    %c0_i32 = arith.constant 0 : i32
    %c0_i32_0 = arith.constant 0 : i32
    %c0_i32_1 = arith.constant 0 : i32
    return %c0_i32, %c0_i32_0 : i32, i32
  }
  func.func @transform_5(%arg0: i32, %arg1: i32) -> (i32, i32) {
    %c0_i32 = arith.constant 0 : i32
    %c0_i32_0 = arith.constant 0 : i32
    %c0_i32_1 = arith.constant 0 : i32
    return %c0_i32, %c0_i32_0 : i32, i32
  }
  func.func @transform_6(%arg0: i32, %arg1: i32) -> (i32, i32) {
    %c0_i32 = arith.constant 0 : i32
    %c0_i32_0 = arith.constant 0 : i32
    %c0_i32_1 = arith.constant 0 : i32
    return %c0_i32, %c0_i32_0 : i32, i32
  }
  func.func @transform_7(%arg0: i32, %arg1: i32) -> (i32, i32, i32, i32) {
    %c0_i32 = arith.constant 0 : i32
    %c0_i32_0 = arith.constant 0 : i32
    %c0_i32_1 = arith.constant 0 : i32
    return %arg0, %arg1, %c0_i32, %c0_i32_0 : i32, i32, i32, i32
  }
}

module attributes {stable_mosaic.version = 11 : i64} {
  func.func @_conv3x3_relu_bn_kernel(%arg0: i32, %arg1: i32, %arg2: memref<1x16x18x128xbf16, #tpu.memory_space<vmem>>, %arg3: memref<1x1x18x128xbf16, #tpu.memory_space<vmem>>, %arg4: memref<1x1x18x128xbf16, #tpu.memory_space<vmem>>, %arg5: memref<3x384x128xbf16, #tpu.memory_space<vmem>>, %arg6: memref<1x128xf32, #tpu.memory_space<vmem>>, %arg7: memref<1x128xf32, #tpu.memory_space<vmem>>, %arg8: memref<1x128xf32, #tpu.memory_space<vmem>>, %arg9: memref<1x16x18x128xbf16, #tpu.memory_space<vmem>>) attributes {dimension_semantics = [#tpu.dimension_semantics<parallel>, #tpu.dimension_semantics<parallel>], iteration_bounds = array<i64: 2, 1>, scalar_prefetch = 0 : i64, scratch_operands = 0 : i64, tpu.core_type = #tpu.core_type<tc>, window_params = [{transform_indices = @transform_0, window_bounds = array<i64: 1, 16, 18, 128>}, {transform_indices = @transform_1, window_bounds = array<i64: 1, 1, 18, 128>}, {transform_indices = @transform_2, window_bounds = array<i64: 1, 1, 18, 128>}, {pipeline_mode = #tpu.pipeline_mode<synchronous>, transform_indices = @transform_3, window_bounds = array<i64: 3, 384, 128>}, {pipeline_mode = #tpu.pipeline_mode<synchronous>, transform_indices = @transform_4, window_bounds = array<i64: 1, 128>}, {pipeline_mode = #tpu.pipeline_mode<synchronous>, transform_indices = @transform_5, window_bounds = array<i64: 1, 128>}, {pipeline_mode = #tpu.pipeline_mode<synchronous>, transform_indices = @transform_6, window_bounds = array<i64: 1, 128>}, {transform_indices = @transform_7, window_bounds = array<i64: 1, 16, 18, 128>}]} {
    %c0_i32 = arith.constant 0 : i32
    %0 = arith.cmpi sgt, %arg1, %c0_i32 : i32
    %cst = arith.constant 1.000000e+00 : f32
    %cst_0 = arith.constant 0.000000e+00 : f32
    %1 = arith.select %0, %cst, %cst_0 : f32
    %2 = arith.truncf %1 : f32 to bf16
    %c0_i32_1 = arith.constant 0 : i32
    %3 = arith.cmpi slt, %arg1, %c0_i32_1 : i32
    %cst_2 = arith.constant 1.000000e+00 : f32
    %cst_3 = arith.constant 0.000000e+00 : f32
    %4 = arith.select %3, %cst_2, %cst_3 : f32
    %5 = arith.truncf %4 : f32 to bf16
    %c0 = arith.constant 0 : index
    %c0_4 = arith.constant 0 : index
    %c0_5 = arith.constant 0 : index
    %c0_6 = arith.constant 0 : index
    %6 = vector.load %arg3[%c0, %c0_4, %c0_5, %c0_6] : memref<1x1x18x128xbf16, #tpu.memory_space<vmem>>, vector<1x1x18x128xbf16>
    %7 = vector.shape_cast %6 : vector<1x1x18x128xbf16> to vector<1x18x128xbf16>
    %8 = vector.broadcast %2 : bf16 to vector<1x18x128xbf16>
    %9 = arith.mulf %7, %8 : vector<1x18x128xbf16>
    %c0_7 = arith.constant 0 : index
    %c0_8 = arith.constant 0 : index
    %c0_9 = arith.constant 0 : index
    %c0_10 = arith.constant 0 : index
    %10 = vector.load %arg2[%c0_7, %c0_8, %c0_9, %c0_10] : memref<1x16x18x128xbf16, #tpu.memory_space<vmem>>, vector<1x16x18x128xbf16>
    %11 = vector.shape_cast %10 : vector<1x16x18x128xbf16> to vector<16x18x128xbf16>
    %c0_11 = arith.constant 0 : index
    %c0_12 = arith.constant 0 : index
    %c0_13 = arith.constant 0 : index
    %c0_14 = arith.constant 0 : index
    %12 = vector.load %arg4[%c0_11, %c0_12, %c0_13, %c0_14] : memref<1x1x18x128xbf16, #tpu.memory_space<vmem>>, vector<1x1x18x128xbf16>
    %13 = vector.shape_cast %12 : vector<1x1x18x128xbf16> to vector<1x18x128xbf16>
    %14 = vector.broadcast %5 : bf16 to vector<1x18x128xbf16>
    %15 = arith.mulf %13, %14 : vector<1x18x128xbf16>
    %16 = tpu.concatenate %9, %11, %15 in 0 : vector<1x18x128xbf16>, vector<16x18x128xbf16>, vector<1x18x128xbf16> -> vector<18x18x128xbf16>
    %17 = vector.extract_strided_slice %16 {offsets = [0, 0, 0], sizes = [18, 16, 128], strides = [1, 1, 1]} : vector<18x18x128xbf16> to vector<18x16x128xbf16>
    %18 = vector.extract_strided_slice %16 {offsets = [0, 1, 0], sizes = [18, 16, 128], strides = [1, 1, 1]} : vector<18x18x128xbf16> to vector<18x16x128xbf16>
    %19 = vector.extract_strided_slice %16 {offsets = [0, 2, 0], sizes = [18, 16, 128], strides = [1, 1, 1]} : vector<18x18x128xbf16> to vector<18x16x128xbf16>
    %20 = tpu.concatenate %17, %18, %19 in 2 : vector<18x16x128xbf16>, vector<18x16x128xbf16>, vector<18x16x128xbf16> -> vector<18x16x384xbf16>
    %21 = vector.shape_cast %20 : vector<18x16x384xbf16> to vector<288x384xbf16>
    %cst_15 = arith.constant 0.000000e+00 : f32
    %22 = vector.broadcast %cst_15 : f32 to vector<256x128xf32>
    %23 = vector.extract_strided_slice %21 {offsets = [0, 0], sizes = [256, 384], strides = [1, 1]} : vector<288x384xbf16> to vector<256x384xbf16>
    %c0_16 = arith.constant 0 : index
    %c0_17 = arith.constant 0 : index
    %c0_18 = arith.constant 0 : index
    %24 = vector.load %arg5[%c0_16, %c0_17, %c0_18] : memref<3x384x128xbf16, #tpu.memory_space<vmem>>, vector<1x384x128xbf16>
    %25 = vector.shape_cast %24 : vector<1x384x128xbf16> to vector<384x128xbf16>
    %cst_19 = arith.constant dense<0.000000e+00> : vector<256x128xf32>
    %26 = tpu.matmul %23, %25, %cst_19 {dimension_numbers = #tpu.dot_dimension_numbers<[1], [0], [0], [1], [0, 0, 1, 1], [], []>} : vector<256x384xbf16>, vector<384x128xbf16>, vector<256x128xf32> -> vector<256x128xf32>
    %27 = arith.addf %22, %26 : vector<256x128xf32>
    %28 = vector.extract_strided_slice %21 {offsets = [16, 0], sizes = [256, 384], strides = [1, 1]} : vector<288x384xbf16> to vector<256x384xbf16>
    %c1 = arith.constant 1 : index
    %c0_20 = arith.constant 0 : index
    %c0_21 = arith.constant 0 : index
    %29 = vector.load %arg5[%c1, %c0_20, %c0_21] : memref<3x384x128xbf16, #tpu.memory_space<vmem>>, vector<1x384x128xbf16>
    %30 = vector.shape_cast %29 : vector<1x384x128xbf16> to vector<384x128xbf16>
    %cst_22 = arith.constant dense<0.000000e+00> : vector<256x128xf32>
    %31 = tpu.matmul %28, %30, %cst_22 {dimension_numbers = #tpu.dot_dimension_numbers<[1], [0], [0], [1], [0, 0, 1, 1], [], []>} : vector<256x384xbf16>, vector<384x128xbf16>, vector<256x128xf32> -> vector<256x128xf32>
    %32 = arith.addf %27, %31 : vector<256x128xf32>
    %33 = vector.extract_strided_slice %21 {offsets = [32, 0], sizes = [256, 384], strides = [1, 1]} : vector<288x384xbf16> to vector<256x384xbf16>
    %c2 = arith.constant 2 : index
    %c0_23 = arith.constant 0 : index
    %c0_24 = arith.constant 0 : index
    %34 = vector.load %arg5[%c2, %c0_23, %c0_24] : memref<3x384x128xbf16, #tpu.memory_space<vmem>>, vector<1x384x128xbf16>
    %35 = vector.shape_cast %34 : vector<1x384x128xbf16> to vector<384x128xbf16>
    %cst_25 = arith.constant dense<0.000000e+00> : vector<256x128xf32>
    %36 = tpu.matmul %33, %35, %cst_25 {dimension_numbers = #tpu.dot_dimension_numbers<[1], [0], [0], [1], [0, 0, 1, 1], [], []>} : vector<256x384xbf16>, vector<384x128xbf16>, vector<256x128xf32> -> vector<256x128xf32>
    %37 = arith.addf %32, %36 : vector<256x128xf32>
    %c0_26 = arith.constant 0 : index
    %c0_27 = arith.constant 0 : index
    %38 = vector.load %arg6[%c0_26, %c0_27] : memref<1x128xf32, #tpu.memory_space<vmem>>, vector<1x128xf32>
    %39 = vector.broadcast %38 : vector<1x128xf32> to vector<256x128xf32>
    %40 = arith.addf %37, %39 : vector<256x128xf32>
    %cst_28 = arith.constant 0.000000e+00 : f32
    %41 = vector.broadcast %cst_28 : f32 to vector<256x128xf32>
    %42 = arith.maximumf %40, %41 : vector<256x128xf32>
    %c0_29 = arith.constant 0 : index
    %c0_30 = arith.constant 0 : index
    %43 = vector.load %arg7[%c0_29, %c0_30] : memref<1x128xf32, #tpu.memory_space<vmem>>, vector<1x128xf32>
    %44 = vector.broadcast %43 : vector<1x128xf32> to vector<256x128xf32>
    %45 = arith.mulf %42, %44 : vector<256x128xf32>
    %c0_31 = arith.constant 0 : index
    %c0_32 = arith.constant 0 : index
    %46 = vector.load %arg8[%c0_31, %c0_32] : memref<1x128xf32, #tpu.memory_space<vmem>>, vector<1x128xf32>
    %47 = vector.broadcast %46 : vector<1x128xf32> to vector<256x128xf32>
    %48 = arith.addf %45, %47 : vector<256x128xf32>
    %49 = vector.shape_cast %48 : vector<256x128xf32> to vector<16x16x128xf32>
    %50 = arith.truncf %49 : vector<16x16x128xf32> to vector<16x16x128xbf16>
    %cst_33 = arith.constant 0.000000e+00 : bf16
    %51 = vector.broadcast %cst_33 : bf16 to vector<16x1x128xbf16>
    %c0_34 = arith.constant 0 : index
    %c0_35 = arith.constant 0 : index
    %c0_36 = arith.constant 0 : index
    %c0_37 = arith.constant 0 : index
    %52 = vector.load %arg9[%c0_34, %c0_35, %c0_36, %c0_37] : memref<1x16x18x128xbf16, #tpu.memory_space<vmem>>, vector<1x16x1x128xbf16>
    %53 = vector.shape_cast %52 : vector<1x16x1x128xbf16> to vector<16x1x128xbf16>
    %54 = vector.shape_cast %51 : vector<16x1x128xbf16> to vector<1x16x1x128xbf16>
    tpu.vector_store %arg9[%c0_34, %c0_35, %c0_36, %c0_37], %54 {strides = array<i32>} : memref<1x16x18x128xbf16, #tpu.memory_space<vmem>>, vector<1x16x1x128xbf16>,
    %c0_38 = arith.constant 0 : index
    %c0_39 = arith.constant 0 : index
    %c17 = arith.constant 17 : index
    %c0_40 = arith.constant 0 : index
    %55 = vector.load %arg9[%c0_38, %c0_39, %c17, %c0_40] : memref<1x16x18x128xbf16, #tpu.memory_space<vmem>>, vector<1x16x1x128xbf16>
    %56 = vector.shape_cast %55 : vector<1x16x1x128xbf16> to vector<16x1x128xbf16>
    %57 = vector.shape_cast %51 : vector<16x1x128xbf16> to vector<1x16x1x128xbf16>
    tpu.vector_store %arg9[%c0_38, %c0_39, %c17, %c0_40], %57 {strides = array<i32>} : memref<1x16x18x128xbf16, #tpu.memory_space<vmem>>, vector<1x16x1x128xbf16>,
    %c0_41 = arith.constant 0 : index
    %c0_42 = arith.constant 0 : index
    %c1_43 = arith.constant 1 : index
    %c0_44 = arith.constant 0 : index
    %58 = vector.load %arg9[%c0_41, %c0_42, %c1_43, %c0_44] : memref<1x16x18x128xbf16, #tpu.memory_space<vmem>>, vector<1x16x16x128xbf16>
    %59 = vector.shape_cast %58 : vector<1x16x16x128xbf16> to vector<16x16x128xbf16>
    %60 = vector.shape_cast %50 : vector<16x16x128xbf16> to vector<1x16x16x128xbf16>
    tpu.vector_store %arg9[%c0_41, %c0_42, %c1_43, %c0_44], %60 {strides = array<i32>} : memref<1x16x18x128xbf16, #tpu.memory_space<vmem>>, vector<1x16x16x128xbf16>,
    return
  }
  func.func @transform_0(%arg0: i32, %arg1: i32) -> (i32, i32, i32, i32) {
    %c0_i32 = arith.constant 0 : i32
    %c0_i32_0 = arith.constant 0 : i32
    %c0_i32_1 = arith.constant 0 : i32
    return %arg0, %arg1, %c0_i32, %c0_i32_0 : i32, i32, i32, i32
  }
  func.func @transform_1(%arg0: i32, %arg1: i32) -> (i32, i32, i32, i32) {
    %c16_i32 = arith.constant 16 : i32
    %0 = arith.muli %arg1, %c16_i32 : i32
    %c1_i32 = arith.constant 1 : i32
    %1 = arith.subi %0, %c1_i32 : i32
    %c0_i32 = arith.constant 0 : i32
    %2 = arith.maxsi %1, %c0_i32 : i32
    %c0_i32_0 = arith.constant 0 : i32
    %c0_i32_1 = arith.constant 0 : i32
    %c0_i32_2 = arith.constant 0 : i32
    return %arg0, %2, %c0_i32_0, %c0_i32_1 : i32, i32, i32, i32
  }
  func.func @transform_2(%arg0: i32, %arg1: i32) -> (i32, i32, i32, i32) {
    %c16_i32 = arith.constant 16 : i32
    %0 = arith.muli %arg1, %c16_i32 : i32
    %c16_i32_0 = arith.constant 16 : i32
    %1 = arith.addi %0, %c16_i32_0 : i32
    %c15_i32 = arith.constant 15 : i32
    %2 = arith.minsi %1, %c15_i32 : i32
    %c0_i32 = arith.constant 0 : i32
    %c0_i32_1 = arith.constant 0 : i32
    %c0_i32_2 = arith.constant 0 : i32
    return %arg0, %2, %c0_i32, %c0_i32_1 : i32, i32, i32, i32
  }
  func.func @transform_3(%arg0: i32, %arg1: i32) -> (i32, i32, i32) {
    %c0_i32 = arith.constant 0 : i32
    %c0_i32_0 = arith.constant 0 : i32
    %c0_i32_1 = arith.constant 0 : i32
    %c0_i32_2 = arith.constant 0 : i32
    return %c0_i32, %c0_i32_0, %c0_i32_1 : i32, i32, i32
  }
  func.func @transform_4(%arg0: i32, %arg1: i32) -> (i32, i32) {
    %c0_i32 = arith.constant 0 : i32
    %c0_i32_0 = arith.constant 0 : i32
    %c0_i32_1 = arith.constant 0 : i32
    return %c0_i32, %c0_i32_0 : i32, i32
  }
  func.func @transform_5(%arg0: i32, %arg1: i32) -> (i32, i32) {
    %c0_i32 = arith.constant 0 : i32
    %c0_i32_0 = arith.constant 0 : i32
    %c0_i32_1 = arith.constant 0 : i32
    return %c0_i32, %c0_i32_0 : i32, i32
  }
  func.func @transform_6(%arg0: i32, %arg1: i32) -> (i32, i32) {
    %c0_i32 = arith.constant 0 : i32
    %c0_i32_0 = arith.constant 0 : i32
    %c0_i32_1 = arith.constant 0 : i32
    return %c0_i32, %c0_i32_0 : i32, i32
  }
  func.func @transform_7(%arg0: i32, %arg1: i32) -> (i32, i32, i32, i32) {
    %c0_i32 = arith.constant 0 : i32
    %c0_i32_0 = arith.constant 0 : i32
    %c0_i32_1 = arith.constant 0 : i32
    return %arg0, %arg1, %c0_i32, %c0_i32_0 : i32, i32, i32, i32
  }
}

</mosaic_0001>

<bundles_post_ra>
// kernel: tile.8
= control target key start
LH: loop header
LB: loop body
LE: loop exit
PB: predicated region body
PF: predicated region fallthrough
CT: control target
= control target key end

     0   :  { %s22_s0 = inlined_call_operand.vmem [shape: f32[128], index: 0, kind: input, shape index: {}]   ;;  %s23_s1 = inlined_call_operand.vmem [shape: f32[4,128], index: 1, kind: output, shape index: {}]  }
   0x1   :  { %v4_v0 = vld [vmem:[%s22_s0] ss:$0 sm:$0xff] }
   0x2   :  { %5 = vst [vmem:[%s23_s1] sm:$0xf] %v4_v0 }

// kernel: up_block_forward.3
= control target key start
LH: loop header
LB: loop body
LE: loop exit
PB: predicated region body
PF: predicated region fallthrough
CT: control target
= control target key end

     0   :  { %s1045_s12 = smov 0   ;;  %s1047_s13 = smov 0   ;;  %s1257_s0 = inlined_call_operand.vmem [shape: bf16[2,8,8,128], index: 0, kind: input, shape index: {}]   ;;  %s1258_s1 = inlined_call_operand.vmem [shape: bf16[128,512], index: 1, kind: input, shape index: {}]   ;;  %s1259_s2 = inlined_call_operand.vmem [shape: f32[1,512], index: 2, kind: input, shape index: {}]   ;;  %s1260_s3 = inlined_call_operand.vmem [shape: bf16[2,8,8,512], index: 3, kind: output, shape index: {}]  }
   0x1   :  { %s1049_s14 = smov 0  }
   0x2 LB: > { %s25_s15 = sadd.s32 1, %s1018_s13  ;;  %p846_p0 = scmp.ge.s32.totalorder %s1022_s14, 1  ;;  %s1022_s14 = sphi %s1049_s14, %s13_s14   ;;  %s1018_s13 = sphi %s1047_s13, %s1262_s13   ;;  %s1014_s12 = sphi %s1045_s12, %s1261_s12  }
   0x3   : > { %p27_p1 = scmp.ge.s32.totalorder %s25_s15, 2  ;;  %p158_p2 = scmp.lt.s32.totalorder %s1022_s14, 3 }
   0x5   : > { %s1264_s15 = smov (%p27_p1, %s25_s15), 0  ;;  %p159_p3 = pnand %p846_p0, %p158_p2 }
   0x6   : > { %v948_v0 = vld [vmem:[%s1258_s1 + $0x4] ss:$16 sps:$4 sm:$0xff] (!%p159_p3)   ;;  %v950_v1 = vld [vmem:[%s1258_s1 + $0xc] ss:$16 sps:$4 sm:$0xff] (!%p159_p3)   ;;  %v1024_v2 = vmov (!%p159_p3), 0   ;;  %p192_p4 = scmp.lt.s32.totalorder (!%p159_p3), %s1014_s12, 1  ;;  %v255_v37 = vlaneseq (!%p159_p3) }
   0x7   : > { %162 = sbr.rel (%p159_p3) target bundleno = 284 (0x11c), region = 32  ;;  %491 = vmatprep.mubr.bf16.mxu0 (!%p159_p3), %v1024_v2  ;;  %564 = vmatprep.mubr.bf16.mxu1 (!%p159_p3), %v1024_v2  ;;  %v952_v3 = vld [vmem:[%s1258_s1] ss:$16 sps:$4 sm:$0xff] (!%p159_p3)   ;;  %v953_v4 = vld [vmem:[%s1258_s1 + $0x8] ss:$16 sps:$4 sm:$0xff] (!%p159_p3)  }
   0x8   : > { %459 = vmatprep.subr.bf16.mxu0 (!%p159_p3), %v948_v0  ;;  %532 = vmatprep.subr.bf16.mxu1 (!%p159_p3), %v950_v1  ;;  %v954_v5 = vld [vmem:[%s1258_s1 + $0x24] ss:$16 sps:$4 sm:$0xff] (!%p159_p3)   ;;  %v956_v6 = vld [vmem:[%s1258_s1 + $0x2c] ss:$16 sps:$4 sm:$0xff] (!%p159_p3)   ;;  %v958_v7 = vld [vmem:[%s1258_s1 + $0x20] ss:$16 sps:$4 sm:$0xff] (!%p159_p3)  }
   0x9   : > { %460 = vmatpush1.bf16.msra.mxu0 (!%p159_p3), %v952_v3  ;;  %533 = vmatpush1.bf16.msra.mxu1 (!%p159_p3), %v953_v4  ;;  %v959_v8 = vld [vmem:[%s1258_s1 + $0x28] ss:$16 sps:$4 sm:$0xff] (!%p159_p3)   ;;  %v960_v9 = vld [vmem:[%s1258_s1 + $0x44] ss:$16 sps:$4 sm:$0xff] (!%p159_p3)   ;;  %v962_v10 = vld [vmem:[%s1258_s1 + $0x4c] ss:$16 sps:$4 sm:$0xff] (!%p159_p3)  }
   0xa   : > { %461 = vmatprep.subr.bf16.mxu0 (!%p159_p3), %v954_v5  ;;  %534 = vmatprep.subr.bf16.mxu1 (!%p159_p3), %v956_v6  ;;  %v964_v11 = vld [vmem:[%s1258_s1 + $0x40] ss:$16 sps:$4 sm:$0xff] (!%p159_p3)   ;;  %v965_v12 = vld [vmem:[%s1258_s1 + $0x48] ss:$16 sps:$4 sm:$0xff] (!%p159_p3)   ;;  %v966_v13 = vld [vmem:[%s1258_s1 + $0x64] ss:$16 sps:$4 sm:$0xff] (!%p159_p3)  }
   0xb   : > { %v968_v14 = vld [vmem:[%s1258_s1 + $0x6c] ss:$16 sps:$4 sm:$0xff] (!%p159_p3)   ;;  %v970_v15 = vld [vmem:[%s1258_s1 + $0x60] ss:$16 sps:$4 sm:$0xff] (!%p159_p3)   ;;  %v971_v16 = vld [vmem:[%s1258_s1 + $0x68] ss:$16 sps:$4 sm:$0xff] (!%p159_p3)  }
   0xc   : > { %v972_v17 = vld [vmem:[%s1258_s1 + $0x84] ss:$16 sps:$4 sm:$0xff] (!%p159_p3)   ;;  %v974_v18 = vld [vmem:[%s1258_s1 + $0x8c] ss:$16 sps:$4 sm:$0xff] (!%p159_p3)   ;;  %v976_v19 = vld [vmem:[%s1258_s1 + $0x80] ss:$16 sps:$4 sm:$0xff] (!%p159_p3)  }
   0xd   : > { %462 = vmatpush1.bf16.msra.mxu0 (!%p159_p3), %v958_v7  ;;  %535 = vmatpush1.bf16.msra.mxu1 (!%p159_p3), %v959_v8  ;;  %v977_v20 = vld [vmem:[%s1258_s1 + $0x88] ss:$16 sps:$4 sm:$0xff] (!%p159_p3)   ;;  %v978_v21 = vld [vmem:[%s1258_s1 + $0xa4] ss:$16 sps:$4 sm:$0xff] (!%p159_p3)   ;;  %v980_v22 = vld [vmem:[%s1258_s1 + $0xac] ss:$16 sps:$4 sm:$0xff] (!%p159_p3)  }
   0xe   : > { %463 = vmatprep.subr.bf16.mxu0 %v960_v9  ;;  %536 = vmatprep.subr.bf16.mxu1 %v962_v10  ;;  %s1266_s12 = smov (!%p192_p4, %s1014_s12), 1  ;;  %v982_v23 = vld [vmem:[%s1258_s1 + $0xa0] ss:$16 sps:$4 sm:$0xff]   ;;  %v983_v24 = vld [vmem:[%s1258_s1 + $0xa8] ss:$16 sps:$4 sm:$0xff]   ;;  %v256_v38 = vshrl.u32 %v255_v37, 7 }
   0xf   : > { %s905_s10 = sshll.u32 %s1266_s12, 5  ;;  %v984_v25 = vld [vmem:[%s1258_s1 + $0xc4] ss:$16 sps:$4 sm:$0xff]   ;;  %v986_v26 = vld [vmem:[%s1258_s1 + $0xcc] ss:$16 sps:$4 sm:$0xff]   ;;  %s906_s17 = sshll.u32 %s1266_s12, 7 }
  0x10   : > { %s1150_s23 = scalar_lea.vmem %s1257_s0, %s905_s10  ;;  %v988_v27 = vld [vmem:[%s1258_s1 + $0xc0] ss:$16 sps:$4 sm:$0xff]   ;;  %v989_v28 = vld [vmem:[%s1258_s1 + $0xc8] ss:$16 sps:$4 sm:$0xff]   ;;  %v990_v29 = vld [vmem:[%s1258_s1 + $0xe4] ss:$16 sps:$4 sm:$0xff]   ;;  %s1202_s20 = scalar_lea.vmem %s1260_s3, %s906_s17 }
  0x11   : > { %464 = vmatpush1.bf16.msra.mxu0 %v964_v11  ;;  %537 = vmatpush1.bf16.msra.mxu1 %v965_v12  ;;  %v992_v30 = vld [vmem:[%s1258_s1 + $0xec] ss:$16 sps:$4 sm:$0xff]   ;;  %v994_v31 = vld [vmem:[%s1258_s1 + $0xe0] ss:$16 sps:$4 sm:$0xff]   ;;  %v995_v32 = vld [vmem:[%s1258_s1 + $0xe8] ss:$16 sps:$4 sm:$0xff]  }
  0x12   : > { %465 = vmatprep.subr.bf16.mxu0 %v966_v13  ;;  %538 = vmatprep.subr.bf16.mxu1 %v968_v14  ;;  %v996_v33 = vld [vmem:[%s1150_s23] sm:$0xff]   ;;  %v997_v34 = vld [vmem:[%s1150_s23 + $0x8] sm:$0xff]   ;;  %v998_v35 = vld [vmem:[%s1150_s23 + $0x10] sm:$0xff]   ;;  %v257_v39 = vsub.s32 0, %v256_v38  ;;  %v265_v40 = vsub.s32 2, %v256_v38  ;;  %v261_v42 = vsub.s32 1, %v256_v38 }
  0x13   : > { %v999_v36 = vld [vmem:[%s1150_s23 + $0x18] sm:$0xff]   ;;  %v253_v41 = vld [vmem:[%s1259_s2] sm:$0xf]  ;;  %v269_v43 = vsub.s32 3, %v256_v38 }
  0x14   : > { %v1186_v44 = vrot.slane %v253_v41, %v257_v39  ;;  %v1188_v45 = vrot.slane %v253_v41, %v265_v40  ;;  %v1190_v46 = vrot.slane %v253_v41, %v261_v42 }
  0x15   : > { %466 = vmatpush1.bf16.msra.mxu0 %v970_v15  ;;  %539 = vmatpush1.bf16.msra.mxu1 %v971_v16  ;;  %v1192_v47 = vrot.slane %v253_v41, %v269_v43 }
  0x16   : > { %467 = vmatprep.subr.bf16.mxu0 %v972_v17  ;;  %540 = vmatprep.subr.bf16.mxu1 %v974_v18 }
  0x19   : > { %468 = vmatpush1.bf16.msra.mxu0 %v976_v19  ;;  %541 = vmatpush1.bf16.msra.mxu1 %v977_v20 }
  0x1a   : > { %469 = vmatprep.subr.bf16.mxu0 %v978_v21  ;;  %542 = vmatprep.subr.bf16.mxu1 %v980_v22 }
  0x1d   : > { %470 = vmatpush1.bf16.msra.mxu0 %v982_v23  ;;  %543 = vmatpush1.bf16.msra.mxu1 %v983_v24 }
  0x1e   : > { %471 = vmatprep.subr.bf16.mxu0 %v984_v25  ;;  %544 = vmatprep.subr.bf16.mxu1 %v986_v26 }
  0x21   : > { %472 = vmatpush1.bf16.msra.mxu0 %v988_v27  ;;  %545 = vmatpush1.bf16.msra.mxu1 %v989_v28 }
  0x22   : > { %473 = vmatprep.subr.bf16.mxu0 %v990_v29  ;;  %546 = vmatprep.subr.bf16.mxu1 %v992_v30 }
  0x25   : > { %474 = vmatpush1.bf16.msra.mxu0 %v994_v31  ;;  %547 = vmatpush1.bf16.msra.mxu1 %v995_v32 }
  0x28   : > { %492 = vmatmul.mubr.bf16.vlgmr.msra.gmra.mrb[0].mxu0 %v996_v33  ;;  %565 = vmatmul.mubr.bf16.vlgmr.msra.gmra.mrb[0].mxu1 %v996_v33 }
  0x29   : > { %501 = vmatprep.mubr.bf16.mxu0 %v1024_v2  ;;  %574 = vmatprep.mubr.bf16.mxu1 %v1024_v2 }
  0x30   : > { %502 = vmatmul.mubr.bf16.gmra.mrb[4].mxu0 %v997_v34  ;;  %575 = vmatmul.mubr.bf16.gmra.mrb[4].mxu1 %v997_v34 }
  0x31   : > { %511 = vmatprep.mubr.bf16.mxu0 %v1024_v2  ;;  %584 = vmatprep.mubr.bf16.mxu1 %v1024_v2 }
  0x38   : > { %512 = vmatmul.mubr.bf16.gmra.mrb[8].mxu0 %v998_v35  ;;  %585 = vmatmul.mubr.bf16.gmra.mrb[8].mxu1 %v998_v35 }
  0x39   : > { %521 = vmatprep.mubr.bf16.mxu0 %v1024_v2  ;;  %594 = vmatprep.mubr.bf16.mxu1 %v1024_v2 }
  0x40   : > { %522 = vmatmul.mubr.bf16.gmra.mrb[12].mxu0 %v999_v36  ;;  %595 = vmatmul.mubr.bf16.gmra.mrb[12].mxu1 %v999_v36 }
  0xfb   : > { %v493_v48 = vpop.f32.mrb[0].mxu0  ;;  %v566_v49 = vpop.f32.mrb[0].mxu1 }
  0xfc   : > { %v494_v50 = vadd.f32 %v493_v48, %v1186_v44  ;;  %v567_v51 = vadd.f32 %v566_v49, %v1188_v45  ;;  %v495_v52 = vpop.f32.mrb[1].mxu0  ;;  %v568_v53 = vpop.f32.mrb[1].mxu1 }
  0xfd   : > { %v496_v54 = vadd.f32 %v495_v52, %v1190_v46  ;;  %v569_v55 = vadd.f32 %v568_v53, %v1192_v47  ;;  %v497_v56 = vpop.f32.mrb[2].mxu0  ;;  %v570_v57 = vpop.f32.mrb[2].mxu1 }
  0xfe   : > { %v498_v58 = vadd.f32 %v497_v56, %v1186_v44  ;;  %v571_v59 = vadd.f32 %v570_v57, %v1188_v45  ;;  %v499_v60 = vpop.f32.mrb[3].mxu0  ;;  %v572_v61 = vpop.f32.mrb[3].mxu1 }
  0xff   : > { %v907_v62 = vpack.c.bf16 %v496_v54, %v494_v50  ;;  %v908_v63 = vpack.c.bf16 %v569_v55, %v567_v51  ;;  %v500_v0 = vadd.f32 %v499_v60, %v1190_v46  ;;  %v573_v1 = vadd.f32 %v572_v61, %v1192_v47 }
 0x101   : > { %733 = vst [vmem:[%s1202_s20] sm:$0xff] %v907_v62  ;;  %734 = vst [vmem:[%s1202_s20 + $0x8] sm:$0xff] %v908_v63  ;;  %v909_v2 = vpack.c.bf16 %v500_v0, %v498_v58  ;;  %v910_v3 = vpack.c.bf16 %v573_v1, %v571_v59 }
 0x103   : > { %735 = vst [vmem:[%s1202_s20 + $0x10] sm:$0xff] %v909_v2  ;;  %736 = vst [vmem:[%s1202_s20 + $0x18] sm:$0xff] %v910_v3  ;;  %v503_v4 = vpop.f32.mrb[4].mxu0  ;;  %v576_v5 = vpop.f32.mrb[4].mxu1 }
 0x104   : > { %v504_v6 = vadd.f32 %v503_v4, %v1186_v44  ;;  %v577_v7 = vadd.f32 %v576_v5, %v1188_v45  ;;  %v505_v8 = vpop.f32.mrb[5].mxu0  ;;  %v578_v9 = vpop.f32.mrb[5].mxu1 }
 0x105   : > { %v506_v10 = vadd.f32 %v505_v8, %v1190_v46  ;;  %v579_v11 = vadd.f32 %v578_v9, %v1192_v47  ;;  %v507_v12 = vpop.f32.mrb[6].mxu0  ;;  %v580_v13 = vpop.f32.mrb[6].mxu1 }
 0x106   : > { %v508_v14 = vadd.f32 %v507_v12, %v1186_v44  ;;  %v581_v15 = vadd.f32 %v580_v13, %v1188_v45  ;;  %v509_v16 = vpop.f32.mrb[7].mxu0  ;;  %v582_v17 = vpop.f32.mrb[7].mxu1 }
 0x107   : > { %v911_v18 = vpack.c.bf16 %v506_v10, %v504_v6  ;;  %v912_v19 = vpack.c.bf16 %v579_v11, %v577_v7  ;;  %v510_v20 = vadd.f32 %v509_v16, %v1190_v46  ;;  %v583_v21 = vadd.f32 %v582_v17, %v1192_v47 }
 0x109   : > { %737 = vst [vmem:[%s1202_s20 + $0x20] sm:$0xff] %v911_v18  ;;  %738 = vst [vmem:[%s1202_s20 + $0x28] sm:$0xff] %v912_v19  ;;  %v913_v22 = vpack.c.bf16 %v510_v20, %v508_v14  ;;  %v914_v23 = vpack.c.bf16 %v583_v21, %v581_v15 }
 0x10b   : > { %739 = vst [vmem:[%s1202_s20 + $0x30] sm:$0xff] %v913_v22  ;;  %740 = vst [vmem:[%s1202_s20 + $0x38] sm:$0xff] %v914_v23  ;;  %v513_v24 = vpop.f32.mrb[8].mxu0  ;;  %v586_v25 = vpop.f32.mrb[8].mxu1 }
 0x10c   : > { %v514_v26 = vadd.f32 %v513_v24, %v1186_v44  ;;  %v587_v27 = vadd.f32 %v586_v25, %v1188_v45  ;;  %v515_v28 = vpop.f32.mrb[9].mxu0  ;;  %v588_v29 = vpop.f32.mrb[9].mxu1 }
 0x10d   : > { %v516_v30 = vadd.f32 %v515_v28, %v1190_v46  ;;  %v589_v31 = vadd.f32 %v588_v29, %v1192_v47  ;;  %v517_v32 = vpop.f32.mrb[10].mxu0  ;;  %v590_v33 = vpop.f32.mrb[10].mxu1 }
 0x10e   : > { %v518_v34 = vadd.f32 %v517_v32, %v1186_v44  ;;  %v591_v35 = vadd.f32 %v590_v33, %v1188_v45  ;;  %v519_v36 = vpop.f32.mrb[11].mxu0  ;;  %v592_v37 = vpop.f32.mrb[11].mxu1 }
 0x10f   : > { %v915_v38 = vpack.c.bf16 %v516_v30, %v514_v26  ;;  %v916_v39 = vpack.c.bf16 %v589_v31, %v587_v27  ;;  %v520_v40 = vadd.f32 %v519_v36, %v1190_v46  ;;  %v593_v41 = vadd.f32 %v592_v37, %v1192_v47 }
 0x111   : > { %741 = vst [vmem:[%s1202_s20 + $0x40] sm:$0xff] %v915_v38  ;;  %742 = vst [vmem:[%s1202_s20 + $0x48] sm:$0xff] %v916_v39  ;;  %v917_v42 = vpack.c.bf16 %v520_v40, %v518_v34  ;;  %v918_v43 = vpack.c.bf16 %v593_v41, %v591_v35 }
 0x113   : > { %743 = vst [vmem:[%s1202_s20 + $0x50] sm:$0xff] %v917_v42  ;;  %744 = vst [vmem:[%s1202_s20 + $0x58] sm:$0xff] %v918_v43  ;;  %v523_v48 = vpop.f32.mrb[12].mxu0  ;;  %v596_v49 = vpop.f32.mrb[12].mxu1 }
 0x114   : > { %v524_v50 = vadd.f32 %v523_v48, %v1186_v44  ;;  %v597_v51 = vadd.f32 %v596_v49, %v1188_v45  ;;  %v525_v52 = vpop.f32.mrb[13].mxu0  ;;  %v598_v53 = vpop.f32.mrb[13].mxu1 }
 0x115   : > { %v526_v54 = vadd.f32 %v525_v52, %v1190_v46  ;;  %v599_v55 = vadd.f32 %v598_v53, %v1192_v47  ;;  %v527_v56 = vpop.f32.mrb[14].mxu0  ;;  %v600_v57 = vpop.f32.mrb[14].mxu1 }
 0x116   : > { %v528_v58 = vadd.f32 %v527_v56, %v1186_v44  ;;  %v601_v59 = vadd.f32 %v600_v57, %v1188_v45  ;;  %v529_v60 = vpop.f32.mrb[15].mxu0  ;;  %v602_v61 = vpop.f32.mrb[15].mxu1 }
 0x117   : > { %v919_v62 = vpack.c.bf16 %v526_v54, %v524_v50  ;;  %v920_v63 = vpack.c.bf16 %v599_v55, %v597_v51  ;;  %v530_v0 = vadd.f32 %v529_v60, %v1190_v46  ;;  %v603_v1 = vadd.f32 %v602_v61, %v1192_v47 }
 0x119   : > { %745 = vst [vmem:[%s1202_s20 + $0x60] sm:$0xff] %v919_v62  ;;  %746 = vst [vmem:[%s1202_s20 + $0x68] sm:$0xff] %v920_v63  ;;  %v921_v2 = vpack.c.bf16 %v530_v0, %v528_v58  ;;  %v922_v3 = vpack.c.bf16 %v603_v1, %v601_v59 }
 0x11b   : > { %747 = vst [vmem:[%s1202_s20 + $0x70] sm:$0xff] %v921_v2  ;;  %748 = vst [vmem:[%s1202_s20 + $0x78] sm:$0xff] %v922_v3 }
 0x11c PF: > { %s13_s14 = sadd.s32 1, %s1022_s14   ;;  %s1261_s12 = smov %s1018_s13 }
 0x11d   : > { %p10_p5 = scmp.ge.s32.totalorder %s13_s14, 4   ;;  %s1262_s13 = smov %s1264_s15 }
 0x11f   :  { %12 = sbr.rel (!%p10_p5) target bundleno = 2 (0x2), region = 62 }

// kernel: up_block_forward.5
= control target key start
LH: loop header
LB: loop body
LE: loop exit
PB: predicated region body
PF: predicated region fallthrough
CT: control target
= control target key end

     0   :  { %s4059_s24 = smov 0   ;;  %s4061_s25 = smov 0   ;;  %s5290_s0 = inlined_call_operand.vmem [shape: bf16[2,16,18,128], index: 0, kind: input, shape index: {}, may-alias: {0,1,2}]   ;;  %s5291_s1 = inlined_call_operand.vmem [shape: bf16[2,16,18,128], index: 1, kind: input, shape index: {}, may-alias: {0,1,2}]   ;;  %s5292_s2 = inlined_call_operand.vmem [shape: bf16[2,16,18,128], index: 2, kind: input, shape index: {}, may-alias: {0,1,2}]   ;;  %s5293_s3 = inlined_call_operand.vmem [shape: bf16[3,384,128], index: 3, kind: input, shape index: {}]   ;;  %s5294_s4 = inlined_call_operand.vmem [shape: f32[1,128], index: 4, kind: input, shape index: {}]   ;;  %s5295_s5 = inlined_call_operand.vmem [shape: f32[1,128], index: 5, kind: input, shape index: {}]   ;;  %s5296_s6 = inlined_call_operand.vmem [shape: f32[1,128], index: 6, kind: input, shape index: {}]   ;;  %s5297_s7 = inlined_call_operand.vmem [shape: f32[2,16,16,4], index: 7, kind: output, shape index: {}]  }
   0x1   :  { %s4063_s26 = smov 0  }
   0x2 LB: > { %s29_s27 = sadd.s32 1, %s4013_s25  ;;  %p2910_p0 = scmp.ge.s32.totalorder %s4017_s26, 1  ;;  %s4017_s26 = sphi %s4063_s26, %s17_s26   ;;  %s4013_s25 = sphi %s4061_s25, %s5306_s25   ;;  %s4009_s24 = sphi %s4059_s24, %s5305_s24  }
   0x3   : > { %p31_p1 = scmp.ge.s32.totalorder %s29_s27, 2  ;;  %p323_p2 = scmp.lt.s32.totalorder %s4017_s26, 3 }
   0x5   : > { %s5308_s27 = smov (%p31_p1, %s29_s27), 0  ;;  %p324_p3 = pnand %p2910_p0, %p323_p2 }
   0x7   : > { %327 = sbr.rel (%p324_p3) target bundleno = 558 (0x22e), region = 48 }
   0xe   : > { %v3883_v0 = vld [vmem:[%s5293_s3 + $0x100] sm:$0xff]   ;;  %p392_p4 = scmp.lt.s32.totalorder %s4009_s24, 1  ;;  %v3886_v3 = vld [vmem:[%s5293_s3 + $0x108] sm:$0xff]   ;;  %v3889_v6 = vld [vmem:[%s5293_s3 + $0x110] sm:$0xff]   ;;  %vm937_vm0 = vcmask 1046528   ;;  %vm2735_vm2 = vcmask 31744  }
   0xf   : > { %v4083_v1 = vld [vmem:[%s5293_s3 + $0x140] sm:$0xff]   ;;  %3128 = vmatprep.subr.bf16.mxu0 %v3883_v0  ;;  %v4098_v4 = vld [vmem:[%s5293_s3 + $0x148] sm:$0xff]   ;;  %v4110_v7 = vld [vmem:[%s5293_s3 + $0x150] sm:$0xff]   ;;  %vm702_vm1 = vsmask.f32 7424 }
  0x10   : > { %v3885_v2 = vld [vmem:[%s5293_s3 + $0xc0] sm:$0xff]   ;;  %3680 = vmatprep.subr.bf16.mxu1 %v4083_v1  ;;  %s5310_s24 = smov (!%p392_p4, %s4009_s24), 1  ;;  %v3888_v5 = vld [vmem:[%s5293_s3 + $0xc8] sm:$0xff]   ;;  %v3891_v8 = vld [vmem:[%s5293_s3 + $0xd0] sm:$0xff]  }
  0x11   : > { %3129 = vmatpush3.bf16.msra.mxu0 %v3885_v2  ;;  %3688 = vmatpush3.bf16.msra.mxu1 %v4083_v1  ;;  %v3892_v9 = vld [vmem:[%s5293_s3 + $0x118] sm:$0xff]   ;;  %v3895_v12 = vld [vmem:[%s5293_s3 + $0x120] sm:$0xff]   ;;  %v3898_v15 = vld [vmem:[%s5293_s3 + $0x128] sm:$0xff]   ;;  %s4152_s20 = smul.u32 192, %s5310_s24  ;;  %s3127_s23 = sshll.u32 %s5310_s24, 8 }
  0x12   : > { %3130 = vmatprep.subr.bf16.mxu0 %v3886_v3  ;;  %3681 = vmatprep.subr.bf16.mxu1 %v4098_v4  ;;  %v4123_v10 = vld [vmem:[%s5293_s3 + $0x158] sm:$0xff]   ;;  %v4136_v13 = vld [vmem:[%s5293_s3 + $0x160] sm:$0xff]   ;;  %v4149_v16 = vld [vmem:[%s5293_s3 + $0x168] sm:$0xff]   ;;  %s5075_s8 = scalar_lea.vmem %s5297_s7, %s3127_s23 }
  0x13   : > { %v3894_v11 = vld [vmem:[%s5293_s3 + $0xd8] sm:$0xff]   ;;  %v3897_v14 = vld [vmem:[%s5293_s3 + $0xe0] sm:$0xff]   ;;  %v3900_v17 = vld [vmem:[%s5293_s3 + $0xe8] sm:$0xff]   ;;  %s4174_s12 = scalar_lea.vmem %s5290_s0, %s4152_s20  ;;  %s414_s17 = scalar_lea.vmem %s5291_s1, %s4152_s20 }
  0x14   : > { %v3901_v18 = vld [vmem:[%s5293_s3 + $0x130] sm:$0xff]   ;;  %v3904_v21 = vld [vmem:[%s5293_s3 + $0x138] sm:$0xff]   ;;  %v4187_v23 = vld [vmem:[%s4174_s12] sm:$0xff]   ;;  %s3126_s16 = sadd.s32 180, %s4152_s20 }
  0x15   : > { %3131 = vmatpush3.bf16.msra.mxu0 %v3888_v5  ;;  %3689 = vmatpush3.bf16.msra.mxu1 %v4098_v4  ;;  %v4165_v19 = vld [vmem:[%s5293_s3 + $0x170] sm:$0xff]   ;;  %v4182_v22 = vld [vmem:[%s5293_s3 + $0x178] sm:$0xff]   ;;  %v4190_v24 = vld [vmem:[%s4174_s12 + $0x8] ss:$0 sps:$4 sm:$0x11]   ;;  %v716_v26 = vshrl.u32 %v4187_v23, 16  ;;  %s431_s19 = scalar_lea.vmem %s5292_s2, %s3126_s16 }
  0x16   : > { %3132 = vmatprep.subr.bf16.mxu0 %v3889_v6  ;;  %3682 = vmatprep.subr.bf16.mxu1 %v4110_v7  ;;  %v3903_v20 = vld [vmem:[%s5293_s3 + $0xf0] sm:$0xff]   ;;  %v3906_v25 = vld [vmem:[%s5293_s3 + $0xf8] sm:$0xff]   ;;  %v718_v27 = vshll.u32 %v4187_v23, 16  ;;  %v723_v28 = vshll.u32 %v4190_v24, 16  ;;  %v4199_v29 = vld [vmem:[%s4174_s12 + $0x60] sm:$0xff]  }
  0x17   : > { %v4203_v30 = vld [vmem:[%s4174_s12 + $0x68] ss:$0 sps:$4 sm:$0x11]   ;;  %v4206_v31 = vld [vmem:[%s4174_s12 + $0x6c] sm:$0xff]   ;;  %v965_v34 = vrot.slane %v4199_v29, 1  ;;  %v3913_v35 = vld [vmem:[%s5293_s3 + $0x40] sm:$0xff]  }
  0x18   : > { %v720_v32 = vrot.slane %v718_v27, 1  ;;  %v725_v33 = vrot.slane %v723_v28, 1  ;;  %v966_v36 = vrot.slane %v4203_v30, 1  ;;  %v4215_v37 = vld [vmem:[%s4174_s12 + $0x74] ss:$0 sps:$4 sm:$0x11]  }
  0x19   : > { %3133 = vmatpush3.bf16.msra.mxu0 %v3891_v8  ;;  %3690 = vmatpush3.bf16.msra.mxu1 %v4110_v7  ;;  %v968_v38 = vrot.slane %v4206_v31, 1  ;;  %v3914_v39 = vld [vmem:[%s5293_s3] sm:$0xff]   ;;  %v969_v42 = vrot.slane %v4215_v37, 1  ;;  %v3915_v43 = vld [vmem:[%s5293_s3 + $0x48] sm:$0xff]   ;;  %v4254_v52 = vld [vmem:[%s4174_s12 + $0x78] sm:$0xff]  }
  0x1a   : > { %3134 = vmatprep.subr.bf16.mxu0 %v3892_v9  ;;  %3683 = vmatprep.subr.bf16.mxu1 %v4123_v10  ;;  %v721_v40 = vor.u32 %v720_v32, %v716_v26  ;;  %v4223_v41 = vsel %vm937_vm0, %v965_v34, %v966_v36  ;;  %v3916_v46 = vld [vmem:[%s5293_s3 + $0x8] sm:$0xff]   ;;  %v4247_v48 = vld [vmem:[%s4174_s12 + $0x14] ss:$0 sps:$4 sm:$0x11]   ;;  %v971_v57 = vrot.slane %v4254_v52, 1  ;;  %v3925_v2 = vld [vmem:[%s5293_s3 + $0x58] sm:$0xff]  }
  0x1b   : > { %3568 = vmatprep.mubr.bf16.mxu1 %v4223_v41  ;;  %v4236_v45 = vsel %vm937_vm0, %v968_v38, %v969_v42  ;;  %v4244_v47 = vld [vmem:[%s4174_s12 + $0xc] sm:$0xff]   ;;  %v735_v51 = vshll.u32 %v4247_v48, 16  ;;  %v4258_v53 = vld [vmem:[%s4174_s12 + $0x80] ss:$0 sps:$4 sm:$0x11]   ;;  %v4261_v54 = vld [vmem:[%s4174_s12 + $0x84] sm:$0xff]  }
  0x1c   : > { %v4230_v44 = vsel %vm702_vm1, %v721_v40, %v725_v33  ;;  %v728_v49 = vshrl.u32 %v4244_v47, 16  ;;  %v730_v50 = vshll.u32 %v4244_v47, 16  ;;  %v3923_v58 = vld [vmem:[%s5293_s3 + $0x50] sm:$0xff]   ;;  %v972_v59 = vrot.slane %v4258_v53, 1  ;;  %v3926_v5 = vld [vmem:[%s5293_s3 + $0x18] sm:$0xff]   ;;  %v3934_v28 = vld [vmem:[%s5293_s3 + $0x20] sm:$0xff]  }
  0x1d   : > { %3135 = vmatpush3.bf16.msra.mxu0 %v3894_v11  ;;  %3691 = vmatpush3.bf16.msra.mxu1 %v4123_v10  ;;  %v737_v56 = vrot.slane %v735_v51, 1  ;;  %v4269_v60 = vld [vmem:[%s4174_s12 + $0x8c] ss:$0 sps:$4 sm:$0x11]   ;;  %v974_v61 = vrot.slane %v4261_v54, 1  ;;  %v3924_v62 = vld [vmem:[%s5293_s3 + $0x10] sm:$0xff]  }
  0x1e   : > { %3136 = vmatprep.subr.bf16.mxu0 %v3895_v12  ;;  %3684 = vmatprep.subr.bf16.mxu1 %v4136_v13  ;;  %v732_v55 = vrot.slane %v730_v50, 1  ;;  %v4278_v0 = vsel %vm937_vm0, %v971_v57, %v972_v59  ;;  %v4298_v6 = vld [vmem:[%s4174_s12 + $0x18] sm:$0xff]   ;;  %v4301_v8 = vld [vmem:[%s4174_s12 + $0x20] ss:$0 sps:$4 sm:$0x11]   ;;  %v3936_v38 = vld [vmem:[%s5293_s3 + $0x28] sm:$0xff]  }
  0x1f   : > { %1283 = vmatprep.mubr.bf16.mxu0 %v4230_v44  ;;  %v740_v9 = vshrl.u32 %v4298_v6, 16  ;;  %v742_v11 = vshll.u32 %v4298_v6, 16  ;;  %v747_v12 = vshll.u32 %v4301_v8, 16  ;;  %v4323_v26 = vld [vmem:[%s4174_s12 + $0xa4] ss:$0 sps:$4 sm:$0x11]  }
  0x20   : > { %v733_v63 = vor.u32 %v732_v55, %v728_v49  ;;  %v981_v34 = vrot.slane %v4323_v26, 1  ;;  %v4355_v40 = vld [vmem:[%s4174_s12 + $0x2c] ss:$0 sps:$4 sm:$0x11]   ;;  %v4369_v51 = vld [vmem:[%s4174_s12 + $0xb4] sm:$0xff]  }
  0x21   : > { %3137 = vmatpush3.bf16.msra.mxu0 %v3897_v14  ;;  %3692 = vmatpush3.bf16.msra.mxu1 %v4136_v13  ;;  %v4308_v14 = vld [vmem:[%s4174_s12 + $0x90] sm:$0xff]   ;;  %v4362_v49 = vld [vmem:[%s4174_s12 + $0xa8] sm:$0xff]   ;;  %v4377_v59 = vld [vmem:[%s4174_s12 + $0xbc] ss:$0 sps:$4 sm:$0x11]  }
  0x22   : > { %3138 = vmatprep.subr.bf16.mxu0 %v3898_v15  ;;  %3685 = vmatprep.subr.bf16.mxu1 %v4149_v16  ;;  %v4285_v3 = vsel %vm702_vm1, %v733_v63, %v737_v56  ;;  %v4312_v15 = vld [vmem:[%s4174_s12 + $0x98] ss:$0 sps:$4 sm:$0x11]   ;;  %v4366_v50 = vld [vmem:[%s4174_s12 + $0xb0] ss:$0 sps:$4 sm:$0x11]  }
  0x23   : > { %v983_v57 = vrot.slane %v4362_v49, 1 }
  0x25   : > { %3139 = vmatpush3.bf16.msra.mxu0 %v3900_v17  ;;  %3693 = vmatpush3.bf16.msra.mxu1 %v4149_v16  ;;  %v4315_v17 = vld [vmem:[%s4174_s12 + $0x9c] sm:$0xff]  }
  0x26   : > { %3140 = vmatprep.subr.bf16.mxu0 %v3901_v18  ;;  %3686 = vmatprep.subr.bf16.mxu1 %v4165_v19  ;;  %v744_v18 = vrot.slane %v742_v11, 1  ;;  %v980_v27 = vrot.slane %v4315_v17, 1  ;;  %v3946_v11 = vld [vmem:[%s5293_s3 + $0x38] sm:$0xff]  }
  0x28   : > { %v745_v32 = vor.u32 %v744_v18, %v740_v9  ;;  %v4413_v18 = vld [vmem:[%s4174_s12 + $0x38] ss:$0 sps:$4 sm:$0x11]  }
  0x29   : > { %3141 = vmatpush3.bf16.msra.mxu0 %v3903_v20  ;;  %3694 = vmatpush3.bf16.msra.mxu1 %v4165_v19  ;;  %v749_v20 = vrot.slane %v747_v12, 1  ;;  %v4410_v12 = vld [vmem:[%s4174_s12 + $0x30] sm:$0xff]  }
  0x2a   : > { %3142 = vmatprep.subr.bf16.mxu0 %v3904_v21  ;;  %3687 = vmatprep.subr.bf16.mxu1 %v4182_v22  ;;  %v977_v21 = vrot.slane %v4308_v14, 1 }
  0x2b   : > { %v4339_v36 = vsel %vm702_vm1, %v745_v32, %v749_v20  ;;  %v472_v20 = vld [vmem:[%s414_s17] sm:$0xf] }
  0x2c   : > { %v479_v32 = vmul.bf16 0.0, %v472_v20 }
  0x2d   : > { %3143 = vmatpush3.bf16.msra.mxu0 %v3906_v25  ;;  %3695 = vmatpush3.bf16.msra.mxu1 %v4182_v22  ;;  %v978_v25 = vrot.slane %v4312_v15, 1 }
  0x2e   : > { %3536 = vmatprep.subr.bf16.mxu0 %v4083_v1  ;;  %3264 = vmatprep.subr.bf16.mxu1 %v3913_v35  ;;  %v3935_v35 = vld [vmem:[%s5293_s3 + $0x68] sm:$0xff]  }
  0x2f   : > { %v4332_v33 = vsel %vm937_vm0, %v977_v21, %v978_v25  ;;  %v473_v21 = vld [vmem:[%s414_s17 + $0x4] sm:$0xf]  ;;  %v764_v25 = vshrl.u32 %v4410_v12, 16 }
  0x30   : > { %1284 = vmatmul.mubr.bf16.vlgmr.msra.gmra.mrb[0].mxu0 %v4187_v23  ;;  %3569 = vmatmul.mubr.bf16.vlgmr.msra.gmra.mrb[0].mxu1 %v4236_v45 }
  0x31   : > { %3537 = vmatpush3.bf16.msra.mxu0 %v4083_v1  ;;  %3265 = vmatpush3.bf16.msra.mxu1 %v3914_v39  ;;  %v975_v1 = vrot.slane %v4269_v60, 1  ;;  %v4352_v39 = vld [vmem:[%s4174_s12 + $0x24] sm:$0xff]  }
  0x32   : > { %3266 = vmatprep.subr.bf16.mxu1 %v3915_v43  ;;  %3538 = vmatprep.subr.bf16.mxu0 %v4098_v4  ;;  %v752_v42 = vshrl.u32 %v4352_v39, 16  ;;  %v754_v43 = vshll.u32 %v4352_v39, 16 }
  0x33   : > { %3572 = vmatprep.mubr.bf16.mxu1 %v4278_v0  ;;  %1291 = vmatprep.mubr.bf16.mxu0 %v4285_v3 }
  0x34   : > { %v756_v55 = vrot.slane %v754_v43, 1 }
  0x35   : > { %3267 = vmatpush3.bf16.msra.mxu1 %v3916_v46  ;;  %3539 = vmatpush3.bf16.msra.mxu0 %v4098_v4  ;;  %v4290_v4 = vsel %vm937_vm0, %v974_v61, %v975_v1  ;;  %v759_v46 = vshll.u32 %v4355_v40, 16  ;;  %v986_v61 = vrot.slane %v4369_v51, 1 }
  0x36   : > { %3268 = vmatprep.subr.bf16.mxu1 %v3923_v58  ;;  %3540 = vmatprep.subr.bf16.mxu0 %v4110_v7  ;;  %v984_v58 = vrot.slane %v4366_v50, 1  ;;  %v757_v63 = vor.u32 %v756_v55, %v752_v42  ;;  %v4424_v42 = vld [vmem:[%s4174_s12 + $0x3c] sm:$0xff]  }
  0x37   : > { %v761_v56 = vrot.slane %v759_v46, 1 }
  0x38   : > { %1292 = vmatmul.mubr.bf16.gmra.mrb[4].mxu0 %v4244_v47  ;;  %3573 = vmatmul.mubr.bf16.gmra.mrb[4].mxu1 %v4290_v4  ;;  %v4386_v1 = vsel %vm937_vm0, %v983_v57, %v984_v58  ;;  %v776_v57 = vshrl.u32 %v4424_v42, 16  ;;  %v778_v58 = vshll.u32 %v4424_v42, 16 }
  0x39   : > { %3269 = vmatpush3.bf16.msra.mxu1 %v3924_v62  ;;  %3541 = vmatpush3.bf16.msra.mxu0 %v4110_v7  ;;  %v3933_v7 = vld [vmem:[%s5293_s3 + $0x60] sm:$0xff]   ;;  %v3944_v62 = vld [vmem:[%s5293_s3 + $0x30] sm:$0xff]   ;;  %5301 = vst [vmem:[#allocation2_spill] sm:$0xff] %v4386_v1  ;;  %v4393_v9 = vsel %vm702_vm1, %v757_v63, %v761_v56 }
  0x3a   : > { %3270 = vmatprep.subr.bf16.mxu1 %v3925_v2  ;;  %3542 = vmatprep.subr.bf16.mxu0 %v4123_v10  ;;  %v987_v2 = vrot.slane %v4377_v59, 1  ;;  %v4431_v56 = vld [vmem:[%s4174_s12 + $0x44] ss:$0 sps:$4 sm:$0x11]   ;;  %v780_v20 = vrot.slane %v778_v58, 1 }
  0x3b   : > { %3576 = vmatprep.mubr.bf16.mxu1 %v4332_v33  ;;  %1299 = vmatprep.mubr.bf16.mxu0 %v4339_v36 }
  0x3d   : > { %3271 = vmatpush3.bf16.msra.mxu1 %v3926_v5  ;;  %3543 = vmatpush3.bf16.msra.mxu0 %v4123_v10  ;;  %v4344_v10 = vsel %vm937_vm0, %v980_v27, %v981_v34  ;;  %v3945_v5 = vld [vmem:[%s5293_s3 + $0x78] sm:$0xff]   ;;  %v766_v27 = vshll.u32 %v4410_v12, 16  ;;  %v480_v34 = vmul.bf16 0.0, %v473_v21  ;;  %v4447_v21 = vld [vmem:[%s4174_s12 + $0x50] ss:$0 sps:$4 sm:$0x11]  }
  0x3e   : > { %3272 = vmatprep.subr.bf16.mxu1 %v3933_v7  ;;  %3544 = vmatprep.subr.bf16.mxu0 %v4136_v13  ;;  %v474_v7 = vld [vmem:[%s414_s17 + $0x8] sm:$0x1] }
  0x3f   : > { %v768_v43 = vrot.slane %v766_v27, 1  ;;  %v4426_v46 = vcombine.low %v479_v32, %v480_v34  ;;  %v781_v32 = vor.u32 %v780_v20, %v776_v57  ;;  %v3954_v57 = vld [vmem:[%s5293_s3 + $0x88] sm:$0xff]  }
  0x40   : > { %1300 = vmatmul.mubr.bf16.gmra.mrb[8].mxu0 %v4298_v6  ;;  %3577 = vmatmul.mubr.bf16.gmra.mrb[8].mxu1 %v4344_v10 }
  0x41   : > { %3273 = vmatpush3.bf16.msra.mxu1 %v3934_v28  ;;  %3545 = vmatpush3.bf16.msra.mxu0 %v4136_v13  ;;  %v3943_v13 = vld [vmem:[%s5293_s3 + $0x70] sm:$0xff]   ;;  %v771_v28 = vshll.u32 %v4413_v18, 16  ;;  %v706_v63 = vshll.u32 %v4426_v46, 16 }
  0x42   : > { %3274 = vmatprep.subr.bf16.mxu1 %v3935_v35  ;;  %3546 = vmatprep.subr.bf16.mxu0 %v4149_v16  ;;  %v481_v35 = vmul.bf16 0.0, %v474_v7 }
  0x43   : > { %3580 = vmatprep.mubr.bf16.mxu1 %v4386_v1  ;;  %1307 = vmatprep.mubr.bf16.mxu0 %v4393_v9  ;;  %v4461_v1 = vld [vmem:[%s4174_s12 + $0x5c] ss:$0 sps:$4 sm:$0x11]  }
  0x44   : > { %v4428_v55 = vcombine.low %v481_v35, %v481_v35  ;;  %v795_v35 = vshll.u32 %v4447_v21, 16 }
  0x45   : > { %3275 = vmatpush3.bf16.msra.mxu1 %v3936_v38  ;;  %3547 = vmatpush3.bf16.msra.mxu0 %v4149_v16  ;;  %v4402_v16 = vsel %vm937_vm0, %v986_v61, %v987_v2  ;;  %v3949_v38 = vld [vmem:[%s5293_s3 + $0x80] sm:$0xff]   ;;  %v4437_v61 = vld [vmem:[%s4174_s12 + $0x48] sm:$0xff]  }
  0x46   : > { %3276 = vmatprep.subr.bf16.mxu1 %v3943_v13  ;;  %3548 = vmatprep.subr.bf16.mxu0 %v4165_v19  ;;  %5302 = vst [vmem:[#allocation3_spill] sm:$0xff] %v4402_v16  ;;  %v769_v13 = vor.u32 %v768_v43, %v764_v25  ;;  %v711_v2 = vshll.u32 %v4428_v55, 16  ;;  %v790_v7 = vshll.u32 %v4437_v61, 16  ;;  %v708_v25 = vrot.slane %v706_v63, 1 }
  0x48   : > { %1308 = vmatmul.mubr.bf16.gmra.mrb[12].mxu0 %v4352_v39  ;;  %3581 = vmatmul.mubr.bf16.gmra.mrb[12].mxu1 %v4402_v16  ;;  %v713_v27 = vrot.slane %v711_v2, 1  ;;  %v792_v34 = vrot.slane %v790_v7, 1  ;;  %v797_v16 = vrot.slane %v795_v35, 1  ;;  %v3957_v7 = vld [vmem:[%s5293_s3 + $0x90] sm:$0xff]   ;;  %v819_v35 = vshll.u32 %v4203_v30, 16 }
  0x49   : > { %3277 = vmatpush3.bf16.msra.mxu1 %v3944_v62  ;;  %3549 = vmatpush3.bf16.msra.mxu0 %v4165_v19  ;;  %v773_v19 = vrot.slane %v771_v28, 1  ;;  %v704_v62 = vshrl.u32 %v4426_v46, 16 }
  0x4a   : > { %3278 = vmatprep.subr.bf16.mxu1 %v3945_v5  ;;  %3550 = vmatprep.subr.bf16.mxu0 %v4182_v22  ;;  %v783_v5 = vshll.u32 %v4431_v56, 16 }
  0x4b   : > { %v709_v43 = vor.u32 %v708_v25, %v704_v62  ;;  %v814_v25 = vshll.u32 %v4199_v29, 16 }
  0x4c   : > { %v785_v28 = vrot.slane %v783_v5, 1 }
  0x4d   : > { %3279 = vmatpush3.bf16.msra.mxu1 %v3946_v11  ;;  %3551 = vmatpush3.bf16.msra.mxu0 %v4182_v22  ;;  %v4444_v11 = vsel %vm702_vm1, %v769_v13, %v773_v19  ;;  %v788_v22 = vshrl.u32 %v4437_v61, 16  ;;  %v4455_v19 = vld [vmem:[%s4174_s12 + $0x54] sm:$0xff]   ;;  %v714_v63 = vsel %vm702_vm1, %v709_v43, %v713_v27  ;;  %v3959_v43 = vld [vmem:[%s5293_s3 + $0xa0] sm:$0xff]  }
  0x4e   : > { %3584 = vmatprep.subr.bf16.mxu1 %v3949_v38  ;;  %1315 = vmatprep.mubr.bf16.mxu0 %v4444_v11  ;;  %v4458_v13 = vsel %vm702_vm1, %v781_v32, %v785_v28  ;;  %v802_v2 = vshll.u32 %v4455_v19, 16  ;;  %v800_v5 = vshrl.u32 %v4455_v19, 16  ;;  %v3958_v27 = vld [vmem:[%s5293_s3 + $0x98] sm:$0xff]   ;;  %v812_v32 = vshrl.u32 %v4199_v29, 16 }
  0x4f   : > { %v793_v58 = vor.u32 %v792_v34, %v788_v22  ;;  %1749 = vmatprep.mubr.bf16.mxu1 %v714_v63  ;;  %v807_v22 = vshll.u32 %v4461_v1, 16  ;;  %v816_v34 = vrot.slane %v814_v25, 1  ;;  %v942_v63 = vrot.slane %v4190_v24, 1 }
  0x50   : > { %1316 = vmatmul.mubr.bf16.gmra.mrb[16].mxu0 %v4410_v12  ;;  %1750 = vmatmul.mubr.bf16.vlgmr.msra.gmra.mrb[16].mxu1 %v4426_v46  ;;  %v804_v20 = vrot.slane %v802_v2, 1  ;;  %v821_v2 = vrot.slane %v819_v35, 1  ;;  %v838_v25 = vshll.u32 %v4254_v52, 16 }
  0x51   : > { %1323 = vmatprep.mubr.bf16.mxu0 %v4458_v13  ;;  %3585 = vmatpush3.bf16.msra.mxu1 %v3949_v38  ;;  %v4472_v62 = vsel %vm702_vm1, %v793_v58, %v797_v16  ;;  %v3961_v38 = vld [vmem:[%s5293_s3 + $0x1c0] sm:$0xff]   ;;  %v809_v16 = vrot.slane %v807_v22, 1  ;;  %v941_v58 = vrot.slane %v4187_v23, 1 }
  0x52   : > { %1757 = vmatprep.mubr.bf16.mxu1 %v4230_v44  ;;  %3586 = vmatprep.subr.bf16.mxu1 %v3954_v57  ;;  %v805_v44 = vor.u32 %v804_v20, %v800_v5  ;;  %v826_v5 = vshll.u32 %v4206_v31, 16  ;;  %v3960_v20 = vld [vmem:[%s5293_s3 + $0xa8] sm:$0xff]  }
  0x53   : > { %3400 = vmatprep.subr.bf16.mxu0 %v3961_v38  ;;  %v4504_v30 = vsel %vm937_vm0, %v941_v58, %v942_v63  ;;  %v3963_v38 = vld [vmem:[%s5293_s3 + $0xb0] sm:$0xff]   ;;  %v843_v58 = vshll.u32 %v4258_v53, 16 }
  0x54   : > { %v4491_v28 = vsel %vm702_vm1, %v805_v44, %v809_v16  ;;  %v828_v22 = vrot.slane %v826_v5, 1  ;;  %v848_v5 = vshrl.u32 %v4261_v54, 16 }
  0x55   : > { %3587 = vmatpush3.bf16.msra.mxu1 %v3954_v57  ;;  %v817_v57 = vor.u32 %v816_v34, %v812_v32  ;;  %v939_v32 = vrot.slane %v4428_v55, 1  ;;  %v836_v34 = vshrl.u32 %v4254_v52, 16 }
  0x56   : > { %3588 = vmatprep.subr.bf16.mxu1 %v3957_v7 }
  0x57   : > { %v4513_v24 = vsel %vm702_vm1, %v817_v57, %v821_v2  ;;  %v845_v57 = vrot.slane %v843_v58, 1  ;;  %v850_v2 = vshll.u32 %v4261_v54, 16 }
  0x58   : > { %1324 = vmatmul.mubr.bf16.gmra.mrb[20].mxu0 %v4424_v42  ;;  %1758 = vmatmul.mubr.bf16.gmra.mrb[20].mxu1 %v4187_v23  ;;  %v824_v23 = vshrl.u32 %v4206_v31, 16 }
  0x59   : > { %1331 = vmatprep.mubr.bf16.mxu0 %v4472_v62  ;;  %1765 = vmatprep.mubr.bf16.mxu1 %v4285_v3 }
  0x5a   : > { %3589 = vmatpush3.bf16.msra.mxu1 %v3957_v7  ;;  %v831_v7 = vshll.u32 %v4215_v37, 16  ;;  %v829_v44 = vor.u32 %v828_v22, %v824_v23  ;;  %v3972_v37 = vld [vmem:[%s5293_s3 + $0xb8] sm:$0xff]   ;;  %v855_v23 = vshll.u32 %v4269_v60, 16  ;;  %v867_v60 = vshll.u32 %v4312_v15, 16 }
  0x5b   : > { %3590 = vmatprep.subr.bf16.mxu1 %v3958_v27  ;;  %v879_v15 = vshll.u32 %v4323_v26, 16  ;;  %v891_v26 = vshll.u32 %v4366_v50, 16  ;;  %v903_v50 = vshll.u32 %v4377_v59, 16  ;;  %v944_v59 = vrot.slane %v4244_v47, 1 }
  0x5c   : > { %v833_v16 = vrot.slane %v831_v7, 1  ;;  %v857_v7 = vrot.slane %v855_v23, 1 }
  0x5e   : > { %3591 = vmatpush3.bf16.msra.mxu1 %v3958_v27  ;;  %v938_v27 = vrot.slane %v4426_v46, 1  ;;  %v4531_v35 = vsel %vm702_vm1, %v829_v44, %v833_v16  ;;  %v4540_v46 = vld [vmem:[%s5293_s3 + $0x200] sm:$0xff]   ;;  %v860_v16 = vshrl.u32 %v4308_v14, 16 }
  0x5f   : > { %3592 = vmatprep.subr.bf16.mxu1 %v3959_v43 }
  0x60   : > { %1332 = vmatmul.mubr.bf16.gmra.mrb[24].mxu0 %v4437_v61  ;;  %1766 = vmatmul.mubr.bf16.gmra.mrb[24].mxu1 %v4244_v47  ;;  %v4535_v63 = vsel %vm937_vm0, %v938_v27, %v939_v32  ;;  %v869_v27 = vrot.slane %v867_v60, 1  ;;  %v874_v32 = vshll.u32 %v4315_v17, 16 }
  0x61   : > { %1339 = vmatprep.mubr.bf16.mxu0 %v4491_v28  ;;  %1773 = vmatprep.mubr.bf16.mxu1 %v4339_v36 }
  0x62   : > { %3593 = vmatpush3.bf16.msra.mxu1 %v3959_v43  ;;  %v840_v43 = vrot.slane %v838_v25, 1  ;;  %v876_v58 = vrot.slane %v874_v32, 1 }
  0x63   : > { %3594 = vmatprep.subr.bf16.mxu1 %v3960_v20 }
  0x64   : > { %v841_v55 = vor.u32 %v840_v43, %v836_v34  ;;  %v872_v43 = vshrl.u32 %v4315_v17, 16 }
  0x66   : > { %3595 = vmatpush3.bf16.msra.mxu1 %v3960_v20  ;;  %v4549_v53 = vsel %vm702_vm1, %v841_v55, %v845_v57  ;;  %v852_v20 = vrot.slane %v850_v2, 1  ;;  %v877_v55 = vor.u32 %v876_v58, %v872_v43  ;;  %v881_v57 = vrot.slane %v879_v15, 1 }
  0x67   : > { %3596 = vmatprep.subr.bf16.mxu1 %v3963_v38  ;;  %v886_v2 = vshll.u32 %v4362_v49, 16  ;;  %v947_v43 = vrot.slane %v4298_v6, 1  ;;  %v948_v58 = vrot.slane %v4301_v8, 1  ;;  %v950_v8 = vrot.slane %v4352_v39, 1 }
  0x68   : > { %1340 = vmatmul.mubr.bf16.gmra.mrb[28].mxu0 %v4455_v19  ;;  %1774 = vmatmul.mubr.bf16.gmra.mrb[28].mxu1 %v4298_v6  ;;  %v853_v22 = vor.u32 %v852_v20, %v848_v5  ;;  %v4579_v5 = vsel %vm702_vm1, %v877_v55, %v881_v57  ;;  %v884_v20 = vshrl.u32 %v4362_v49, 16  ;;  %v951_v55 = vrot.slane %v4355_v40, 1  ;;  %v3966_v57 = vld [vmem:[%s5293_s3 + $0x1d0] sm:$0xff]   ;;  %v3968_v40 = vld [vmem:[%s5293_s3 + $0x1d8] sm:$0xff]  }
  0x69   : > { %1347 = vmatprep.mubr.bf16.mxu0 %v4513_v24  ;;  %1781 = vmatprep.mubr.bf16.mxu1 %v4393_v9  ;;  %v888_v23 = vrot.slane %v886_v2, 1  ;;  %v953_v2 = vrot.slane %v4410_v12, 1 }
  0x6a   : > { %3597 = vmatpush3.bf16.msra.mxu1 %v3963_v38  ;;  %v862_v38 = vshll.u32 %v4308_v14, 16  ;;  %v4559_v44 = vsel %vm702_vm1, %v853_v22, %v857_v7  ;;  %v893_v7 = vrot.slane %v891_v26, 1  ;;  %v3967_v26 = vld [vmem:[%s5293_s3 + $0x190] sm:$0xff]  }
  0x6b   : > { %3598 = vmatprep.subr.bf16.mxu1 %v3972_v37  ;;  %v889_v22 = vor.u32 %v888_v23, %v884_v20  ;;  %v954_v20 = vrot.slane %v4413_v18, 1  ;;  %v4638_v23 = vsel %vm937_vm0, %v950_v8, %v951_v55  ;;  %v956_v18 = vrot.slane %v4424_v42, 1  ;;  %v3988_v8 = vld [vmem:[%s4174_s12 + $0x6c] sm:$0xff]  }
  0x6c   : > { %v864_v25 = vrot.slane %v862_v38, 1  ;;  %v898_v38 = vshll.u32 %v4369_v51, 16 }
  0x6e   : > { %3599 = vmatpush3.bf16.msra.mxu1 %v3972_v37  ;;  %v865_v37 = vor.u32 %v864_v25, %v860_v16  ;;  %v4589_v16 = vsel %vm702_vm1, %v889_v22, %v893_v7  ;;  %v896_v25 = vshrl.u32 %v4369_v51, 16  ;;  %v900_v60 = vrot.slane %v898_v38, 1  ;;  %v3970_v38 = vld [vmem:[%s5293_s3 + $0x1e0] sm:$0xff]  }
  0x6f   : > { %3632 = vmatprep.subr.bf16.mxu1 %v4540_v46  ;;  %v4648_v22 = vsel %vm937_vm0, %v953_v2, %v954_v20  ;;  %v957_v7 = vrot.slane %v4431_v56, 1  ;;  %v3973_v56 = vld [vmem:[%s5293_s3 + $0x1e8] sm:$0xff]  }
  0x70   : > { %1348 = vmatmul.mubr.bf16.gmra.mrb[32].mxu0 %v4199_v29  ;;  %1782 = vmatmul.mubr.bf16.gmra.mrb[32].mxu1 %v4352_v39  ;;  %v4569_v34 = vsel %vm702_vm1, %v865_v37, %v869_v27  ;;  %v901_v37 = vor.u32 %v900_v60, %v896_v25  ;;  %v905_v27 = vrot.slane %v903_v50, 1  ;;  %v959_v25 = vrot.slane %v4437_v61, 1 }
  0x71   : > { %1355 = vmatprep.mubr.bf16.mxu0 %v4531_v35  ;;  %1789 = vmatprep.mubr.bf16.mxu1 %v4444_v11  ;;  %v960_v60 = vrot.slane %v4447_v21, 1  ;;  %v4664_v50 = vsel %vm937_vm0, %v956_v18, %v957_v7  ;;  %v962_v21 = vrot.slane %v4455_v19, 1 }
  0x72   : > { %v4598_v32 = vsel %vm702_vm1, %v901_v37, %v905_v27  ;;  %v3971_v37 = vld [vmem:[%s5293_s3 + $0x1a0] sm:$0xff]  }
  0x73   : > { %v4674_v27 = vsel %vm937_vm0, %v959_v25, %v960_v60 }
  0x78   : > { %1356 = vmatmul.mubr.bf16.gmra.mrb[36].mxu0 %v4206_v31  ;;  %1790 = vmatmul.mubr.bf16.gmra.mrb[36].mxu1 %v4410_v12 }
  0x79   : > { %1363 = vmatprep.mubr.bf16.mxu0 %v4549_v53  ;;  %1797 = vmatprep.mubr.bf16.mxu1 %v4458_v13 }
  0x80   : > { %1364 = vmatmul.mubr.bf16.gmra.mrb[40].mxu0 %v4254_v52  ;;  %1798 = vmatmul.mubr.bf16.gmra.mrb[40].mxu1 %v4424_v42 }
  0x81   : > { %1371 = vmatprep.mubr.bf16.mxu0 %v4559_v44  ;;  %1805 = vmatprep.mubr.bf16.mxu1 %v4472_v62 }
  0x88   : > { %1372 = vmatmul.mubr.bf16.gmra.mrb[44].mxu0 %v4261_v54  ;;  %1806 = vmatmul.mubr.bf16.gmra.mrb[44].mxu1 %v4437_v61 }
  0x89   : > { %1379 = vmatprep.mubr.bf16.mxu0 %v4569_v34  ;;  %1813 = vmatprep.mubr.bf16.mxu1 %v4491_v28 }
  0x90   : > { %1380 = vmatmul.mubr.bf16.gmra.mrb[48].mxu0 %v4308_v14  ;;  %1814 = vmatmul.mubr.bf16.gmra.mrb[48].mxu1 %v4455_v19 }
  0x91   : > { %1387 = vmatprep.mubr.bf16.mxu0 %v4579_v5  ;;  %1821 = vmatprep.mubr.bf16.mxu1 %v4513_v24 }
  0x98   : > { %1388 = vmatmul.mubr.bf16.gmra.mrb[52].mxu0 %v4315_v17  ;;  %1822 = vmatmul.mubr.bf16.gmra.mrb[52].mxu1 %v4199_v29  ;;  %v945_v29 = vrot.slane %v4247_v48, 1  ;;  %v4622_v48 = vsel %vm937_vm0, %v947_v43, %v948_v58  ;;  %v3976_v58 = vld [vmem:[%s5293_s3 + $0x1b0] sm:$0xff]  }
  0x99   : > { %1395 = vmatprep.mubr.bf16.mxu0 %v4589_v16  ;;  %1829 = vmatprep.mubr.bf16.mxu1 %v4531_v35 }
  0x9a   : > { %v4612_v15 = vsel %vm937_vm0, %v944_v59, %v945_v29  ;;  %v963_v59 = vrot.slane %v4461_v1, 1  ;;  %v3975_v29 = vld [vmem:[%s5293_s3 + $0x1f0] sm:$0xff]   ;;  %v3977_v1 = vld [vmem:[%s5293_s3 + $0x1f8] sm:$0xff]  }
  0x9c   : > { %v4688_v43 = vsel %vm937_vm0, %v962_v21, %v963_v59 }
  0xa0   : > { %1396 = vmatmul.mubr.bf16.gmra.mrb[56].mxu0 %v4362_v49  ;;  %1830 = vmatmul.mubr.bf16.gmra.mrb[56].mxu1 %v4206_v31  ;;  %v3962_v31 = vld [vmem:[%s5293_s3 + $0x180] sm:$0xff]  }
  0xa1   : > { %1403 = vmatprep.mubr.bf16.mxu0 %v4598_v32  ;;  %1837 = vmatprep.mubr.bf16.mxu1 %v4549_v53 }
  0xa8   : > { %1404 = vmatmul.mubr.bf16.gmra.mrb[60].mxu0 %v4369_v51  ;;  %1838 = vmatmul.mubr.bf16.gmra.mrb[60].mxu1 %v4254_v52  ;;  %v3964_v51 = vld [vmem:[%s5293_s3 + $0x1c8] sm:$0xff]  }
  0xa9   : > { %3552 = vmatprep.mubr.bf16.mxu0 %v4504_v30  ;;  %1845 = vmatprep.mubr.bf16.mxu1 %v4559_v44  ;;  %v3965_v52 = vld [vmem:[%s5293_s3 + $0x188] sm:$0xff]  }
  0xb0   : > { %3553 = vmatmul.mubr.bf16.vlgmr.msra.gmra.mrb[64].mxu0 %v4612_v15  ;;  %1846 = vmatmul.mubr.bf16.gmra.mrb[64].mxu1 %v4261_v54  ;;  %v3969_v54 = vld [vmem:[%s5293_s3 + $0x198] sm:$0xff]  }
  0xb1   : > { %3401 = vmatpush3.bf16.msra.mxu0 %v3962_v31  ;;  %3556 = vmatprep.mubr.bf16.mxu0 %v4622_v48  ;;  %v3980_v31 = vld [vmem:[%s5293_s3 + $0x208] sm:$0xff]  }
  0xb2   : > { %3402 = vmatprep.subr.bf16.mxu0 %v3964_v51  ;;  %1853 = vmatprep.mubr.bf16.mxu1 %v4569_v34 }
  0xb5   : > { %3403 = vmatpush3.bf16.msra.mxu0 %v3965_v52 }
  0xb6   : > { %3404 = vmatprep.subr.bf16.mxu0 %v3966_v57 }
  0xb8   : > { %3557 = vmatmul.mubr.bf16.gmra.mrb[68].mxu0 %v4638_v23  ;;  %1854 = vmatmul.mubr.bf16.gmra.mrb[68].mxu1 %v4308_v14  ;;  %v3974_v14 = vld [vmem:[%s5293_s3 + $0x1a8] sm:$0xff]  }
  0xb9   : > { %3405 = vmatpush3.bf16.msra.mxu0 %v3967_v26  ;;  %3560 = vmatprep.mubr.bf16.mxu0 %v4648_v22 }
  0xba   : > { %3406 = vmatprep.subr.bf16.mxu0 %v3968_v40  ;;  %1861 = vmatprep.mubr.bf16.mxu1 %v4579_v5 }
  0xbd   : > { %3407 = vmatpush3.bf16.msra.mxu0 %v3969_v54 }
  0xbe   : > { %3408 = vmatprep.subr.bf16.mxu0 %v3970_v38 }
  0xc0   : > { %3561 = vmatmul.mubr.bf16.gmra.mrb[72].mxu0 %v4664_v50  ;;  %1862 = vmatmul.mubr.bf16.gmra.mrb[72].mxu1 %v4315_v17  ;;  %v3978_v17 = vld [vmem:[%s5293_s3 + $0x1b8] sm:$0xff]  }
  0xc1   : > { %3409 = vmatpush3.bf16.msra.mxu0 %v3971_v37  ;;  %3564 = vmatprep.mubr.bf16.mxu0 %v4674_v27  ;;  %v531_v37 = vld [vmem:[%s431_s19 + $0x4] sm:$0xf] }
  0xc2   : > { %3410 = vmatprep.subr.bf16.mxu0 %v3973_v56  ;;  %1869 = vmatprep.mubr.bf16.mxu1 %v4589_v16  ;;  %v3991_v56 = vld [vmem:[%s4174_s12 + $0x90] sm:$0xff]  }
  0xc5   : > { %3411 = vmatpush3.bf16.msra.mxu0 %v3974_v14 }
  0xc6   : > { %3412 = vmatprep.subr.bf16.mxu0 %v3975_v29  ;;  %v538_v29 = vmul.bf16 0.0, %v531_v37 }
  0xc8   : > { %3565 = vmatmul.mubr.bf16.gmra.mrb[76].mxu0 %v4688_v43  ;;  %1870 = vmatmul.mubr.bf16.gmra.mrb[76].mxu1 %v4362_v49  ;;  %v3985_v49 = vld [vmem:[%s5293_s3 + $0x230] sm:$0xff]  }
  0xc9   : > { %3413 = vmatpush3.bf16.msra.mxu0 %v3976_v58  ;;  %2264 = vmatprep.mubr.bf16.mxu0 %v4285_v3  ;;  %v3981_v3 = vld [vmem:[%s5293_s3 + $0x210] sm:$0xff]  }
  0xca   : > { %3414 = vmatprep.subr.bf16.mxu0 %v3977_v1  ;;  %3600 = vmatprep.mubr.bf16.mxu1 %v4535_v63 }
  0xcd   : > { %3415 = vmatpush3.bf16.msra.mxu0 %v3978_v17  ;;  %v532_v17 = vld [vmem:[%s431_s19 + $0x8] sm:$0x1] }
  0xd0   : > { %2265 = vmatmul.mubr.bf16.vlgmr.msra.gmra.mrb[80].mxu0 %v4244_v47  ;;  %3601 = vmatmul.mubr.bf16.vlgmr.msra.gmra.mrb[80].mxu1 %v4504_v30  ;;  %v3982_v47 = vld [vmem:[%s5293_s3 + $0x218] sm:$0xff]  }
  0xd1   : > { %2272 = vmatprep.mubr.bf16.mxu0 %v4339_v36  ;;  %3633 = vmatpush3.bf16.msra.mxu1 %v4540_v46  ;;  %v3983_v36 = vld [vmem:[%s5293_s3 + $0x220] sm:$0xff]  }
  0xd2   : > { %3604 = vmatprep.mubr.bf16.mxu1 %v4612_v15  ;;  %3634 = vmatprep.subr.bf16.mxu1 %v3980_v31  ;;  %v3987_v46 = vld [vmem:[%s4174_s12 + $0x60] sm:$0xff]  }
  0xd5   : > { %3635 = vmatpush3.bf16.msra.mxu1 %v3980_v31 }
  0xd6   : > { %3636 = vmatprep.subr.bf16.mxu1 %v3981_v3 }
  0xd8   : > { %2273 = vmatmul.mubr.bf16.gmra.mrb[84].mxu0 %v4298_v6  ;;  %3605 = vmatmul.mubr.bf16.gmra.mrb[84].mxu1 %v4622_v48  ;;  %v3984_v6 = vld [vmem:[%s5293_s3 + $0x228] sm:$0xff]  }
  0xd9   : > { %2280 = vmatprep.mubr.bf16.mxu0 %v4393_v9  ;;  %3608 = vmatprep.mubr.bf16.mxu1 %v4638_v23 }
  0xda   : > { %3637 = vmatpush3.bf16.msra.mxu1 %v3981_v3 }
  0xdb   : > { %3638 = vmatprep.subr.bf16.mxu1 %v3982_v47 }
  0xde   : > { %3639 = vmatpush3.bf16.msra.mxu1 %v3982_v47 }
  0xdf   : > { %3640 = vmatprep.subr.bf16.mxu1 %v3983_v36 }
  0xe0   : > { %2281 = vmatmul.mubr.bf16.gmra.mrb[88].mxu0 %v4352_v39  ;;  %3609 = vmatmul.mubr.bf16.gmra.mrb[88].mxu1 %v4648_v22  ;;  %v3986_v39 = vld [vmem:[%s5293_s3 + $0x238] sm:$0xff]  }
  0xe1   : > { %2288 = vmatprep.mubr.bf16.mxu0 %v4444_v11  ;;  %3612 = vmatprep.mubr.bf16.mxu1 %v4664_v50 }
  0xe2   : > { %3641 = vmatpush3.bf16.msra.mxu1 %v3983_v36 }
  0xe3   : > { %3642 = vmatprep.subr.bf16.mxu1 %v3984_v6 }
  0xe6   : > { %3643 = vmatpush3.bf16.msra.mxu1 %v3984_v6 }
  0xe7   : > { %3644 = vmatprep.subr.bf16.mxu1 %v3985_v49 }
  0xe8   : > { %2289 = vmatmul.mubr.bf16.gmra.mrb[92].mxu0 %v4410_v12  ;;  %3613 = vmatmul.mubr.bf16.gmra.mrb[92].mxu1 %v4674_v27 }
  0xe9   : > { %2296 = vmatprep.mubr.bf16.mxu0 %v4458_v13  ;;  %3616 = vmatprep.mubr.bf16.mxu1 %v4688_v43 }
  0xea   : > { %3645 = vmatpush3.bf16.msra.mxu1 %v3985_v49 }
  0xeb   : > { %3646 = vmatprep.subr.bf16.mxu1 %v3986_v39 }
  0xee   : > { %3647 = vmatpush3.bf16.msra.mxu1 %v3986_v39 }
  0xf0   : > { %2297 = vmatmul.mubr.bf16.gmra.mrb[96].mxu0 %v4424_v42  ;;  %3617 = vmatmul.mubr.bf16.gmra.mrb[0].mxu1 %v4223_v41 }
  0xf1   : > { %2304 = vmatprep.mubr.bf16.mxu0 %v4472_v62  ;;  %3620 = vmatprep.mubr.bf16.mxu1 %v4236_v45 }
  0xf8   : > { %2305 = vmatmul.mubr.bf16.gmra.mrb[100].mxu0 %v4437_v61  ;;  %3621 = vmatmul.mubr.bf16.gmra.mrb[4].mxu1 %v4278_v0 }
  0xf9   : > { %2312 = vmatprep.mubr.bf16.mxu0 %v4491_v28  ;;  %3624 = vmatprep.mubr.bf16.mxu1 %v4290_v4 }
 0x100   : > { %2313 = vmatmul.mubr.bf16.gmra.mrb[104].mxu0 %v4455_v19  ;;  %3625 = vmatmul.mubr.bf16.gmra.mrb[8].mxu1 %v4332_v33  ;;  %v5303_v19 = vld [vmem:[#allocation2_spill] sm:$0xff] }
 0x101   : > { %2320 = vmatprep.mubr.bf16.mxu0 %v4513_v24  ;;  %3628 = vmatprep.mubr.bf16.mxu1 %v4344_v10 }
 0x103   : > { %v3144_v9 = vpop.f32.mrb[0].mxu0 }
 0x104   : > { %v3145_v12 = vpop.f32.mrb[1].mxu0 }
 0x105   : > { %v4749_v11 = vadd.f32 %v3145_v12, %v3144_v9  ;;  %v3147_v13 = vpop.f32.mrb[2].mxu0  ;;  %v3992_v9 = vld [vmem:[%s4174_s12 + $0x9c] sm:$0xff]  }
 0x106   : > { %v3148_v42 = vpop.f32.mrb[3].mxu0 }
 0x107   : > { %v4752_v62 = vadd.f32 %v3148_v42, %v3147_v13 }
 0x108   : > { %2321 = vmatmul.mubr.bf16.gmra.mrb[108].mxu0 %v3987_v46  ;;  %3629 = vmatmul.mubr.bf16.gmra.mrb[12].mxu1 %v5303_v19 }
 0x109   : > { %2328 = vmatprep.mubr.bf16.mxu0 %v4531_v35  ;;  %3648 = vmatprep.mubr.bf16.mxu1 %v4612_v15  ;;  %v3989_v35 = vld [vmem:[%s4174_s12 + $0x78] sm:$0xff]  }
 0x10b   : > { %v3150_v61 = vpop.f32.mrb[4].mxu0 }
 0x10c   : > { %v3151_v28 = vpop.f32.mrb[5].mxu0 }
 0x10d   : > { %v4758_v30 = vadd.f32 %v3151_v28, %v3150_v61  ;;  %v3153_v63 = vpop.f32.mrb[6].mxu0 }
 0x10e   : > { %v3154_v51 = vpop.f32.mrb[7].mxu0 }
 0x10f   : > { %v4761_v52 = vadd.f32 %v3154_v51, %v3153_v63 }
 0x110   : > { %2329 = vmatmul.mubr.bf16.gmra.mrb[112].mxu0 %v3988_v8  ;;  %3649 = vmatmul.mubr.bf16.vlgmr.msra.gmra.mrb[80].mxu1 %v4622_v48  ;;  %v3990_v48 = vld [vmem:[%s4174_s12 + $0x84] sm:$0xff]  }
 0x111   : > { %2336 = vmatprep.mubr.bf16.mxu0 %v4549_v53  ;;  %3652 = vmatprep.mubr.bf16.mxu1 %v4638_v23 }
 0x113   : > { %v3156_v24 = vpop.f32.mrb[8].mxu0 }
 0x114   : > { %v3157_v55 = vpop.f32.mrb[9].mxu0 }
 0x115   : > { %v4767_v57 = vadd.f32 %v3157_v55, %v3156_v24  ;;  %v3159_v2 = vpop.f32.mrb[10].mxu0 }
 0x116   : > { %v3160_v20 = vpop.f32.mrb[11].mxu0 }
 0x117   : > { %v4770_v26 = vadd.f32 %v3160_v20, %v3159_v2 }
 0x118   : > { %2337 = vmatmul.mubr.bf16.gmra.mrb[116].mxu0 %v3989_v35  ;;  %3653 = vmatmul.mubr.bf16.gmra.mrb[84].mxu1 %v4648_v22 }
 0x119   : > { %2344 = vmatprep.mubr.bf16.mxu0 %v4559_v44  ;;  %3656 = vmatprep.mubr.bf16.mxu1 %v4664_v50  ;;  %v530_v50 = vld [vmem:[%s431_s19] sm:$0xf] }
 0x11b   : > { %v3162_v15 = vpop.f32.mrb[12].mxu0 }
 0x11c   : > { %v3163_v40 = vpop.f32.mrb[13].mxu0 }
 0x11d   : > { %v4776_v54 = vadd.f32 %v3163_v40, %v3162_v15  ;;  %v3165_v18 = vpop.f32.mrb[14].mxu0  ;;  %v3993_v15 = vld [vmem:[%s4174_s12 + $0xa8] sm:$0xff]  }
 0x11e   : > { %v3166_v7 = vpop.f32.mrb[15].mxu0 }
 0x11f   : > { %v4779_v53 = vadd.f32 %v3166_v7, %v3165_v18 }
 0x120   : > { %2345 = vmatmul.mubr.bf16.gmra.mrb[120].mxu0 %v3990_v48  ;;  %3657 = vmatmul.mubr.bf16.gmra.mrb[88].mxu1 %v4674_v27  ;;  %v537_v27 = vmul.bf16 0.0, %v530_v50 }
 0x121   : > { %2352 = vmatprep.mubr.bf16.mxu0 %v4569_v34  ;;  %3660 = vmatprep.mubr.bf16.mxu1 %v4688_v43 }
 0x122   : > { %v4804_v6 = vcombine.low %v537_v27, %v538_v29 }
 0x123   : > { %v3168_v23 = vpop.f32.mrb[16].mxu0  ;;  %v3280_v34 = vpop.f32.mrb[16].mxu1 }
 0x124   : > { %v3169_v38 = vpop.f32.mrb[17].mxu0  ;;  %v3281_v14 = vpop.f32.mrb[17].mxu1  ;;  %v910_v61 = vshll.u32 %v4804_v6, 16 }
 0x125   : > { %v4789_v44 = vadd.f32 %v3169_v38, %v3168_v23  ;;  %v3171_v22 = vpop.f32.mrb[18].mxu0  ;;  %v4796_v21 = vadd.f32 %v3281_v14, %v3280_v34  ;;  %v3283_v59 = vpop.f32.mrb[18].mxu1  ;;  %v3994_v14 = vld [vmem:[%s4174_s12 + $0xb4] sm:$0xff]  }
 0x126   : > { %v3172_v25 = vpop.f32.mrb[19].mxu0  ;;  %v3284_v58 = vpop.f32.mrb[19].mxu1  ;;  %v912_v55 = vrot.slane %v910_v61, 1 }
 0x127   : > { %v4792_v60 = vadd.f32 %v3172_v25, %v3171_v22  ;;  %v4798_v43 = vadd.f32 %v3284_v58, %v3283_v59 }
 0x128   : > { %2353 = vmatmul.mubr.bf16.gmra.mrb[124].mxu0 %v3991_v56  ;;  %3661 = vmatmul.mubr.bf16.gmra.mrb[92].mxu1 %v4223_v41 }
 0x129   : > { %2360 = vmatprep.mubr.bf16.mxu0 %v4579_v5  ;;  %3664 = vmatprep.mubr.bf16.mxu1 %v4236_v45  ;;  %v539_v5 = vmul.bf16 0.0, %v532_v17 }
 0x12b   : > { %v3174_v1 = vpop.f32.mrb[20].mxu0  ;;  %v3286_v39 = vpop.f32.mrb[20].mxu1  ;;  %v2951_v42 = vcombine.low %v539_v5, %v539_v5  ;;  %v989_v5 = vrot.slane %v4804_v6, 1 }
 0x12c   : > { %v3175_v31 = vpop.f32.mrb[21].mxu0  ;;  %v3287_v12 = vpop.f32.mrb[21].mxu1 }
 0x12d   : > { %v4801_v3 = vadd.f32 %v3175_v31, %v3174_v1  ;;  %v3177_v47 = vpop.f32.mrb[22].mxu0  ;;  %v4810_v13 = vadd.f32 %v3287_v12, %v3286_v39  ;;  %v3289_v41 = vpop.f32.mrb[22].mxu1  ;;  %v915_v2 = vshll.u32 %v2951_v42, 16  ;;  %v990_v39 = vrot.slane %v2951_v42, 1 }
 0x12e   : > { %v3178_v36 = vpop.f32.mrb[23].mxu0  ;;  %v3290_v28 = vpop.f32.mrb[23].mxu1 }
 0x12f   : > { %v4806_v49 = vadd.f32 %v3178_v36, %v3177_v47  ;;  %v4813_v63 = vadd.f32 %v3290_v28, %v3289_v41  ;;  %v917_v48 = vrot.slane %v915_v2, 1  ;;  %v5304_v36 = vld [vmem:[#allocation3_spill] sm:$0xff] }
 0x130   : > { %2361 = vmatmul.mubr.bf16.gmra.mrb[128].mxu0 %v3992_v9  ;;  %3665 = vmatmul.mubr.bf16.gmra.mrb[0].mxu1 %v4278_v0 }
 0x131   : > { %2368 = vmatprep.mubr.bf16.mxu0 %v4589_v16  ;;  %3668 = vmatprep.mubr.bf16.mxu1 %v4290_v4  ;;  %v908_v16 = vshrl.u32 %v4804_v6, 16 }
 0x133   : > { %v3180_v45 = vpop.f32.mrb[24].mxu0  ;;  %v3292_v35 = vpop.f32.mrb[24].mxu1  ;;  %v913_v7 = vor.u32 %v912_v55, %v908_v16 }
 0x134   : > { %v3181_v46 = vpop.f32.mrb[25].mxu0  ;;  %v3293_v40 = vpop.f32.mrb[25].mxu1 }
 0x135   : > { %v4816_v51 = vadd.f32 %v3181_v46, %v3180_v45  ;;  %v3183_v24 = vpop.f32.mrb[26].mxu0  ;;  %v4824_v18 = vadd.f32 %v3293_v40, %v3292_v35  ;;  %v3295_v0 = vpop.f32.mrb[26].mxu1 }
 0x136   : > { %v3184_v8 = vpop.f32.mrb[27].mxu0  ;;  %v3296_v23 = vpop.f32.mrb[27].mxu1 }
 0x137   : > { %v4820_v20 = vadd.f32 %v3184_v8, %v3183_v24  ;;  %v4826_v38 = vadd.f32 %v3296_v23, %v3295_v0 }
 0x138   : > { %2369 = vmatmul.mubr.bf16.gmra.mrb[132].mxu0 %v3993_v15  ;;  %3669 = vmatmul.mubr.bf16.gmra.mrb[4].mxu1 %v4332_v33 }
 0x139   : > { %2376 = vmatprep.mubr.bf16.mxu0 %v4598_v32  ;;  %3672 = vmatprep.mubr.bf16.mxu1 %v4344_v10  ;;  %v918_v32 = vsel %vm702_vm1, %v913_v7, %v917_v48 }
 0x13b   : > { %v3186_v4 = vpop.f32.mrb[28].mxu0  ;;  %v3298_v56 = vpop.f32.mrb[28].mxu1 }
 0x13c   : > { %v3187_v22 = vpop.f32.mrb[29].mxu0  ;;  %v3299_v59 = vpop.f32.mrb[29].mxu1 }
 0x13d   : > { %v4829_v25 = vadd.f32 %v3187_v22, %v3186_v4  ;;  %v3189_v50 = vpop.f32.mrb[30].mxu0  ;;  %v4836_v27 = vadd.f32 %v3299_v59, %v3298_v56  ;;  %v3301_v29 = vpop.f32.mrb[30].mxu1 }
 0x13e   : > { %v3190_v37 = vpop.f32.mrb[31].mxu0  ;;  %v3302_v58 = vpop.f32.mrb[31].mxu1 }
 0x13f   : > { %v4833_v34 = vadd.f32 %v3190_v37, %v3189_v50  ;;  %v4838_v1 = vadd.f32 %v3302_v58, %v3301_v29 }
 0x140   : > { %2377 = vmatmul.mubr.bf16.gmra.mrb[136].mxu0 %v3994_v14  ;;  %3673 = vmatmul.mubr.bf16.gmra.mrb[8].mxu1 %v5303_v19  ;;  %v991_v19 = vsel %vm937_vm0, %v989_v5, %v990_v39 }
 0x141   : > { %2384 = vmatprep.mubr.bf16.mxu0 %v918_v32  ;;  %3676 = vmatprep.mubr.bf16.mxu1 %v5304_v36 }
 0x143   : > { %v3192_v33 = vpop.f32.mrb[32].mxu0  ;;  %v3304_v12 = vpop.f32.mrb[32].mxu1 }
 0x144   : > { %v3193_v17 = vpop.f32.mrb[33].mxu0  ;;  %v3305_v41 = vpop.f32.mrb[33].mxu1 }
 0x145   : > { %v4841_v10 = vadd.f32 %v3193_v17, %v3192_v33  ;;  %v3195_v31 = vpop.f32.mrb[34].mxu0  ;;  %v4848_v61 = vadd.f32 %v3305_v41, %v3304_v12  ;;  %v3307_v28 = vpop.f32.mrb[34].mxu1 }
 0x146   : > { %v3196_v47 = vpop.f32.mrb[35].mxu0  ;;  %v3308_v45 = vpop.f32.mrb[35].mxu1 }
 0x147   : > { %v4845_v9 = vadd.f32 %v3196_v47, %v3195_v31  ;;  %v4851_v24 = vadd.f32 %v3308_v45, %v3307_v28 }
 0x148   : > { %2385 = vmatmul.mubr.bf16.gmra.mrb[140].mxu0 %v4804_v6  ;;  %3677 = vmatmul.mubr.bf16.gmra.mrb[12].mxu1 %v991_v19 }
 0x14b   : > { %v3198_v46 = vpop.f32.mrb[36].mxu0  ;;  %v3310_v35 = vpop.f32.mrb[36].mxu1 }
 0x14c   : > { %v3199_v8 = vpop.f32.mrb[37].mxu0  ;;  %v3311_v15 = vpop.f32.mrb[37].mxu1 }
 0x14d   : > { %v3200_v16 = vadd.f32 %v3199_v8, %v3198_v46  ;;  %v3201_v55 = vpop.f32.mrb[38].mxu0  ;;  %v4853_v40 = vadd.f32 %v3311_v15, %v3310_v35  ;;  %v3313_v6 = vpop.f32.mrb[38].mxu1 }
 0x14e   : > { %v3202_v42 = vpop.f32.mrb[39].mxu0  ;;  %v3314_v0 = vpop.f32.mrb[39].mxu1 }
 0x14f   : > { %v3203_v2 = vadd.f32 %v3202_v42, %v3201_v55  ;;  %v4855_v48 = vadd.f32 %v3314_v0, %v3313_v6 }
 0x153   : > { %v3204_v7 = vpop.f32.mrb[40].mxu0  ;;  %v3316_v32 = vpop.f32.mrb[40].mxu1 }
 0x154   : > { %v3205_v23 = vpop.f32.mrb[41].mxu0  ;;  %v3317_v56 = vpop.f32.mrb[41].mxu1 }
 0x155   : > { %v3206_v4 = vadd.f32 %v3205_v23, %v3204_v7  ;;  %v3207_v22 = vpop.f32.mrb[42].mxu0  ;;  %v4859_v14 = vadd.f32 %v3317_v56, %v3316_v32  ;;  %v3319_v59 = vpop.f32.mrb[42].mxu1 }
 0x156   : > { %v3208_v50 = vpop.f32.mrb[43].mxu0  ;;  %v3320_v29 = vpop.f32.mrb[43].mxu1 }
 0x157   : > { %v4857_v37 = vadd.f32 %v3208_v50, %v3207_v22  ;;  %v4861_v33 = vadd.f32 %v3320_v29, %v3319_v59 }
 0x15b   : > { %v3210_v58 = vpop.f32.mrb[44].mxu0  ;;  %v3322_v39 = vpop.f32.mrb[44].mxu1 }
 0x15c   : > { %v3211_v17 = vpop.f32.mrb[45].mxu0  ;;  %v3323_v12 = vpop.f32.mrb[45].mxu1 }
 0x15d   : > { %v4863_v31 = vadd.f32 %v3211_v17, %v3210_v58  ;;  %v3213_v47 = vpop.f32.mrb[46].mxu0  ;;  %v4867_v41 = vadd.f32 %v3323_v12, %v3322_v39  ;;  %v3325_v28 = vpop.f32.mrb[46].mxu1 }
 0x15e   : > { %v3214_v36 = vpop.f32.mrb[47].mxu0  ;;  %v3326_v19 = vpop.f32.mrb[47].mxu1 }
 0x15f   : > { %v4865_v5 = vadd.f32 %v3214_v36, %v3213_v47  ;;  %v4869_v46 = vadd.f32 %v3326_v19, %v3325_v28 }
 0x163   : > { %v3216_v45 = vpop.f32.mrb[48].mxu0  ;;  %v3328_v6 = vpop.f32.mrb[48].mxu1 }
 0x164   : > { %v3217_v8 = vpop.f32.mrb[49].mxu0  ;;  %v3329_v0 = vpop.f32.mrb[49].mxu1 }
 0x165   : > { %v4871_v55 = vadd.f32 %v3217_v8, %v3216_v45  ;;  %v3219_v42 = vpop.f32.mrb[50].mxu0  ;;  %v3330_v7 = vadd.f32 %v3329_v0, %v3328_v6  ;;  %v3331_v23 = vpop.f32.mrb[50].mxu1 }
 0x166   : > { %v3220_v35 = vpop.f32.mrb[51].mxu0  ;;  %v3332_v22 = vpop.f32.mrb[51].mxu1 }
 0x167   : > { %v4873_v15 = vadd.f32 %v3220_v35, %v3219_v42  ;;  %v4876_v32 = vadd.f32 %v3330_v7, %v4841_v10  ;;  %v3333_v56 = vadd.f32 %v3332_v22, %v3331_v23 }
 0x169   : > { %v4881_v17 = vadd.f32 %v3333_v56, %v4845_v9 }
 0x16b   : > { %v3222_v50 = vpop.f32.mrb[52].mxu0  ;;  %v3334_v39 = vpop.f32.mrb[52].mxu1 }
 0x16c   : > { %v3223_v59 = vpop.f32.mrb[53].mxu0  ;;  %v3335_v12 = vpop.f32.mrb[53].mxu1 }
 0x16d   : > { %v4878_v29 = vadd.f32 %v3223_v59, %v3222_v50  ;;  %v3225_v58 = vpop.f32.mrb[54].mxu0  ;;  %v3336_v28 = vadd.f32 %v3335_v12, %v3334_v39  ;;  %v3337_v19 = vpop.f32.mrb[54].mxu1 }
 0x16e   : > { %v3226_v47 = vpop.f32.mrb[55].mxu0  ;;  %v3338_v45 = vpop.f32.mrb[55].mxu1 }
 0x16f   : > { %v4883_v36 = vadd.f32 %v3226_v47, %v3225_v58  ;;  %v4885_v42 = vadd.f32 %v3336_v28, %v3200_v16  ;;  %v3339_v10 = vadd.f32 %v3338_v45, %v3337_v19 }
 0x171   : > { %v4889_v7 = vadd.f32 %v3339_v10, %v3203_v2 }
 0x173   : > { %v3228_v8 = vpop.f32.mrb[56].mxu0  ;;  %v3340_v22 = vpop.f32.mrb[56].mxu1 }
 0x174   : > { %v3229_v35 = vpop.f32.mrb[57].mxu0  ;;  %v3341_v50 = vpop.f32.mrb[57].mxu1 }
 0x175   : > { %v4887_v6 = vadd.f32 %v3229_v35, %v3228_v8  ;;  %v3231_v0 = vpop.f32.mrb[58].mxu0  ;;  %v3342_v56 = vadd.f32 %v3341_v50, %v3340_v22  ;;  %v3343_v59 = vpop.f32.mrb[58].mxu1 }
 0x176   : > { %v3232_v9 = vpop.f32.mrb[59].mxu0  ;;  %v3344_v58 = vpop.f32.mrb[59].mxu1 }
 0x177   : > { %v4891_v23 = vadd.f32 %v3232_v9, %v3231_v0  ;;  %v4893_v39 = vadd.f32 %v3342_v56, %v3206_v4  ;;  %v3345_v16 = vadd.f32 %v3344_v58, %v3343_v59 }
 0x179   : > { %v4898_v45 = vadd.f32 %v3345_v16, %v4857_v37 }
 0x17b   : > { %v3234_v47 = vpop.f32.mrb[60].mxu0  ;;  %v3346_v10 = vpop.f32.mrb[60].mxu1 }
 0x17c   : > { %v3235_v12 = vpop.f32.mrb[61].mxu0  ;;  %v3347_v35 = vpop.f32.mrb[61].mxu1 }
 0x17d   : > { %v4895_v28 = vadd.f32 %v3235_v12, %v3234_v47  ;;  %v3237_v19 = vpop.f32.mrb[62].mxu0  ;;  %v3348_v0 = vadd.f32 %v3347_v35, %v3346_v10  ;;  %v3349_v9 = vpop.f32.mrb[62].mxu1 }
 0x17e   : > { %v3238_v2 = vpop.f32.mrb[63].mxu0  ;;  %v3350_v22 = vpop.f32.mrb[63].mxu1 }
 0x17f   : > { %v4900_v8 = vadd.f32 %v3238_v2, %v3237_v19  ;;  %v4903_v4 = vadd.f32 %v3348_v0, %v4863_v31  ;;  %v3351_v56 = vadd.f32 %v3350_v22, %v3349_v9 }
 0x181   : > { %v4908_v16 = vadd.f32 %v3351_v56, %v4865_v5 }
 0x183   : > { %v3554_v50 = vpop.f32.mrb[64].mxu0  ;;  %v3352_v35 = vpop.f32.mrb[64].mxu1 }
 0x184   : > { %v1455_v59 = vadd.f32 %v3554_v50, %v4758_v30  ;;  %v1446_v58 = vpop.f32.mrb[65].mxu0 }
 0x185   : > { %v1447_v47 = vadd.f32 %v4749_v11, %v1446_v58  ;;  %v3555_v37 = vpop.f32.mrb[66].mxu0  ;;  %v3353_v11 = vpop.f32.mrb[65].mxu1 }
 0x186   : > { %v4911_v12 = vadd.f32 %v4810_v13, %v1455_v59  ;;  %v1458_v19 = vadd.f32 %v3555_v37, %v4761_v52  ;;  %v1449_v2 = vpop.f32.mrb[67].mxu0  ;;  %v3354_v5 = vadd.f32 %v3353_v11, %v3352_v35  ;;  %v3355_v9 = vpop.f32.mrb[66].mxu1 }
 0x187   : > { %v4915_v10 = vadd.f32 %v4796_v21, %v1447_v47  ;;  %v1450_v31 = vadd.f32 %v4752_v62, %v1449_v2  ;;  %v3356_v13 = vpop.f32.mrb[67].mxu1 }
 0x188   : > { %v4919_v30 = vadd.f32 %v4813_v63, %v1458_v19  ;;  %v4925_v52 = vadd.f32 %v3354_v5, %v4871_v55  ;;  %v3357_v50 = vadd.f32 %v3356_v13, %v3355_v9 }
 0x189   : > { %v4922_v0 = vadd.f32 %v4798_v43, %v1450_v31 }
 0x18a   : > { %v4930_v63 = vadd.f32 %v3357_v50, %v4873_v15 }
 0x18b   : > { %v3558_v22 = vpop.f32.mrb[68].mxu0  ;;  %v3358_v19 = vpop.f32.mrb[68].mxu1 }
 0x18c   : > { %v1471_v21 = vadd.f32 %v3558_v22, %v4776_v54  ;;  %v1462_v56 = vpop.f32.mrb[69].mxu0 }
 0x18d   : > { %v1463_v62 = vadd.f32 %v4767_v57, %v1462_v56  ;;  %v3559_v59 = vpop.f32.mrb[70].mxu0  ;;  %v3359_v57 = vpop.f32.mrb[69].mxu1 }
 0x18e   : > { %v4933_v43 = vadd.f32 %v4836_v27, %v1471_v21  ;;  %v1474_v58 = vadd.f32 %v3559_v59, %v4779_v53  ;;  %v1465_v47 = vpop.f32.mrb[71].mxu0  ;;  %v3360_v15 = vadd.f32 %v3359_v57, %v3358_v19  ;;  %v3361_v31 = vpop.f32.mrb[70].mxu1 }
 0x18f   : > { %v4937_v37 = vadd.f32 %v4824_v18, %v1463_v62  ;;  %v1466_v55 = vadd.f32 %v4770_v26, %v1465_v47  ;;  %v3362_v27 = vpop.f32.mrb[71].mxu1 }
 0x190   : > { %v4941_v54 = vadd.f32 %v4838_v1, %v1474_v58  ;;  %v4947_v53 = vadd.f32 %v3360_v15, %v4878_v29  ;;  %v3363_v11 = vadd.f32 %v3362_v27, %v3361_v31 }
 0x191   : > { %v4944_v2 = vadd.f32 %v4826_v38, %v1466_v55 }
 0x192   : > { %v4952_v1 = vadd.f32 %v3363_v11, %v4883_v36 }
 0x193   : > { %v3562_v35 = vpop.f32.mrb[72].mxu0  ;;  %v3364_v21 = vpop.f32.mrb[72].mxu1 }
 0x194   : > { %v1487_v18 = vadd.f32 %v3562_v35, %v4801_v3  ;;  %v1478_v5 = vpop.f32.mrb[73].mxu0 }
 0x195   : > { %v1479_v26 = vadd.f32 %v4789_v44, %v1478_v5  ;;  %v3563_v9 = vpop.f32.mrb[74].mxu0  ;;  %v3365_v44 = vpop.f32.mrb[73].mxu1 }
 0x196   : > { %v4955_v38 = vadd.f32 %v4853_v40, %v1487_v18  ;;  %v1490_v13 = vadd.f32 %v3563_v9, %v4806_v49  ;;  %v1481_v22 = vpop.f32.mrb[75].mxu0  ;;  %v3366_v36 = vadd.f32 %v3365_v44, %v3364_v21  ;;  %v3367_v62 = vpop.f32.mrb[74].mxu1 }
 0x197   : > { %v4959_v50 = vadd.f32 %v4848_v61, %v1479_v26  ;;  %v1482_v29 = vadd.f32 %v4792_v60, %v1481_v22  ;;  %v3368_v40 = vpop.f32.mrb[75].mxu1 }
 0x198   : > { %v4963_v3 = vadd.f32 %v4855_v48, %v1490_v13  ;;  %v4969_v49 = vadd.f32 %v3366_v36, %v4887_v6  ;;  %v3369_v58 = vadd.f32 %v3368_v40, %v3367_v62 }
 0x199   : > { %v4966_v56 = vadd.f32 %v4851_v24, %v1482_v29 }
 0x19a   : > { %v4974_v48 = vadd.f32 %v3369_v58, %v4891_v23 }
 0x19b   : > { %v3566_v59 = vpop.f32.mrb[76].mxu0  ;;  %v3370_v31 = vpop.f32.mrb[76].mxu1 }
 0x19c   : > { %v1503_v61 = vadd.f32 %v3566_v59, %v4829_v25  ;;  %v1494_v47 = vpop.f32.mrb[77].mxu0 }
 0x19d   : > { %v1495_v60 = vadd.f32 %v4816_v51, %v1494_v47  ;;  %v3567_v55 = vpop.f32.mrb[78].mxu0  ;;  %v3371_v51 = vpop.f32.mrb[77].mxu1 }
 0x19e   : > { %v4977_v24 = vadd.f32 %v4867_v41, %v1503_v61  ;;  %v1506_v19 = vadd.f32 %v3567_v55, %v4833_v34  ;;  %v1497_v57 = vpop.f32.mrb[79].mxu0  ;;  %v3372_v23 = vadd.f32 %v3371_v51, %v3370_v31  ;;  %v3373_v35 = vpop.f32.mrb[78].mxu1 }
 0x19f   : > { %v4981_v15 = vadd.f32 %v4859_v14, %v1495_v60  ;;  %v1498_v6 = vadd.f32 %v4820_v20, %v1497_v57  ;;  %v3374_v11 = vpop.f32.mrb[79].mxu1 }
 0x1a0   : > { %v4985_v25 = vadd.f32 %v4869_v46, %v1506_v19  ;;  %v4989_v18 = vadd.f32 %v3372_v23, %v4895_v28  ;;  %v3375_v34 = vadd.f32 %v3374_v11, %v3373_v35 }
 0x1a1   : > { %v1803_v27 = vadd.f32 %v4861_v33, %v1498_v6 }
 0x1a2   : > { %v4992_v20 = vadd.f32 %v3375_v34, %v4900_v8 }
 0x1a3   : > { %v3416_v41 = vpop.f32.mrb[80].mxu0 }
 0x1a4   : > { %v3417_v5 = vpop.f32.mrb[81].mxu0 }
 0x1a5   : > { %v3418_v14 = vadd.f32 %v3417_v5, %v3416_v41  ;;  %v3419_v26 = vpop.f32.mrb[82].mxu0 }
 0x1a6   : > { %v3420_v9 = vpop.f32.mrb[83].mxu0 }
 0x1a7   : > { %v3421_v46 = vadd.f32 %v3420_v9, %v3419_v26  ;;  %v4995_v13 = vadd.f32 %v3418_v14, %v4915_v10 }
 0x1a9   : > { %v4998_v33 = vadd.f32 %v3421_v46, %v4922_v0 }
 0x1ab   : > { %v3422_v22 = vpop.f32.mrb[84].mxu0 }
 0x1ac   : > { %v3423_v29 = vpop.f32.mrb[85].mxu0 }
 0x1ad   : > { %v3424_v21 = vadd.f32 %v3423_v29, %v3422_v22  ;;  %v3425_v28 = vpop.f32.mrb[86].mxu0 }
 0x1ae   : > { %v3426_v44 = vpop.f32.mrb[87].mxu0 }
 0x1af   : > { %v3427_v36 = vadd.f32 %v3426_v44, %v3425_v28  ;;  %v3698_v62 = vadd.f32 %v3424_v21, %v4911_v12 }
 0x1b1   : > { %v5002_v40 = vadd.f32 %v3427_v36, %v4919_v30 }
 0x1b3   : > { %v3428_v8 = vpop.f32.mrb[88].mxu0 }
 0x1b4   : > { %v3429_v59 = vpop.f32.mrb[89].mxu0 }
 0x1b5   : > { %v3430_v58 = vadd.f32 %v3429_v59, %v3428_v8  ;;  %v3431_v61 = vpop.f32.mrb[90].mxu0 }
 0x1b6   : > { %v3432_v10 = vpop.f32.mrb[91].mxu0 }
 0x1b7   : > { %v3433_v47 = vadd.f32 %v3432_v10, %v3431_v61  ;;  %v5005_v0 = vadd.f32 %v3430_v58, %v4937_v37 }
 0x1b9   : > { %v5008_v60 = vadd.f32 %v3433_v47, %v4944_v2 }
 0x1bb   : > { %v3434_v55 = vpop.f32.mrb[92].mxu0 }
 0x1bc   : > { %v3435_v19 = vpop.f32.mrb[93].mxu0 }
 0x1bd   : > { %v3436_v57 = vadd.f32 %v3435_v19, %v3434_v55  ;;  %v3437_v6 = vpop.f32.mrb[94].mxu0 }
 0x1be   : > { %v3438_v12 = vpop.f32.mrb[95].mxu0 }
 0x1bf   : > { %v3439_v31 = vadd.f32 %v3438_v12, %v3437_v6  ;;  %v5011_v30 = vadd.f32 %v3436_v57, %v4933_v43 }
 0x1c1   : > { %v5014_v51 = vadd.f32 %v3439_v31, %v4941_v54 }
 0x1c3   : > { %v3440_v23 = vpop.f32.mrb[96].mxu0 }
 0x1c4   : > { %v3441_v35 = vpop.f32.mrb[97].mxu0 }
 0x1c5   : > { %v3442_v11 = vadd.f32 %v3441_v35, %v3440_v23  ;;  %v3443_v37 = vpop.f32.mrb[98].mxu0 }
 0x1c6   : > { %v3444_v41 = vpop.f32.mrb[99].mxu0 }
 0x1c7   : > { %v3445_v34 = vadd.f32 %v3444_v41, %v3443_v37  ;;  %v5017_v2 = vadd.f32 %v3442_v11, %v4959_v50  ;;  %v5045_v11 = vld [vmem:[%s5294_s4] ss:$0 sm:$0xff] }
 0x1c9   : > { %v5020_v5 = vadd.f32 %v3445_v34, %v4966_v56 }
 0x1cb   : > { %v3446_v14 = vpop.f32.mrb[100].mxu0 }
 0x1cc   : > { %v3447_v26 = vpop.f32.mrb[101].mxu0 }
 0x1cd   : > { %v3448_v9 = vadd.f32 %v3447_v26, %v3446_v14  ;;  %v3449_v43 = vpop.f32.mrb[102].mxu0 }
 0x1ce   : > { %v3450_v46 = vpop.f32.mrb[103].mxu0 }
 0x1cf   : > { %v3451_v22 = vadd.f32 %v3450_v46, %v3449_v43  ;;  %v5023_v54 = vadd.f32 %v3448_v9, %v4955_v38  ;;  %v5056_v43 = vld [vmem:[%s5295_s5] ss:$0 sm:$0xff] }
 0x1d1   : > { %v5026_v29 = vadd.f32 %v3451_v22, %v4963_v3 }
 0x1d3   : > { %v3452_v21 = vpop.f32.mrb[104].mxu0 }
 0x1d4   : > { %v3453_v28 = vpop.f32.mrb[105].mxu0 }
 0x1d5   : > { %v3454_v44 = vadd.f32 %v3453_v28, %v3452_v21  ;;  %v3455_v50 = vpop.f32.mrb[106].mxu0 }
 0x1d6   : > { %v3456_v36 = vpop.f32.mrb[107].mxu0 }
 0x1d7   : > { %v3457_v8 = vadd.f32 %v3456_v36, %v3455_v50  ;;  %v5029_v56 = vadd.f32 %v3454_v44, %v4981_v15 }
 0x1d9   : > { %v5031_v59 = vadd.f32 %v3457_v8, %v1803_v27 }
 0x1db   : > { %v3458_v58 = vpop.f32.mrb[108].mxu0 }
 0x1dc   : > { %v3459_v61 = vpop.f32.mrb[109].mxu0 }
 0x1dd   : > { %v3460_v10 = vadd.f32 %v3459_v61, %v3458_v58  ;;  %v3461_v47 = vpop.f32.mrb[110].mxu0 }
 0x1de   : > { %v3462_v38 = vpop.f32.mrb[111].mxu0 }
 0x1df   : > { %v3463_v55 = vadd.f32 %v3462_v38, %v3461_v47  ;;  %v5034_v3 = vadd.f32 %v3460_v10, %v4977_v24 }
 0x1e1   : > { %v5037_v19 = vadd.f32 %v3463_v55, %v4985_v25 }
 0x1e3   : > { %v3464_v57 = vpop.f32.mrb[112].mxu0  ;;  %v3650_v35 = vpop.f32.mrb[80].mxu1 }
 0x1e4   : > { %v3465_v6 = vpop.f32.mrb[113].mxu0  ;;  %v3699_v24 = vadd.f32 %v3698_v62, %v3650_v35  ;;  %v2427_v37 = vpop.f32.mrb[81].mxu1 }
 0x1e5   : > { %v3466_v12 = vadd.f32 %v3465_v6, %v3464_v57  ;;  %v3467_v31 = vpop.f32.mrb[114].mxu0  ;;  %v3703_v41 = vadd.f32 %v4995_v13, %v2427_v37  ;;  %v3651_v34 = vpop.f32.mrb[82].mxu1 }
 0x1e6   : > { %v3468_v15 = vpop.f32.mrb[115].mxu0  ;;  %v2595_v14 = vadd.f32 %v3699_v24, %v5045_v11  ;;  %v2430_v26 = vpop.f32.mrb[83].mxu1 }
 0x1e7   : > { %v3469_v23 = vadd.f32 %v3468_v15, %v3467_v31  ;;  %v5040_v27 = vadd.f32 %v4876_v32, %v3466_v12  ;;  %v3707_v32 = vadd.f32 %v5002_v40, %v3651_v34  ;;  %v2593_v62 = vadd.f32 %v3703_v41, %v5045_v11  ;;  %v5065_v40 = vld [vmem:[%s5296_s6] ss:$0 sm:$0xff] }
 0x1e8   : > { %v3711_v46 = vadd.f32 %v4998_v33, %v2430_v26  ;;  %v2627_v22 = vmax.f32 %v2595_v14, 0.0 }
 0x1e9   : > { %v5048_v25 = vadd.f32 %v4881_v17, %v3469_v23  ;;  %v2596_v13 = vadd.f32 %v3707_v32, %v5045_v11  ;;  %v2625_v44 = vmax.f32 %v2593_v62, 0.0 }
 0x1ea   : > { %v2594_v50 = vadd.f32 %v3711_v46, %v5045_v11  ;;  %v2666_v8 = vmul.f32 %v5056_v43, %v2627_v22 }
 0x1eb   : > { %v3470_v9 = vpop.f32.mrb[116].mxu0  ;;  %v2628_v58 = vmax.f32 %v2596_v13, 0.0  ;;  %v2664_v10 = vmul.f32 %v5056_v43, %v2625_v44  ;;  %v3654_v38 = vpop.f32.mrb[84].mxu1 }
 0x1ec   : > { %v3471_v17 = vpop.f32.mrb[117].mxu0  ;;  %v2626_v47 = vmax.f32 %v2594_v50, 0.0  ;;  %v2705_v55 = vadd.f32 %v5065_v40, %v2666_v8  ;;  %v3715_v6 = vadd.f32 %v5011_v30, %v3654_v38 }
 0x1ed   : > { %v3472_v21 = vadd.f32 %v3471_v17, %v3470_v9  ;;  %v3473_v28 = vpop.f32.mrb[118].mxu0  ;;  %v2667_v57 = vmul.f32 %v5056_v43, %v2628_v58  ;;  %v2703_v31 = vadd.f32 %v5065_v40, %v2664_v10 }
 0x1ee   : > { %v3474_v36 = vpop.f32.mrb[119].mxu0  ;;  %v2665_v15 = vmul.f32 %v5056_v43, %v2626_v47  ;;  %2738 = vst.msk [vmem:[%s5075_s8 + $0x10] sm:$0xff] %vm2735_vm2, %v2705_v55  ;;  %v2599_v37 = vadd.f32 %v3715_v6, %v5045_v11 }
 0x1ef   : > { %v3475_v33 = vadd.f32 %v3474_v36, %v3473_v28  ;;  %v5070_v61 = vadd.f32 %v4885_v42, %v3472_v21  ;;  %v2443_v42 = vpop.f32.mrb[85].mxu1  ;;  %v2706_v24 = vadd.f32 %v5065_v40, %v2667_v57  ;;  %2736 = vst.msk [vmem:[%s5075_s8] sm:$0xff] %vm2735_vm2, %v2703_v31 }
 0x1f0   : > { %v3719_v23 = vadd.f32 %v5005_v0, %v2443_v42  ;;  %v3655_v35 = vpop.f32.mrb[86].mxu1  ;;  %v2704_v34 = vadd.f32 %v5065_v40, %v2665_v15  ;;  %v2631_v26 = vmax.f32 %v2599_v37, 0.0 }
 0x1f1   : > { %v5082_v12 = vadd.f32 %v4889_v7, %v3475_v33  ;;  %v3723_v30 = vadd.f32 %v5014_v51, %v3655_v35  ;;  %v2446_v41 = vpop.f32.mrb[87].mxu1  ;;  %2739 = vst.msk [vmem:[%s5075_s8 + $0x18] sm:$0xff] %vm2735_vm2, %v2706_v24 }
 0x1f2   : > { %v2597_v14 = vadd.f32 %v3719_v23, %v5045_v11  ;;  %v3727_v0 = vadd.f32 %v5008_v60, %v2446_v41  ;;  %2737 = vst.msk [vmem:[%s5075_s8 + $0x8] sm:$0xff] %vm2735_vm2, %v2704_v34  ;;  %v2670_v13 = vmul.f32 %v5056_v43, %v2631_v26 }
 0x1f3   : > { %v3476_v7 = vpop.f32.mrb[120].mxu0  ;;  %v2600_v9 = vadd.f32 %v3723_v30, %v5045_v11  ;;  %v3658_v36 = vpop.f32.mrb[88].mxu1 }
 0x1f4   : > { %v3477_v32 = vpop.f32.mrb[121].mxu0  ;;  %v2629_v51 = vmax.f32 %v2597_v14, 0.0  ;;  %v2598_v17 = vadd.f32 %v3727_v0, %v5045_v11  ;;  %v2709_v8 = vadd.f32 %v5065_v40, %v2670_v13  ;;  %v3731_v33 = vadd.f32 %v5023_v54, %v3658_v36  ;;  %v2459_v10 = vpop.f32.mrb[89].mxu1 }
 0x1f5   : > { %v3478_v62 = vadd.f32 %v3477_v32, %v3476_v7  ;;  %v3479_v46 = vpop.f32.mrb[122].mxu0  ;;  %v2632_v21 = vmax.f32 %v2600_v9, 0.0  ;;  %v3735_v55 = vadd.f32 %v5017_v2, %v2459_v10  ;;  %v3659_v57 = vpop.f32.mrb[90].mxu1 }
 0x1f6   : > { %v3480_v22 = vpop.f32.mrb[123].mxu0  ;;  %v2668_v44 = vmul.f32 %v5056_v43, %v2629_v51  ;;  %v2630_v50 = vmax.f32 %v2598_v17, 0.0  ;;  %2742 = vst.msk [vmem:[%s5075_s8 + $0x30] sm:$0xff] %vm2735_vm2, %v2709_v8  ;;  %v2603_v42 = vadd.f32 %v3731_v33, %v5045_v11  ;;  %v3739_v54 = vadd.f32 %v5026_v29, %v3659_v57  ;;  %v2462_v31 = vpop.f32.mrb[91].mxu1 }
 0x1f7   : > { %v3481_v28 = vadd.f32 %v3480_v22, %v3479_v46  ;;  %v5105_v60 = vadd.f32 %v4893_v39, %v3478_v62  ;;  %v2671_v58 = vmul.f32 %v5056_v43, %v2632_v21  ;;  %v2601_v23 = vadd.f32 %v3735_v55, %v5045_v11 }
 0x1f8   : > { %v2707_v38 = vadd.f32 %v5065_v40, %v2668_v44  ;;  %v2669_v39 = vmul.f32 %v5056_v43, %v2630_v50  ;;  %v3743_v2 = vadd.f32 %v5020_v5, %v2462_v31  ;;  %v2635_v24 = vmax.f32 %v2603_v42, 0.0 }
 0x1f9   : > { %v5112_v47 = vadd.f32 %v4898_v45, %v3481_v28  ;;  %v2710_v6 = vadd.f32 %v5065_v40, %v2671_v58  ;;  %v2604_v37 = vadd.f32 %v3739_v54, %v5045_v11  ;;  %v2633_v29 = vmax.f32 %v2601_v23, 0.0 }
 0x1fa   : > { %2740 = vst.msk [vmem:[%s5075_s8 + $0x20] sm:$0xff] %vm2735_vm2, %v2707_v38  ;;  %v2708_v15 = vadd.f32 %v5065_v40, %v2669_v39  ;;  %v2602_v7 = vadd.f32 %v3743_v2, %v5045_v11  ;;  %v2674_v14 = vmul.f32 %v5056_v43, %v2635_v24 }
 0x1fb   : > { %v3482_v45 = vpop.f32.mrb[124].mxu0  ;;  %2743 = vst.msk [vmem:[%s5075_s8 + $0x38] sm:$0xff] %vm2735_vm2, %v2710_v6  ;;  %v2636_v0 = vmax.f32 %v2604_v37, 0.0  ;;  %v2672_v26 = vmul.f32 %v5056_v43, %v2633_v29  ;;  %v3662_v62 = vpop.f32.mrb[92].mxu1 }
 0x1fc   : > { %v3483_v35 = vpop.f32.mrb[125].mxu0  ;;  %2741 = vst.msk [vmem:[%s5075_s8 + $0x28] sm:$0xff] %vm2735_vm2, %v2708_v15  ;;  %v2634_v9 = vmax.f32 %v2602_v7, 0.0  ;;  %v2713_v46 = vadd.f32 %v5065_v40, %v2674_v14  ;;  %v3747_v17 = vadd.f32 %v5034_v3, %v3662_v62  ;;  %v2475_v22 = vpop.f32.mrb[93].mxu1 }
 0x1fd   : > { %v3484_v30 = vadd.f32 %v3483_v35, %v3482_v45  ;;  %v3485_v41 = vpop.f32.mrb[126].mxu0  ;;  %v2675_v51 = vmul.f32 %v5056_v43, %v2636_v0  ;;  %v2711_v21 = vadd.f32 %v5065_v40, %v2672_v26  ;;  %v3751_v28 = vadd.f32 %v5029_v56, %v2475_v22  ;;  %v3663_v44 = vpop.f32.mrb[94].mxu1 }
 0x1fe   : > { %v3486_v34 = vpop.f32.mrb[127].mxu0  ;;  %2746 = vst.msk [vmem:[%s5075_s8 + $0x50] sm:$0xff] %vm2735_vm2, %v2713_v46  ;;  %v2607_v36 = vadd.f32 %v3747_v17, %v5045_v11  ;;  %v3755_v3 = vadd.f32 %v5037_v19, %v3663_v44  ;;  %v2478_v8 = vpop.f32.mrb[95].mxu1 }
 0x1ff   : > { %v3487_v32 = vadd.f32 %v3486_v34, %v3485_v41  ;;  %v5135_v5 = vadd.f32 %v4903_v4, %v3484_v30  ;;  %v2673_v4 = vmul.f32 %v5056_v43, %v2634_v9  ;;  %v2714_v50 = vadd.f32 %v5065_v40, %v2675_v51  ;;  %2744 = vst.msk [vmem:[%s5075_s8 + $0x40] sm:$0xff] %vm2735_vm2, %v2711_v21 }
 0x200   : > { %v2605_v33 = vadd.f32 %v3751_v28, %v5045_v11  ;;  %v3759_v56 = vadd.f32 %v5031_v59, %v2478_v8  ;;  %v2639_v38 = vmax.f32 %v2607_v36, 0.0  ;;  %v2608_v39 = vadd.f32 %v3755_v3, %v5045_v11 }
 0x201   : > { %v5142_v13 = vadd.f32 %v4908_v16, %v3487_v32  ;;  %v2712_v58 = vadd.f32 %v5065_v40, %v2673_v4  ;;  %2747 = vst.msk [vmem:[%s5075_s8 + $0x58] sm:$0xff] %vm2735_vm2, %v2714_v50 }
 0x202   : > { %v2637_v19 = vmax.f32 %v2605_v33, 0.0  ;;  %v2606_v6 = vadd.f32 %v3759_v56, %v5045_v11  ;;  %v2678_v54 = vmul.f32 %v5056_v43, %v2639_v38  ;;  %v2640_v31 = vmax.f32 %v2608_v39, 0.0 }
 0x203   : > { %v3488_v16 = vpop.f32.mrb[128].mxu0  ;;  %2745 = vst.msk [vmem:[%s5075_s8 + $0x48] sm:$0xff] %vm2735_vm2, %v2712_v58  ;;  %v3666_v2 = vpop.f32.mrb[0].mxu1 }
 0x204   : > { %v3489_v10 = vpop.f32.mrb[129].mxu0  ;;  %v2676_v15 = vmul.f32 %v5056_v43, %v2637_v19  ;;  %v2638_v23 = vmax.f32 %v2606_v6, 0.0  ;;  %v2717_v35 = vadd.f32 %v5065_v40, %v2678_v54  ;;  %v2679_v24 = vmul.f32 %v5056_v43, %v2640_v31  ;;  %v2491_v30 = vpop.f32.mrb[1].mxu1 }
 0x205   : > { %v3490_v55 = vadd.f32 %v3489_v10, %v3488_v16  ;;  %v3491_v57 = vpop.f32.mrb[130].mxu0  ;;  %v3762_v37 = vadd.f32 %v5070_v61, %v3666_v2  ;;  %v3765_v7 = vadd.f32 %v5040_v27, %v2491_v30  ;;  %v3667_v34 = vpop.f32.mrb[2].mxu1 }
 0x206   : > { %v3492_v42 = vpop.f32.mrb[131].mxu0  ;;  %v2715_v29 = vadd.f32 %v5065_v40, %v2676_v15  ;;  %2750 = vst.msk [vmem:[%s5075_s8 + $0x70] sm:$0xff] %vm2735_vm2, %v2717_v35  ;;  %v2718_v14 = vadd.f32 %v5065_v40, %v2679_v24  ;;  %v3768_v61 = vadd.f32 %v5082_v12, %v3667_v34  ;;  %v2494_v32 = vpop.f32.mrb[3].mxu1 }
 0x207   : > { %v3493_v45 = vadd.f32 %v3492_v42, %v3491_v57  ;;  %v5165_v59 = vadd.f32 %v4925_v52, %v3490_v55  ;;  %v2677_v52 = vmul.f32 %v5056_v43, %v2638_v23  ;;  %v2611_v0 = vadd.f32 %v3762_v37, %v5045_v11 }
 0x208   : > { %2748 = vst.msk [vmem:[%s5075_s8 + $0x60] sm:$0xff] %vm2735_vm2, %v2715_v29  ;;  %v2609_v9 = vadd.f32 %v3765_v7, %v5045_v11  ;;  %v3771_v27 = vadd.f32 %v5048_v25, %v2494_v32  ;;  %2751 = vst.msk [vmem:[%s5075_s8 + $0x78] sm:$0xff] %vm2735_vm2, %v2718_v14  ;;  %v2612_v51 = vadd.f32 %v3768_v61, %v5045_v11 }
 0x209   : > { %v5172_v41 = vadd.f32 %v4930_v63, %v3493_v45  ;;  %v2716_v26 = vadd.f32 %v5065_v40, %v2677_v52  ;;  %v2643_v46 = vmax.f32 %v2611_v0, 0.0 }
 0x20a   : > { %v2641_v12 = vmax.f32 %v2609_v9, 0.0  ;;  %v2610_v21 = vadd.f32 %v3771_v27, %v5045_v11  ;;  %v2644_v44 = vmax.f32 %v2612_v51, 0.0 }
 0x20b   : > { %v3494_v63 = vpop.f32.mrb[132].mxu0  ;;  %2749 = vst.msk [vmem:[%s5075_s8 + $0x68] sm:$0xff] %vm2735_vm2, %v2716_v26  ;;  %v2682_v28 = vmul.f32 %v5056_v43, %v2643_v46  ;;  %v3670_v8 = vpop.f32.mrb[4].mxu1 }
 0x20c   : > { %v3495_v62 = vpop.f32.mrb[133].mxu0  ;;  %v2680_v36 = vmul.f32 %v5056_v43, %v2641_v12  ;;  %v2642_v3 = vmax.f32 %v2610_v21, 0.0  ;;  %v2683_v58 = vmul.f32 %v5056_v43, %v2644_v44  ;;  %v3774_v33 = vadd.f32 %v5135_v5, %v3670_v8  ;;  %v2507_v56 = vpop.f32.mrb[5].mxu1 }
 0x20d   : > { %v3496_v17 = vadd.f32 %v3495_v62, %v3494_v63  ;;  %v3497_v22 = vpop.f32.mrb[134].mxu0  ;;  %v2721_v16 = vadd.f32 %v5065_v40, %v2682_v28  ;;  %v3671_v55 = vpop.f32.mrb[6].mxu1 }
 0x20e   : > { %v3498_v4 = vpop.f32.mrb[135].mxu0  ;;  %v2719_v38 = vadd.f32 %v5065_v40, %v2680_v36  ;;  %v2681_v39 = vmul.f32 %v5056_v43, %v2642_v3  ;;  %v2722_v57 = vadd.f32 %v5065_v40, %v2683_v58  ;;  %v2615_v19 = vadd.f32 %v3774_v33, %v5045_v11  ;;  %v2510_v6 = vpop.f32.mrb[7].mxu1 }
 0x20f   : > { %v3499_v50 = vadd.f32 %v3498_v4, %v3497_v22  ;;  %v3785_v25 = vadd.f32 %v4947_v53, %v3496_v17  ;;  %v3777_v53 = vadd.f32 %v5105_v60, %v2507_v56  ;;  %2754 = vst.msk [vmem:[%s5075_s8 + $0x90] sm:$0xff] %vm2735_vm2, %v2721_v16  ;;  %v3780_v5 = vadd.f32 %v5142_v13, %v3671_v55 }
 0x210   : > { %2752 = vst.msk [vmem:[%s5075_s8 + $0x80] sm:$0xff] %vm2735_vm2, %v2719_v38  ;;  %v3783_v60 = vadd.f32 %v5112_v47, %v2510_v6  ;;  %2755 = vst.msk [vmem:[%s5075_s8 + $0x98] sm:$0xff] %vm2735_vm2, %v2722_v57  ;;  %v2647_v45 = vmax.f32 %v2615_v19, 0.0 }
 0x211   : > { %v3791_v10 = vadd.f32 %v4952_v1, %v3499_v50  ;;  %v2720_v1 = vadd.f32 %v5065_v40, %v2681_v39  ;;  %v2613_v54 = vadd.f32 %v3777_v53, %v5045_v11  ;;  %v2616_v15 = vadd.f32 %v3780_v5, %v5045_v11 }
 0x212   : > { %v2614_v35 = vadd.f32 %v3783_v60, %v5045_v11  ;;  %v2686_v37 = vmul.f32 %v5056_v43, %v2647_v45 }
 0x213   : > { %v3500_v42 = vpop.f32.mrb[136].mxu0  ;;  %2753 = vst.msk [vmem:[%s5075_s8 + $0x88] sm:$0xff] %vm2735_vm2, %v2720_v1  ;;  %v2645_v13 = vmax.f32 %v2613_v54, 0.0  ;;  %v2648_v30 = vmax.f32 %v2616_v15, 0.0  ;;  %v3674_v34 = vpop.f32.mrb[8].mxu1 }
 0x214   : > { %v3501_v31 = vpop.f32.mrb[137].mxu0  ;;  %v2646_v7 = vmax.f32 %v2614_v35, 0.0  ;;  %v2725_v14 = vadd.f32 %v5065_v40, %v2686_v37  ;;  %v3786_v61 = vadd.f32 %v3785_v25, %v3674_v34  ;;  %v2523_v32 = vpop.f32.mrb[9].mxu1 }
 0x215   : > { %v3502_v23 = vadd.f32 %v3501_v31, %v3500_v42  ;;  %v3503_v2 = vpop.f32.mrb[138].mxu0  ;;  %v2684_v52 = vmul.f32 %v5056_v43, %v2645_v13  ;;  %v2687_v0 = vmul.f32 %v5056_v43, %v2648_v30  ;;  %v3675_v27 = vpop.f32.mrb[10].mxu1 }
 0x216   : > { %v3504_v24 = vpop.f32.mrb[139].mxu0  ;;  %v2685_v9 = vmul.f32 %v5056_v43, %v2646_v7  ;;  %2758 = vst.msk [vmem:[%s5075_s8 + $0xb0] sm:$0xff] %vm2735_vm2, %v2725_v14  ;;  %v2619_v46 = vadd.f32 %v3786_v61, %v5045_v11  ;;  %v3792_v51 = vadd.f32 %v3791_v10, %v3675_v27  ;;  %v2526_v17 = vpop.f32.mrb[11].mxu1 }
 0x217   : > { %v3505_v29 = vadd.f32 %v3504_v24, %v3503_v2  ;;  %v3800_v47 = vadd.f32 %v4969_v49, %v3502_v23  ;;  %v2723_v26 = vadd.f32 %v5065_v40, %v2684_v52  ;;  %v3789_v49 = vadd.f32 %v5165_v59, %v2523_v32 }
 0x218   : > { %v2726_v62 = vadd.f32 %v5065_v40, %v2687_v0  ;;  %v3795_v21 = vadd.f32 %v5172_v41, %v2526_v17  ;;  %v2651_v4 = vmax.f32 %v2619_v46, 0.0  ;;  %v2620_v28 = vadd.f32 %v3792_v51, %v5045_v11 }
 0x219   : > { %v3806_v63 = vadd.f32 %v4974_v48, %v3505_v29  ;;  %2756 = vst.msk [vmem:[%s5075_s8 + $0xa0] sm:$0xff] %vm2735_vm2, %v2723_v26  ;;  %v2724_v48 = vadd.f32 %v5065_v40, %v2685_v9  ;;  %v2617_v12 = vadd.f32 %v3789_v49, %v5045_v11 }
 0x21a   : > { %2759 = vst.msk [vmem:[%s5075_s8 + $0xb8] sm:$0xff] %vm2735_vm2, %v2726_v62  ;;  %v2618_v36 = vadd.f32 %v3795_v21, %v5045_v11  ;;  %v2690_v8 = vmul.f32 %v5056_v43, %v2651_v4  ;;  %v2652_v16 = vmax.f32 %v2620_v28, 0.0 }
 0x21b   : > { %v3506_v22 = vpop.f32.mrb[140].mxu0  ;;  %2757 = vst.msk [vmem:[%s5075_s8 + $0xa8] sm:$0xff] %vm2735_vm2, %v2724_v48  ;;  %v2649_v25 = vmax.f32 %v2617_v12, 0.0  ;;  %v3678_v10 = vpop.f32.mrb[12].mxu1 }
 0x21c   : > { %v3507_v59 = vpop.f32.mrb[141].mxu0  ;;  %v2650_v56 = vmax.f32 %v2618_v36, 0.0  ;;  %v2729_v38 = vadd.f32 %v5065_v40, %v2690_v8  ;;  %v2691_v39 = vmul.f32 %v5056_v43, %v2652_v16  ;;  %v2539_v55 = vpop.f32.mrb[13].mxu1 }
 0x21d   : > { %v3508_v44 = vadd.f32 %v3507_v59, %v3506_v22  ;;  %v3509_v50 = vpop.f32.mrb[142].mxu0  ;;  %v2688_v33 = vmul.f32 %v5056_v43, %v2649_v25  ;;  %v3801_v5 = vadd.f32 %v3800_v47, %v2539_v55  ;;  %v3679_v6 = vpop.f32.mrb[14].mxu1 }
 0x21e   : > { %v3510_v3 = vpop.f32.mrb[143].mxu0  ;;  %2762 = vst.msk [vmem:[%s5075_s8 + $0xd0] sm:$0xff] %vm2735_vm2, %v2729_v38  ;;  %v2730_v42 = vadd.f32 %v5065_v40, %v2691_v39  ;;  %v2542_v60 = vpop.f32.mrb[15].mxu1 }
 0x21f   : > { %v3797_v41 = vadd.f32 %v4989_v18, %v3508_v44  ;;  %v3511_v58 = vadd.f32 %v3510_v3, %v3509_v50  ;;  %v2727_v19 = vadd.f32 %v5065_v40, %v2688_v33  ;;  %v2689_v18 = vmul.f32 %v5056_v43, %v2650_v56 }
 0x220   : > { %v3807_v45 = vadd.f32 %v3806_v63, %v2542_v60  ;;  %2763 = vst.msk [vmem:[%s5075_s8 + $0xd8] sm:$0xff] %vm2735_vm2, %v2730_v42 }
 0x221   : > { %v3798_v53 = vadd.f32 %v3797_v41, %v3678_v10  ;;  %v3803_v57 = vadd.f32 %v4992_v20, %v3511_v58  ;;  %2760 = vst.msk [vmem:[%s5075_s8 + $0xc0] sm:$0xff] %vm2735_vm2, %v2727_v19  ;;  %v2728_v31 = vadd.f32 %v5065_v40, %v2689_v18  ;;  %v2621_v20 = vadd.f32 %v3801_v5, %v5045_v11 }
 0x222   : > { %v2622_v13 = vadd.f32 %v3807_v45, %v5045_v11 }
 0x223   : > { %v2623_v1 = vadd.f32 %v3798_v53, %v5045_v11  ;;  %v3804_v54 = vadd.f32 %v3803_v57, %v3679_v6  ;;  %2761 = vst.msk [vmem:[%s5075_s8 + $0xc8] sm:$0xff] %vm2735_vm2, %v2728_v31  ;;  %v2653_v2 = vmax.f32 %v2621_v20, 0.0 }
 0x224   : > { %v2654_v30 = vmax.f32 %v2622_v13, 0.0 }
 0x225   : > { %v2655_v15 = vmax.f32 %v2623_v1, 0.0  ;;  %v2624_v23 = vadd.f32 %v3804_v54, %v5045_v11  ;;  %v2692_v37 = vmul.f32 %v5056_v43, %v2653_v2 }
 0x226   : > { %v2693_v7 = vmul.f32 %v5056_v43, %v2654_v30 }
 0x227   : > { %v2694_v35 = vmul.f32 %v5056_v43, %v2655_v15  ;;  %v2656_v24 = vmax.f32 %v2624_v23, 0.0  ;;  %v2731_v52 = vadd.f32 %v5065_v40, %v2692_v37 }
 0x228   : > { %v2732_v11 = vadd.f32 %v5065_v40, %v2693_v7 }
 0x229   : > { %v2733_v29 = vadd.f32 %v5065_v40, %v2694_v35  ;;  %v2695_v47 = vmul.f32 %v5056_v43, %v2656_v24  ;;  %2764 = vst.msk [vmem:[%s5075_s8 + $0xe0] sm:$0xff] %vm2735_vm2, %v2731_v52 }
 0x22a   : > { %2765 = vst.msk [vmem:[%s5075_s8 + $0xe8] sm:$0xff] %vm2735_vm2, %v2732_v11 }
 0x22b   : > { %2766 = vst.msk [vmem:[%s5075_s8 + $0xf0] sm:$0xff] %vm2735_vm2, %v2733_v29  ;;  %v2734_v34 = vadd.f32 %v5065_v40, %v2695_v47 }
 0x22d   : > { %2767 = vst.msk [vmem:[%s5075_s8 + $0xf8] sm:$0xff] %vm2735_vm2, %v2734_v34 }
 0x22e PF: > { %s17_s26 = sadd.s32 1, %s4017_s26   ;;  %s5305_s24 = smov %s4013_s25 }
 0x22f   : > { %p14_p5 = scmp.ge.s32.totalorder %s17_s26, 4   ;;  %s5306_s25 = smov %s5308_s27 }
 0x231   :  { %16 = sbr.rel (!%p14_p5) target bundleno = 2 (0x2), region = 86 }

// kernel: up_block_forward.4
= control target key start
LH: loop header
LB: loop body
LE: loop exit
PB: predicated region body
PF: predicated region fallthrough
CT: control target
= control target key end

     0   :  { %s4721_s24 = smov 0   ;;  %s4723_s25 = smov 0   ;;  %s6381_s0 = inlined_call_operand.vmem [shape: bf16[2,16,18,128], index: 0, kind: input, shape index: {}, may-alias: {0,1,2}]   ;;  %s6382_s1 = inlined_call_operand.vmem [shape: bf16[2,16,18,128], index: 1, kind: input, shape index: {}, may-alias: {0,1,2}]   ;;  %s6383_s2 = inlined_call_operand.vmem [shape: bf16[2,16,18,128], index: 2, kind: input, shape index: {}, may-alias: {0,1,2}]   ;;  %s6384_s3 = inlined_call_operand.vmem [shape: bf16[3,384,128], index: 3, kind: input, shape index: {}]   ;;  %s6385_s4 = inlined_call_operand.vmem [shape: f32[1,128], index: 4, kind: input, shape index: {}]   ;;  %s6386_s5 = inlined_call_operand.vmem [shape: f32[1,128], index: 5, kind: input, shape index: {}]   ;;  %s6387_s6 = inlined_call_operand.vmem [shape: f32[1,128], index: 6, kind: input, shape index: {}]   ;;  %s6388_s7 = inlined_call_operand.vmem [shape: bf16[2,16,18,128], index: 7, kind: output, shape index: {}]  }
   0x1   :  { %s4725_s26 = smov 0  }
   0x2 LB: > { %s29_s27 = sadd.s32 1, %s4675_s25  ;;  %p3510_p0 = scmp.ge.s32.totalorder %s4679_s26, 1  ;;  %s4679_s26 = sphi %s4725_s26, %s17_s26   ;;  %s4675_s25 = sphi %s4723_s25, %s6419_s25   ;;  %s4671_s24 = sphi %s4721_s24, %s6418_s24  }
   0x3   : > { %p31_p1 = scmp.ge.s32.totalorder %s29_s27, 2  ;;  %p323_p2 = scmp.lt.s32.totalorder %s4679_s26, 3 }
   0x5   : > { %s6421_s27 = smov (%p31_p1, %s29_s27), 0  ;;  %p324_p3 = pnand %p3510_p0, %p323_p2 }
   0x7   : > { %327 = sbr.rel (%p324_p3) target bundleno = 602 (0x25a), region = 48 }
   0xe   : > { %v4545_v0 = vld [vmem:[%s6384_s3 + $0x100] sm:$0xff]   ;;  %p392_p4 = scmp.lt.s32.totalorder %s4671_s24, 1  ;;  %v4548_v3 = vld [vmem:[%s6384_s3 + $0x108] sm:$0xff]   ;;  %v4551_v6 = vld [vmem:[%s6384_s3 + $0x110] sm:$0xff]   ;;  %vm937_vm0 = vcmask 1046528   ;;  %vm2751_vm2 = vcmask 1040384  }
   0xf   : > { %v4745_v1 = vld [vmem:[%s6384_s3 + $0x140] sm:$0xff]   ;;  %3790 = vmatprep.subr.bf16.mxu0 %v4545_v0  ;;  %v4760_v4 = vld [vmem:[%s6384_s3 + $0x148] sm:$0xff]   ;;  %v4772_v7 = vld [vmem:[%s6384_s3 + $0x150] sm:$0xff]   ;;  %vm702_vm1 = vsmask.f32 7424  ;;  %vm3254_vm7 = vcmask 1043456  }
  0x10   : > { %v4547_v2 = vld [vmem:[%s6384_s3 + $0xc0] sm:$0xff]   ;;  %4342 = vmatprep.subr.bf16.mxu1 %v4745_v1  ;;  %s6423_s24 = smov (!%p392_p4, %s4671_s24), 1  ;;  %v4550_v5 = vld [vmem:[%s6384_s3 + $0xc8] sm:$0xff]   ;;  %v4553_v8 = vld [vmem:[%s6384_s3 + $0xd0] sm:$0xff]   ;;  %vm2752_vm3 = vsmask.f32 256 }
  0x11   : > { %3791 = vmatpush3.bf16.msra.mxu0 %v4547_v2  ;;  %4350 = vmatpush3.bf16.msra.mxu1 %v4745_v1  ;;  %v4554_v9 = vld [vmem:[%s6384_s3 + $0x118] sm:$0xff]   ;;  %v4557_v12 = vld [vmem:[%s6384_s3 + $0x120] sm:$0xff]   ;;  %v4560_v15 = vld [vmem:[%s6384_s3 + $0x128] sm:$0xff]   ;;  %s4814_s20 = smul.u32 192, %s6423_s24  ;;  %vm2802_vm5 = vsmask.f32 7938 }
  0x12   : > { %3792 = vmatprep.subr.bf16.mxu0 %v4548_v3  ;;  %4343 = vmatprep.subr.bf16.mxu1 %v4760_v4  ;;  %v4785_v10 = vld [vmem:[%s6384_s3 + $0x158] sm:$0xff]   ;;  %v4798_v13 = vld [vmem:[%s6384_s3 + $0x160] sm:$0xff]   ;;  %v4811_v16 = vld [vmem:[%s6384_s3 + $0x168] sm:$0xff]   ;;  %vm2932_vm8 = vsmask.f32 4368 }
  0x13   : > { %v4556_v11 = vld [vmem:[%s6384_s3 + $0xd8] sm:$0xff]   ;;  %v4559_v14 = vld [vmem:[%s6384_s3 + $0xe0] sm:$0xff]   ;;  %v4562_v17 = vld [vmem:[%s6384_s3 + $0xe8] sm:$0xff]   ;;  %s4836_s11 = scalar_lea.vmem %s6381_s0, %s4814_s20  ;;  %s414_s14 = scalar_lea.vmem %s6382_s1, %s4814_s20 }
  0x14   : > { %v4563_v18 = vld [vmem:[%s6384_s3 + $0x130] sm:$0xff]   ;;  %v4566_v21 = vld [vmem:[%s6384_s3 + $0x138] sm:$0xff]   ;;  %v4849_v23 = vld [vmem:[%s4836_s11] sm:$0xff]   ;;  %s3757_s8 = sadd.s32 180, %s4814_s20 }
  0x15   : > { %3793 = vmatpush3.bf16.msra.mxu0 %v4550_v5  ;;  %4351 = vmatpush3.bf16.msra.mxu1 %v4760_v4  ;;  %v4827_v19 = vld [vmem:[%s6384_s3 + $0x170] sm:$0xff]   ;;  %v4844_v22 = vld [vmem:[%s6384_s3 + $0x178] sm:$0xff]   ;;  %v4852_v24 = vld [vmem:[%s4836_s11 + $0x8] ss:$0 sps:$4 sm:$0x11]   ;;  %v716_v26 = vshrl.u32 %v4849_v23, 16  ;;  %s431_s12 = scalar_lea.vmem %s6383_s2, %s3757_s8 }
  0x16   : > { %3794 = vmatprep.subr.bf16.mxu0 %v4551_v6  ;;  %4344 = vmatprep.subr.bf16.mxu1 %v4772_v7  ;;  %v4565_v20 = vld [vmem:[%s6384_s3 + $0xf0] sm:$0xff]   ;;  %v4568_v25 = vld [vmem:[%s6384_s3 + $0xf8] sm:$0xff]   ;;  %v718_v27 = vshll.u32 %v4849_v23, 16  ;;  %v723_v28 = vshll.u32 %v4852_v24, 16  ;;  %v4861_v29 = vld [vmem:[%s4836_s11 + $0x60] sm:$0xff]  }
  0x17   : > { %v4865_v30 = vld [vmem:[%s4836_s11 + $0x68] ss:$0 sps:$4 sm:$0x11]   ;;  %v4868_v31 = vld [vmem:[%s4836_s11 + $0x6c] sm:$0xff]   ;;  %v965_v34 = vrot.slane %v4861_v29, 1  ;;  %v4575_v35 = vld [vmem:[%s6384_s3 + $0x40] sm:$0xff]  }
  0x18   : > { %v720_v32 = vrot.slane %v718_v27, 1  ;;  %v725_v33 = vrot.slane %v723_v28, 1  ;;  %v966_v36 = vrot.slane %v4865_v30, 1  ;;  %v4877_v37 = vld [vmem:[%s4836_s11 + $0x74] ss:$0 sps:$4 sm:$0x11]   ;;  %vm5560_vm4 = vmand %vm2751_vm2, %vm2752_vm3 }
  0x19   : > { %3795 = vmatpush3.bf16.msra.mxu0 %v4553_v8  ;;  %4352 = vmatpush3.bf16.msra.mxu1 %v4772_v7  ;;  %v968_v38 = vrot.slane %v4868_v31, 1  ;;  %v4576_v39 = vld [vmem:[%s6384_s3] sm:$0xff]   ;;  %v969_v42 = vrot.slane %v4877_v37, 1  ;;  %v4577_v43 = vld [vmem:[%s6384_s3 + $0x48] sm:$0xff]   ;;  %v4916_v52 = vld [vmem:[%s4836_s11 + $0x78] sm:$0xff]  }
  0x1a   : > { %3796 = vmatprep.subr.bf16.mxu0 %v4554_v9  ;;  %4345 = vmatprep.subr.bf16.mxu1 %v4785_v10  ;;  %v721_v40 = vor.u32 %v720_v32, %v716_v26  ;;  %v4885_v41 = vsel %vm937_vm0, %v965_v34, %v966_v36  ;;  %v4578_v46 = vld [vmem:[%s6384_s3 + $0x8] sm:$0xff]   ;;  %v4909_v48 = vld [vmem:[%s4836_s11 + $0x14] ss:$0 sps:$4 sm:$0x11]   ;;  %v971_v57 = vrot.slane %v4916_v52, 1  ;;  %v4587_v2 = vld [vmem:[%s6384_s3 + $0x58] sm:$0xff]  }
  0x1b   : > { %4230 = vmatprep.mubr.bf16.mxu1 %v4885_v41  ;;  %v4898_v45 = vsel %vm937_vm0, %v968_v38, %v969_v42  ;;  %v4906_v47 = vld [vmem:[%s4836_s11 + $0xc] sm:$0xff]   ;;  %v735_v51 = vshll.u32 %v4909_v48, 16  ;;  %v4920_v53 = vld [vmem:[%s4836_s11 + $0x80] ss:$0 sps:$4 sm:$0x11]   ;;  %v4923_v54 = vld [vmem:[%s4836_s11 + $0x84] sm:$0xff]  }
  0x1c   : > { %v4892_v44 = vsel %vm702_vm1, %v721_v40, %v725_v33  ;;  %v728_v49 = vshrl.u32 %v4906_v47, 16  ;;  %v730_v50 = vshll.u32 %v4906_v47, 16  ;;  %v4585_v58 = vld [vmem:[%s6384_s3 + $0x50] sm:$0xff]   ;;  %v972_v59 = vrot.slane %v4920_v53, 1  ;;  %v4588_v5 = vld [vmem:[%s6384_s3 + $0x18] sm:$0xff]   ;;  %v4596_v28 = vld [vmem:[%s6384_s3 + $0x20] sm:$0xff]  }
  0x1d   : > { %3797 = vmatpush3.bf16.msra.mxu0 %v4556_v11  ;;  %4353 = vmatpush3.bf16.msra.mxu1 %v4785_v10  ;;  %v737_v56 = vrot.slane %v735_v51, 1  ;;  %v4931_v60 = vld [vmem:[%s4836_s11 + $0x8c] ss:$0 sps:$4 sm:$0x11]   ;;  %v974_v61 = vrot.slane %v4923_v54, 1  ;;  %v4586_v62 = vld [vmem:[%s6384_s3 + $0x10] sm:$0xff]   ;;  %vm5568_vm6 = vmand %vm2751_vm2, %vm2802_vm5 }
  0x1e   : > { %3798 = vmatprep.subr.bf16.mxu0 %v4557_v12  ;;  %4346 = vmatprep.subr.bf16.mxu1 %v4798_v13  ;;  %v732_v55 = vrot.slane %v730_v50, 1  ;;  %v4940_v0 = vsel %vm937_vm0, %v971_v57, %v972_v59  ;;  %v4960_v6 = vld [vmem:[%s4836_s11 + $0x18] sm:$0xff]   ;;  %v4963_v8 = vld [vmem:[%s4836_s11 + $0x20] ss:$0 sps:$4 sm:$0x11]   ;;  %v4598_v38 = vld [vmem:[%s6384_s3 + $0x28] sm:$0xff]  }
  0x1f   : > { %1283 = vmatprep.mubr.bf16.mxu0 %v4892_v44  ;;  %v740_v9 = vshrl.u32 %v4960_v6, 16  ;;  %v742_v11 = vshll.u32 %v4960_v6, 16  ;;  %v747_v12 = vshll.u32 %v4963_v8, 16  ;;  %v4985_v26 = vld [vmem:[%s4836_s11 + $0xa4] ss:$0 sps:$4 sm:$0x11]   ;;  %vm5923_vm9 = vmand %vm3254_vm7, %vm2802_vm5 }
  0x20   : > { %v733_v63 = vor.u32 %v732_v55, %v728_v49  ;;  %v981_v34 = vrot.slane %v4985_v26, 1  ;;  %v5017_v40 = vld [vmem:[%s4836_s11 + $0x2c] ss:$0 sps:$4 sm:$0x11]   ;;  %v5031_v51 = vld [vmem:[%s4836_s11 + $0xb4] sm:$0xff]   ;;  %vm5933_vm10 = vmor %vm2752_vm3, %vm2932_vm8 }
  0x21   : > { %3799 = vmatpush3.bf16.msra.mxu0 %v4559_v14  ;;  %4354 = vmatpush3.bf16.msra.mxu1 %v4798_v13  ;;  %v4970_v14 = vld [vmem:[%s4836_s11 + $0x90] sm:$0xff]   ;;  %v5024_v49 = vld [vmem:[%s4836_s11 + $0xa8] sm:$0xff]   ;;  %v5039_v59 = vld [vmem:[%s4836_s11 + $0xbc] ss:$0 sps:$4 sm:$0x11]  }
  0x22   : > { %3800 = vmatprep.subr.bf16.mxu0 %v4560_v15  ;;  %4347 = vmatprep.subr.bf16.mxu1 %v4811_v16  ;;  %v4947_v3 = vsel %vm702_vm1, %v733_v63, %v737_v56  ;;  %v4974_v15 = vld [vmem:[%s4836_s11 + $0x98] ss:$0 sps:$4 sm:$0x11]   ;;  %v5028_v50 = vld [vmem:[%s4836_s11 + $0xb0] ss:$0 sps:$4 sm:$0x11]  }
  0x23   : > { %v983_v57 = vrot.slane %v5024_v49, 1 }
  0x25   : > { %3801 = vmatpush3.bf16.msra.mxu0 %v4562_v17  ;;  %4355 = vmatpush3.bf16.msra.mxu1 %v4811_v16  ;;  %v4977_v17 = vld [vmem:[%s4836_s11 + $0x9c] sm:$0xff]  }
  0x26   : > { %3802 = vmatprep.subr.bf16.mxu0 %v4563_v18  ;;  %4348 = vmatprep.subr.bf16.mxu1 %v4827_v19  ;;  %v744_v18 = vrot.slane %v742_v11, 1  ;;  %v980_v27 = vrot.slane %v4977_v17, 1  ;;  %v4608_v11 = vld [vmem:[%s6384_s3 + $0x38] sm:$0xff]  }
  0x28   : > { %v745_v32 = vor.u32 %v744_v18, %v740_v9  ;;  %v5075_v18 = vld [vmem:[%s4836_s11 + $0x38] ss:$0 sps:$4 sm:$0x11]  }
  0x29   : > { %3803 = vmatpush3.bf16.msra.mxu0 %v4565_v20  ;;  %4356 = vmatpush3.bf16.msra.mxu1 %v4827_v19  ;;  %v749_v20 = vrot.slane %v747_v12, 1  ;;  %v5072_v12 = vld [vmem:[%s4836_s11 + $0x30] sm:$0xff]  }
  0x2a   : > { %3804 = vmatprep.subr.bf16.mxu0 %v4566_v21  ;;  %4349 = vmatprep.subr.bf16.mxu1 %v4844_v22  ;;  %v977_v21 = vrot.slane %v4970_v14, 1 }
  0x2b   : > { %v5001_v36 = vsel %vm702_vm1, %v745_v32, %v749_v20  ;;  %v472_v20 = vld [vmem:[%s414_s14] sm:$0xf] }
  0x2c   : > { %v479_v32 = vmul.bf16 0.0, %v472_v20 }
  0x2d   : > { %3805 = vmatpush3.bf16.msra.mxu0 %v4568_v25  ;;  %4357 = vmatpush3.bf16.msra.mxu1 %v4844_v22  ;;  %v978_v25 = vrot.slane %v4974_v15, 1 }
  0x2e   : > { %4198 = vmatprep.subr.bf16.mxu0 %v4745_v1  ;;  %3926 = vmatprep.subr.bf16.mxu1 %v4575_v35  ;;  %v4597_v35 = vld [vmem:[%s6384_s3 + $0x68] sm:$0xff]  }
  0x2f   : > { %v4994_v33 = vsel %vm937_vm0, %v977_v21, %v978_v25  ;;  %v473_v21 = vld [vmem:[%s414_s14 + $0x4] sm:$0xf]  ;;  %v764_v25 = vshrl.u32 %v5072_v12, 16 }
  0x30   : > { %1284 = vmatmul.mubr.bf16.vlgmr.msra.gmra.mrb[0].mxu0 %v4849_v23  ;;  %4231 = vmatmul.mubr.bf16.vlgmr.msra.gmra.mrb[0].mxu1 %v4898_v45 }
  0x31   : > { %4199 = vmatpush3.bf16.msra.mxu0 %v4745_v1  ;;  %3927 = vmatpush3.bf16.msra.mxu1 %v4576_v39  ;;  %v975_v1 = vrot.slane %v4931_v60, 1  ;;  %v5014_v39 = vld [vmem:[%s4836_s11 + $0x24] sm:$0xff]  }
  0x32   : > { %3928 = vmatprep.subr.bf16.mxu1 %v4577_v43  ;;  %4200 = vmatprep.subr.bf16.mxu0 %v4760_v4  ;;  %v752_v42 = vshrl.u32 %v5014_v39, 16  ;;  %v754_v43 = vshll.u32 %v5014_v39, 16 }
  0x33   : > { %4234 = vmatprep.mubr.bf16.mxu1 %v4940_v0  ;;  %1291 = vmatprep.mubr.bf16.mxu0 %v4947_v3 }
  0x34   : > { %v756_v55 = vrot.slane %v754_v43, 1 }
  0x35   : > { %3929 = vmatpush3.bf16.msra.mxu1 %v4578_v46  ;;  %4201 = vmatpush3.bf16.msra.mxu0 %v4760_v4  ;;  %v4952_v4 = vsel %vm937_vm0, %v974_v61, %v975_v1  ;;  %v759_v46 = vshll.u32 %v5017_v40, 16  ;;  %v986_v61 = vrot.slane %v5031_v51, 1 }
  0x36   : > { %3930 = vmatprep.subr.bf16.mxu1 %v4585_v58  ;;  %4202 = vmatprep.subr.bf16.mxu0 %v4772_v7  ;;  %v984_v58 = vrot.slane %v5028_v50, 1  ;;  %v757_v63 = vor.u32 %v756_v55, %v752_v42  ;;  %v5086_v42 = vld [vmem:[%s4836_s11 + $0x3c] sm:$0xff]  }
  0x37   : > { %v761_v56 = vrot.slane %v759_v46, 1 }
  0x38   : > { %1292 = vmatmul.mubr.bf16.gmra.mrb[4].mxu0 %v4906_v47  ;;  %4235 = vmatmul.mubr.bf16.gmra.mrb[4].mxu1 %v4952_v4  ;;  %v5048_v1 = vsel %vm937_vm0, %v983_v57, %v984_v58  ;;  %v776_v57 = vshrl.u32 %v5086_v42, 16  ;;  %v778_v58 = vshll.u32 %v5086_v42, 16 }
  0x39   : > { %3931 = vmatpush3.bf16.msra.mxu1 %v4586_v62  ;;  %4203 = vmatpush3.bf16.msra.mxu0 %v4772_v7  ;;  %v4595_v7 = vld [vmem:[%s6384_s3 + $0x60] sm:$0xff]   ;;  %v4606_v62 = vld [vmem:[%s6384_s3 + $0x30] sm:$0xff]   ;;  %6392 = vst [vmem:[#allocation2_spill] sm:$0xff] %v5048_v1  ;;  %v5055_v9 = vsel %vm702_vm1, %v757_v63, %v761_v56 }
  0x3a   : > { %3932 = vmatprep.subr.bf16.mxu1 %v4587_v2  ;;  %4204 = vmatprep.subr.bf16.mxu0 %v4785_v10  ;;  %v987_v2 = vrot.slane %v5039_v59, 1  ;;  %v5093_v56 = vld [vmem:[%s4836_s11 + $0x44] ss:$0 sps:$4 sm:$0x11]   ;;  %v780_v20 = vrot.slane %v778_v58, 1 }
  0x3b   : > { %4238 = vmatprep.mubr.bf16.mxu1 %v4994_v33  ;;  %1299 = vmatprep.mubr.bf16.mxu0 %v5001_v36 }
  0x3d   : > { %3933 = vmatpush3.bf16.msra.mxu1 %v4588_v5  ;;  %4205 = vmatpush3.bf16.msra.mxu0 %v4785_v10  ;;  %v5006_v10 = vsel %vm937_vm0, %v980_v27, %v981_v34  ;;  %v4607_v5 = vld [vmem:[%s6384_s3 + $0x78] sm:$0xff]   ;;  %v766_v27 = vshll.u32 %v5072_v12, 16  ;;  %v480_v34 = vmul.bf16 0.0, %v473_v21  ;;  %v5109_v21 = vld [vmem:[%s4836_s11 + $0x50] ss:$0 sps:$4 sm:$0x11]  }
  0x3e   : > { %3934 = vmatprep.subr.bf16.mxu1 %v4595_v7  ;;  %4206 = vmatprep.subr.bf16.mxu0 %v4798_v13  ;;  %v474_v7 = vld [vmem:[%s414_s14 + $0x8] sm:$0x1]  ;;  %s5552_s14 = scalar_lea.vmem %s6388_s7, %s4814_s20 }
  0x3f   : > { %v768_v43 = vrot.slane %v766_v27, 1  ;;  %v5088_v46 = vcombine.low %v479_v32, %v480_v34  ;;  %v781_v32 = vor.u32 %v780_v20, %v776_v57  ;;  %v4616_v57 = vld [vmem:[%s6384_s3 + $0x88] sm:$0xff]  }
  0x40   : > { %1300 = vmatmul.mubr.bf16.gmra.mrb[8].mxu0 %v4960_v6  ;;  %4239 = vmatmul.mubr.bf16.gmra.mrb[8].mxu1 %v5006_v10 }
  0x41   : > { %3935 = vmatpush3.bf16.msra.mxu1 %v4596_v28  ;;  %4207 = vmatpush3.bf16.msra.mxu0 %v4798_v13  ;;  %v4605_v13 = vld [vmem:[%s6384_s3 + $0x70] sm:$0xff]   ;;  %v771_v28 = vshll.u32 %v5075_v18, 16  ;;  %v706_v63 = vshll.u32 %v5088_v46, 16 }
  0x42   : > { %3936 = vmatprep.subr.bf16.mxu1 %v4597_v35  ;;  %4208 = vmatprep.subr.bf16.mxu0 %v4811_v16  ;;  %v481_v35 = vmul.bf16 0.0, %v474_v7 }
  0x43   : > { %4242 = vmatprep.mubr.bf16.mxu1 %v5048_v1  ;;  %1307 = vmatprep.mubr.bf16.mxu0 %v5055_v9  ;;  %v5123_v1 = vld [vmem:[%s4836_s11 + $0x5c] ss:$0 sps:$4 sm:$0x11]  }
  0x44   : > { %v5090_v55 = vcombine.low %v481_v35, %v481_v35  ;;  %v795_v35 = vshll.u32 %v5109_v21, 16 }
  0x45   : > { %3937 = vmatpush3.bf16.msra.mxu1 %v4598_v38  ;;  %4209 = vmatpush3.bf16.msra.mxu0 %v4811_v16  ;;  %v5064_v16 = vsel %vm937_vm0, %v986_v61, %v987_v2  ;;  %v4611_v38 = vld [vmem:[%s6384_s3 + $0x80] sm:$0xff]   ;;  %v5099_v61 = vld [vmem:[%s4836_s11 + $0x48] sm:$0xff]  }
  0x46   : > { %3938 = vmatprep.subr.bf16.mxu1 %v4605_v13  ;;  %4210 = vmatprep.subr.bf16.mxu0 %v4827_v19  ;;  %6393 = vst [vmem:[#allocation3_spill] sm:$0xff] %v5064_v16  ;;  %v769_v13 = vor.u32 %v768_v43, %v764_v25  ;;  %v711_v2 = vshll.u32 %v5090_v55, 16  ;;  %v790_v7 = vshll.u32 %v5099_v61, 16  ;;  %v708_v25 = vrot.slane %v706_v63, 1 }
  0x48   : > { %1308 = vmatmul.mubr.bf16.gmra.mrb[12].mxu0 %v5014_v39  ;;  %4243 = vmatmul.mubr.bf16.gmra.mrb[12].mxu1 %v5064_v16  ;;  %v713_v27 = vrot.slane %v711_v2, 1  ;;  %v792_v34 = vrot.slane %v790_v7, 1  ;;  %v797_v16 = vrot.slane %v795_v35, 1  ;;  %v4619_v7 = vld [vmem:[%s6384_s3 + $0x90] sm:$0xff]   ;;  %v819_v35 = vshll.u32 %v4865_v30, 16 }
  0x49   : > { %3939 = vmatpush3.bf16.msra.mxu1 %v4606_v62  ;;  %4211 = vmatpush3.bf16.msra.mxu0 %v4827_v19  ;;  %v773_v19 = vrot.slane %v771_v28, 1  ;;  %v704_v62 = vshrl.u32 %v5088_v46, 16 }
  0x4a   : > { %3940 = vmatprep.subr.bf16.mxu1 %v4607_v5  ;;  %4212 = vmatprep.subr.bf16.mxu0 %v4844_v22  ;;  %v783_v5 = vshll.u32 %v5093_v56, 16 }
  0x4b   : > { %v709_v43 = vor.u32 %v708_v25, %v704_v62  ;;  %v814_v25 = vshll.u32 %v4861_v29, 16 }
  0x4c   : > { %v785_v28 = vrot.slane %v783_v5, 1 }
  0x4d   : > { %3941 = vmatpush3.bf16.msra.mxu1 %v4608_v11  ;;  %4213 = vmatpush3.bf16.msra.mxu0 %v4844_v22  ;;  %v5106_v11 = vsel %vm702_vm1, %v769_v13, %v773_v19  ;;  %v788_v22 = vshrl.u32 %v5099_v61, 16  ;;  %v5117_v19 = vld [vmem:[%s4836_s11 + $0x54] sm:$0xff]   ;;  %v714_v63 = vsel %vm702_vm1, %v709_v43, %v713_v27  ;;  %v4621_v43 = vld [vmem:[%s6384_s3 + $0xa0] sm:$0xff]  }
  0x4e   : > { %4246 = vmatprep.subr.bf16.mxu1 %v4611_v38  ;;  %1315 = vmatprep.mubr.bf16.mxu0 %v5106_v11  ;;  %v5120_v13 = vsel %vm702_vm1, %v781_v32, %v785_v28  ;;  %v802_v2 = vshll.u32 %v5117_v19, 16  ;;  %v800_v5 = vshrl.u32 %v5117_v19, 16  ;;  %v4620_v27 = vld [vmem:[%s6384_s3 + $0x98] sm:$0xff]   ;;  %v812_v32 = vshrl.u32 %v4861_v29, 16 }
  0x4f   : > { %v793_v58 = vor.u32 %v792_v34, %v788_v22  ;;  %1749 = vmatprep.mubr.bf16.mxu1 %v714_v63  ;;  %v807_v22 = vshll.u32 %v5123_v1, 16  ;;  %v816_v34 = vrot.slane %v814_v25, 1  ;;  %v942_v63 = vrot.slane %v4852_v24, 1 }
  0x50   : > { %1316 = vmatmul.mubr.bf16.gmra.mrb[16].mxu0 %v5072_v12  ;;  %1750 = vmatmul.mubr.bf16.vlgmr.msra.gmra.mrb[16].mxu1 %v5088_v46  ;;  %v804_v20 = vrot.slane %v802_v2, 1  ;;  %v821_v2 = vrot.slane %v819_v35, 1  ;;  %v838_v25 = vshll.u32 %v4916_v52, 16 }
  0x51   : > { %1323 = vmatprep.mubr.bf16.mxu0 %v5120_v13  ;;  %4247 = vmatpush3.bf16.msra.mxu1 %v4611_v38  ;;  %v5134_v62 = vsel %vm702_vm1, %v793_v58, %v797_v16  ;;  %v4623_v38 = vld [vmem:[%s6384_s3 + $0x1c0] sm:$0xff]   ;;  %v809_v16 = vrot.slane %v807_v22, 1  ;;  %v941_v58 = vrot.slane %v4849_v23, 1 }
  0x52   : > { %1757 = vmatprep.mubr.bf16.mxu1 %v4892_v44  ;;  %4248 = vmatprep.subr.bf16.mxu1 %v4616_v57  ;;  %v805_v44 = vor.u32 %v804_v20, %v800_v5  ;;  %v826_v5 = vshll.u32 %v4868_v31, 16  ;;  %v4622_v20 = vld [vmem:[%s6384_s3 + $0xa8] sm:$0xff]  }
  0x53   : > { %4062 = vmatprep.subr.bf16.mxu0 %v4623_v38  ;;  %v5166_v30 = vsel %vm937_vm0, %v941_v58, %v942_v63  ;;  %v4625_v38 = vld [vmem:[%s6384_s3 + $0xb0] sm:$0xff]   ;;  %v843_v58 = vshll.u32 %v4920_v53, 16 }
  0x54   : > { %v5153_v28 = vsel %vm702_vm1, %v805_v44, %v809_v16  ;;  %v828_v22 = vrot.slane %v826_v5, 1  ;;  %v848_v5 = vshrl.u32 %v4923_v54, 16 }
  0x55   : > { %4249 = vmatpush3.bf16.msra.mxu1 %v4616_v57  ;;  %v817_v57 = vor.u32 %v816_v34, %v812_v32  ;;  %v939_v32 = vrot.slane %v5090_v55, 1  ;;  %v836_v34 = vshrl.u32 %v4916_v52, 16 }
  0x56   : > { %4250 = vmatprep.subr.bf16.mxu1 %v4619_v7 }
  0x57   : > { %v5175_v24 = vsel %vm702_vm1, %v817_v57, %v821_v2  ;;  %v845_v57 = vrot.slane %v843_v58, 1  ;;  %v850_v2 = vshll.u32 %v4923_v54, 16 }
  0x58   : > { %1324 = vmatmul.mubr.bf16.gmra.mrb[20].mxu0 %v5086_v42  ;;  %1758 = vmatmul.mubr.bf16.gmra.mrb[20].mxu1 %v4849_v23  ;;  %v824_v23 = vshrl.u32 %v4868_v31, 16 }
  0x59   : > { %1331 = vmatprep.mubr.bf16.mxu0 %v5134_v62  ;;  %1765 = vmatprep.mubr.bf16.mxu1 %v4947_v3 }
  0x5a   : > { %4251 = vmatpush3.bf16.msra.mxu1 %v4619_v7  ;;  %v831_v7 = vshll.u32 %v4877_v37, 16  ;;  %v829_v44 = vor.u32 %v828_v22, %v824_v23  ;;  %v4634_v37 = vld [vmem:[%s6384_s3 + $0xb8] sm:$0xff]   ;;  %v855_v23 = vshll.u32 %v4931_v60, 16  ;;  %v867_v60 = vshll.u32 %v4974_v15, 16 }
  0x5b   : > { %4252 = vmatprep.subr.bf16.mxu1 %v4620_v27  ;;  %v879_v15 = vshll.u32 %v4985_v26, 16  ;;  %v891_v26 = vshll.u32 %v5028_v50, 16  ;;  %v903_v50 = vshll.u32 %v5039_v59, 16  ;;  %v944_v59 = vrot.slane %v4906_v47, 1 }
  0x5c   : > { %v833_v16 = vrot.slane %v831_v7, 1  ;;  %v857_v7 = vrot.slane %v855_v23, 1 }
  0x5e   : > { %4253 = vmatpush3.bf16.msra.mxu1 %v4620_v27  ;;  %v938_v27 = vrot.slane %v5088_v46, 1  ;;  %v5193_v35 = vsel %vm702_vm1, %v829_v44, %v833_v16  ;;  %v5202_v46 = vld [vmem:[%s6384_s3 + $0x200] sm:$0xff]   ;;  %v860_v16 = vshrl.u32 %v4970_v14, 16 }
  0x5f   : > { %4254 = vmatprep.subr.bf16.mxu1 %v4621_v43 }
  0x60   : > { %1332 = vmatmul.mubr.bf16.gmra.mrb[24].mxu0 %v5099_v61  ;;  %1766 = vmatmul.mubr.bf16.gmra.mrb[24].mxu1 %v4906_v47  ;;  %v5197_v63 = vsel %vm937_vm0, %v938_v27, %v939_v32  ;;  %v869_v27 = vrot.slane %v867_v60, 1  ;;  %v874_v32 = vshll.u32 %v4977_v17, 16 }
  0x61   : > { %1339 = vmatprep.mubr.bf16.mxu0 %v5153_v28  ;;  %1773 = vmatprep.mubr.bf16.mxu1 %v5001_v36 }
  0x62   : > { %4255 = vmatpush3.bf16.msra.mxu1 %v4621_v43  ;;  %v840_v43 = vrot.slane %v838_v25, 1  ;;  %v876_v58 = vrot.slane %v874_v32, 1 }
  0x63   : > { %4256 = vmatprep.subr.bf16.mxu1 %v4622_v20 }
  0x64   : > { %v841_v55 = vor.u32 %v840_v43, %v836_v34  ;;  %v872_v43 = vshrl.u32 %v4977_v17, 16 }
  0x66   : > { %4257 = vmatpush3.bf16.msra.mxu1 %v4622_v20  ;;  %v5211_v53 = vsel %vm702_vm1, %v841_v55, %v845_v57  ;;  %v852_v20 = vrot.slane %v850_v2, 1  ;;  %v877_v55 = vor.u32 %v876_v58, %v872_v43  ;;  %v881_v57 = vrot.slane %v879_v15, 1 }
  0x67   : > { %4258 = vmatprep.subr.bf16.mxu1 %v4625_v38  ;;  %v886_v2 = vshll.u32 %v5024_v49, 16  ;;  %v947_v43 = vrot.slane %v4960_v6, 1  ;;  %v948_v58 = vrot.slane %v4963_v8, 1  ;;  %v950_v8 = vrot.slane %v5014_v39, 1 }
  0x68   : > { %1340 = vmatmul.mubr.bf16.gmra.mrb[28].mxu0 %v5117_v19  ;;  %1774 = vmatmul.mubr.bf16.gmra.mrb[28].mxu1 %v4960_v6  ;;  %v853_v22 = vor.u32 %v852_v20, %v848_v5  ;;  %v5241_v5 = vsel %vm702_vm1, %v877_v55, %v881_v57  ;;  %v884_v20 = vshrl.u32 %v5024_v49, 16  ;;  %v951_v55 = vrot.slane %v5017_v40, 1  ;;  %v4628_v57 = vld [vmem:[%s6384_s3 + $0x1d0] sm:$0xff]   ;;  %v4630_v40 = vld [vmem:[%s6384_s3 + $0x1d8] sm:$0xff]  }
  0x69   : > { %1347 = vmatprep.mubr.bf16.mxu0 %v5175_v24  ;;  %1781 = vmatprep.mubr.bf16.mxu1 %v5055_v9  ;;  %v888_v23 = vrot.slane %v886_v2, 1  ;;  %v953_v2 = vrot.slane %v5072_v12, 1 }
  0x6a   : > { %4259 = vmatpush3.bf16.msra.mxu1 %v4625_v38  ;;  %v862_v38 = vshll.u32 %v4970_v14, 16  ;;  %v5221_v44 = vsel %vm702_vm1, %v853_v22, %v857_v7  ;;  %v893_v7 = vrot.slane %v891_v26, 1  ;;  %v4629_v26 = vld [vmem:[%s6384_s3 + $0x190] sm:$0xff]  }
  0x6b   : > { %4260 = vmatprep.subr.bf16.mxu1 %v4634_v37  ;;  %v889_v22 = vor.u32 %v888_v23, %v884_v20  ;;  %v954_v20 = vrot.slane %v5075_v18, 1  ;;  %v5300_v23 = vsel %vm937_vm0, %v950_v8, %v951_v55  ;;  %v956_v18 = vrot.slane %v5086_v42, 1  ;;  %v4650_v8 = vld [vmem:[%s4836_s11 + $0x6c] sm:$0xff]  }
  0x6c   : > { %v864_v25 = vrot.slane %v862_v38, 1  ;;  %v898_v38 = vshll.u32 %v5031_v51, 16 }
  0x6e   : > { %4261 = vmatpush3.bf16.msra.mxu1 %v4634_v37  ;;  %v865_v37 = vor.u32 %v864_v25, %v860_v16  ;;  %v5251_v16 = vsel %vm702_vm1, %v889_v22, %v893_v7  ;;  %v896_v25 = vshrl.u32 %v5031_v51, 16  ;;  %v900_v60 = vrot.slane %v898_v38, 1  ;;  %v4632_v38 = vld [vmem:[%s6384_s3 + $0x1e0] sm:$0xff]  }
  0x6f   : > { %4294 = vmatprep.subr.bf16.mxu1 %v5202_v46  ;;  %v5310_v22 = vsel %vm937_vm0, %v953_v2, %v954_v20  ;;  %v957_v7 = vrot.slane %v5093_v56, 1  ;;  %v4635_v56 = vld [vmem:[%s6384_s3 + $0x1e8] sm:$0xff]  }
  0x70   : > { %1348 = vmatmul.mubr.bf16.gmra.mrb[32].mxu0 %v4861_v29  ;;  %1782 = vmatmul.mubr.bf16.gmra.mrb[32].mxu1 %v5014_v39  ;;  %v5231_v34 = vsel %vm702_vm1, %v865_v37, %v869_v27  ;;  %v901_v37 = vor.u32 %v900_v60, %v896_v25  ;;  %v905_v27 = vrot.slane %v903_v50, 1  ;;  %v959_v25 = vrot.slane %v5099_v61, 1 }
  0x71   : > { %1355 = vmatprep.mubr.bf16.mxu0 %v5193_v35  ;;  %1789 = vmatprep.mubr.bf16.mxu1 %v5106_v11  ;;  %v960_v60 = vrot.slane %v5109_v21, 1  ;;  %v5326_v50 = vsel %vm937_vm0, %v956_v18, %v957_v7  ;;  %v962_v21 = vrot.slane %v5117_v19, 1 }
  0x72   : > { %v5260_v32 = vsel %vm702_vm1, %v901_v37, %v905_v27  ;;  %v4633_v37 = vld [vmem:[%s6384_s3 + $0x1a0] sm:$0xff]  }
  0x73   : > { %v5336_v27 = vsel %vm937_vm0, %v959_v25, %v960_v60 }
  0x78   : > { %1356 = vmatmul.mubr.bf16.gmra.mrb[36].mxu0 %v4868_v31  ;;  %1790 = vmatmul.mubr.bf16.gmra.mrb[36].mxu1 %v5072_v12 }
  0x79   : > { %1363 = vmatprep.mubr.bf16.mxu0 %v5211_v53  ;;  %1797 = vmatprep.mubr.bf16.mxu1 %v5120_v13 }
  0x80   : > { %1364 = vmatmul.mubr.bf16.gmra.mrb[40].mxu0 %v4916_v52  ;;  %1798 = vmatmul.mubr.bf16.gmra.mrb[40].mxu1 %v5086_v42 }
  0x81   : > { %1371 = vmatprep.mubr.bf16.mxu0 %v5221_v44  ;;  %1805 = vmatprep.mubr.bf16.mxu1 %v5134_v62 }
  0x88   : > { %1372 = vmatmul.mubr.bf16.gmra.mrb[44].mxu0 %v4923_v54  ;;  %1806 = vmatmul.mubr.bf16.gmra.mrb[44].mxu1 %v5099_v61 }
  0x89   : > { %1379 = vmatprep.mubr.bf16.mxu0 %v5231_v34  ;;  %1813 = vmatprep.mubr.bf16.mxu1 %v5153_v28 }
  0x90   : > { %1380 = vmatmul.mubr.bf16.gmra.mrb[48].mxu0 %v4970_v14  ;;  %1814 = vmatmul.mubr.bf16.gmra.mrb[48].mxu1 %v5117_v19 }
  0x91   : > { %1387 = vmatprep.mubr.bf16.mxu0 %v5241_v5  ;;  %1821 = vmatprep.mubr.bf16.mxu1 %v5175_v24 }
  0x98   : > { %1388 = vmatmul.mubr.bf16.gmra.mrb[52].mxu0 %v4977_v17  ;;  %1822 = vmatmul.mubr.bf16.gmra.mrb[52].mxu1 %v4861_v29  ;;  %v945_v29 = vrot.slane %v4909_v48, 1  ;;  %v5284_v48 = vsel %vm937_vm0, %v947_v43, %v948_v58  ;;  %v4638_v58 = vld [vmem:[%s6384_s3 + $0x1b0] sm:$0xff]  }
  0x99   : > { %1395 = vmatprep.mubr.bf16.mxu0 %v5251_v16  ;;  %1829 = vmatprep.mubr.bf16.mxu1 %v5193_v35 }
  0x9a   : > { %v5274_v15 = vsel %vm937_vm0, %v944_v59, %v945_v29  ;;  %v963_v59 = vrot.slane %v5123_v1, 1  ;;  %v4637_v29 = vld [vmem:[%s6384_s3 + $0x1f0] sm:$0xff]   ;;  %v4639_v1 = vld [vmem:[%s6384_s3 + $0x1f8] sm:$0xff]  }
  0x9c   : > { %v5350_v43 = vsel %vm937_vm0, %v962_v21, %v963_v59 }
  0xa0   : > { %1396 = vmatmul.mubr.bf16.gmra.mrb[56].mxu0 %v5024_v49  ;;  %1830 = vmatmul.mubr.bf16.gmra.mrb[56].mxu1 %v4868_v31  ;;  %v4624_v31 = vld [vmem:[%s6384_s3 + $0x180] sm:$0xff]  }
  0xa1   : > { %1403 = vmatprep.mubr.bf16.mxu0 %v5260_v32  ;;  %1837 = vmatprep.mubr.bf16.mxu1 %v5211_v53 }
  0xa8   : > { %1404 = vmatmul.mubr.bf16.gmra.mrb[60].mxu0 %v5031_v51  ;;  %1838 = vmatmul.mubr.bf16.gmra.mrb[60].mxu1 %v4916_v52  ;;  %v4626_v51 = vld [vmem:[%s6384_s3 + $0x1c8] sm:$0xff]  }
  0xa9   : > { %4214 = vmatprep.mubr.bf16.mxu0 %v5166_v30  ;;  %1845 = vmatprep.mubr.bf16.mxu1 %v5221_v44  ;;  %v4627_v52 = vld [vmem:[%s6384_s3 + $0x188] sm:$0xff]  }
  0xb0   : > { %4215 = vmatmul.mubr.bf16.vlgmr.msra.gmra.mrb[64].mxu0 %v5274_v15  ;;  %1846 = vmatmul.mubr.bf16.gmra.mrb[64].mxu1 %v4923_v54  ;;  %v4631_v54 = vld [vmem:[%s6384_s3 + $0x198] sm:$0xff]  }
  0xb1   : > { %4063 = vmatpush3.bf16.msra.mxu0 %v4624_v31  ;;  %4218 = vmatprep.mubr.bf16.mxu0 %v5284_v48  ;;  %v4642_v31 = vld [vmem:[%s6384_s3 + $0x208] sm:$0xff]  }
  0xb2   : > { %4064 = vmatprep.subr.bf16.mxu0 %v4626_v51  ;;  %1853 = vmatprep.mubr.bf16.mxu1 %v5231_v34 }
  0xb5   : > { %4065 = vmatpush3.bf16.msra.mxu0 %v4627_v52 }
  0xb6   : > { %4066 = vmatprep.subr.bf16.mxu0 %v4628_v57 }
  0xb8   : > { %4219 = vmatmul.mubr.bf16.gmra.mrb[68].mxu0 %v5300_v23  ;;  %1854 = vmatmul.mubr.bf16.gmra.mrb[68].mxu1 %v4970_v14  ;;  %v4636_v14 = vld [vmem:[%s6384_s3 + $0x1a8] sm:$0xff]  }
  0xb9   : > { %4067 = vmatpush3.bf16.msra.mxu0 %v4629_v26  ;;  %4222 = vmatprep.mubr.bf16.mxu0 %v5310_v22 }
  0xba   : > { %4068 = vmatprep.subr.bf16.mxu0 %v4630_v40  ;;  %1861 = vmatprep.mubr.bf16.mxu1 %v5241_v5 }
  0xbd   : > { %4069 = vmatpush3.bf16.msra.mxu0 %v4631_v54 }
  0xbe   : > { %4070 = vmatprep.subr.bf16.mxu0 %v4632_v38 }
  0xc0   : > { %4223 = vmatmul.mubr.bf16.gmra.mrb[72].mxu0 %v5326_v50  ;;  %1862 = vmatmul.mubr.bf16.gmra.mrb[72].mxu1 %v4977_v17  ;;  %v4640_v17 = vld [vmem:[%s6384_s3 + $0x1b8] sm:$0xff]  }
  0xc1   : > { %4071 = vmatpush3.bf16.msra.mxu0 %v4633_v37  ;;  %4226 = vmatprep.mubr.bf16.mxu0 %v5336_v27  ;;  %v531_v37 = vld [vmem:[%s431_s12 + $0x4] sm:$0xf] }
  0xc2   : > { %4072 = vmatprep.subr.bf16.mxu0 %v4635_v56  ;;  %1869 = vmatprep.mubr.bf16.mxu1 %v5251_v16  ;;  %v4653_v56 = vld [vmem:[%s4836_s11 + $0x90] sm:$0xff]  }
  0xc5   : > { %4073 = vmatpush3.bf16.msra.mxu0 %v4636_v14 }
  0xc6   : > { %4074 = vmatprep.subr.bf16.mxu0 %v4637_v29  ;;  %v538_v29 = vmul.bf16 0.0, %v531_v37 }
  0xc8   : > { %4227 = vmatmul.mubr.bf16.gmra.mrb[76].mxu0 %v5350_v43  ;;  %1870 = vmatmul.mubr.bf16.gmra.mrb[76].mxu1 %v5024_v49  ;;  %v4647_v49 = vld [vmem:[%s6384_s3 + $0x230] sm:$0xff]  }
  0xc9   : > { %4075 = vmatpush3.bf16.msra.mxu0 %v4638_v58  ;;  %2264 = vmatprep.mubr.bf16.mxu0 %v4947_v3  ;;  %v4643_v3 = vld [vmem:[%s6384_s3 + $0x210] sm:$0xff]  }
  0xca   : > { %4076 = vmatprep.subr.bf16.mxu0 %v4639_v1  ;;  %4262 = vmatprep.mubr.bf16.mxu1 %v5197_v63 }
  0xcd   : > { %4077 = vmatpush3.bf16.msra.mxu0 %v4640_v17  ;;  %v532_v17 = vld [vmem:[%s431_s12 + $0x8] sm:$0x1] }
  0xd0   : > { %2265 = vmatmul.mubr.bf16.vlgmr.msra.gmra.mrb[80].mxu0 %v4906_v47  ;;  %4263 = vmatmul.mubr.bf16.vlgmr.msra.gmra.mrb[80].mxu1 %v5166_v30  ;;  %v4644_v47 = vld [vmem:[%s6384_s3 + $0x218] sm:$0xff]  }
  0xd1   : > { %2272 = vmatprep.mubr.bf16.mxu0 %v5001_v36  ;;  %4295 = vmatpush3.bf16.msra.mxu1 %v5202_v46  ;;  %v4645_v36 = vld [vmem:[%s6384_s3 + $0x220] sm:$0xff]  }
  0xd2   : > { %4266 = vmatprep.mubr.bf16.mxu1 %v5274_v15  ;;  %4296 = vmatprep.subr.bf16.mxu1 %v4642_v31  ;;  %v4649_v46 = vld [vmem:[%s4836_s11 + $0x60] sm:$0xff]  }
  0xd5   : > { %4297 = vmatpush3.bf16.msra.mxu1 %v4642_v31 }
  0xd6   : > { %4298 = vmatprep.subr.bf16.mxu1 %v4643_v3 }
  0xd8   : > { %2273 = vmatmul.mubr.bf16.gmra.mrb[84].mxu0 %v4960_v6  ;;  %4267 = vmatmul.mubr.bf16.gmra.mrb[84].mxu1 %v5284_v48  ;;  %v4646_v6 = vld [vmem:[%s6384_s3 + $0x228] sm:$0xff]  }
  0xd9   : > { %2280 = vmatprep.mubr.bf16.mxu0 %v5055_v9  ;;  %4270 = vmatprep.mubr.bf16.mxu1 %v5300_v23 }
  0xda   : > { %4299 = vmatpush3.bf16.msra.mxu1 %v4643_v3 }
  0xdb   : > { %4300 = vmatprep.subr.bf16.mxu1 %v4644_v47 }
  0xde   : > { %4301 = vmatpush3.bf16.msra.mxu1 %v4644_v47 }
  0xdf   : > { %4302 = vmatprep.subr.bf16.mxu1 %v4645_v36 }
  0xe0   : > { %2281 = vmatmul.mubr.bf16.gmra.mrb[88].mxu0 %v5014_v39  ;;  %4271 = vmatmul.mubr.bf16.gmra.mrb[88].mxu1 %v5310_v22  ;;  %v4648_v39 = vld [vmem:[%s6384_s3 + $0x238] sm:$0xff]  }
  0xe1   : > { %2288 = vmatprep.mubr.bf16.mxu0 %v5106_v11  ;;  %4274 = vmatprep.mubr.bf16.mxu1 %v5326_v50 }
  0xe2   : > { %4303 = vmatpush3.bf16.msra.mxu1 %v4645_v36 }
  0xe3   : > { %4304 = vmatprep.subr.bf16.mxu1 %v4646_v6 }
  0xe6   : > { %4305 = vmatpush3.bf16.msra.mxu1 %v4646_v6 }
  0xe7   : > { %4306 = vmatprep.subr.bf16.mxu1 %v4647_v49 }
  0xe8   : > { %2289 = vmatmul.mubr.bf16.gmra.mrb[92].mxu0 %v5072_v12  ;;  %4275 = vmatmul.mubr.bf16.gmra.mrb[92].mxu1 %v5336_v27 }
  0xe9   : > { %2296 = vmatprep.mubr.bf16.mxu0 %v5120_v13  ;;  %4278 = vmatprep.mubr.bf16.mxu1 %v5350_v43 }
  0xea   : > { %4307 = vmatpush3.bf16.msra.mxu1 %v4647_v49 }
  0xeb   : > { %4308 = vmatprep.subr.bf16.mxu1 %v4648_v39 }
  0xee   : > { %4309 = vmatpush3.bf16.msra.mxu1 %v4648_v39 }
  0xf0   : > { %2297 = vmatmul.mubr.bf16.gmra.mrb[96].mxu0 %v5086_v42  ;;  %4279 = vmatmul.mubr.bf16.gmra.mrb[0].mxu1 %v4885_v41 }
  0xf1   : > { %2304 = vmatprep.mubr.bf16.mxu0 %v5134_v62  ;;  %4282 = vmatprep.mubr.bf16.mxu1 %v4898_v45 }
  0xf8   : > { %2305 = vmatmul.mubr.bf16.gmra.mrb[100].mxu0 %v5099_v61  ;;  %4283 = vmatmul.mubr.bf16.gmra.mrb[4].mxu1 %v4940_v0 }
  0xf9   : > { %2312 = vmatprep.mubr.bf16.mxu0 %v5153_v28  ;;  %4286 = vmatprep.mubr.bf16.mxu1 %v4952_v4 }
 0x100   : > { %2313 = vmatmul.mubr.bf16.gmra.mrb[104].mxu0 %v5117_v19  ;;  %4287 = vmatmul.mubr.bf16.gmra.mrb[8].mxu1 %v4994_v33  ;;  %v6394_v19 = vld [vmem:[#allocation2_spill] sm:$0xff] }
 0x101   : > { %2320 = vmatprep.mubr.bf16.mxu0 %v5175_v24  ;;  %4290 = vmatprep.mubr.bf16.mxu1 %v5006_v10 }
 0x103   : > { %v3806_v9 = vpop.f32.mrb[0].mxu0 }
 0x104   : > { %v3807_v12 = vpop.f32.mrb[1].mxu0 }
 0x105   : > { %v5411_v11 = vadd.f32 %v3807_v12, %v3806_v9  ;;  %v3809_v13 = vpop.f32.mrb[2].mxu0  ;;  %v4654_v9 = vld [vmem:[%s4836_s11 + $0x9c] sm:$0xff]  }
 0x106   : > { %v3810_v42 = vpop.f32.mrb[3].mxu0 }
 0x107   : > { %v5414_v62 = vadd.f32 %v3810_v42, %v3809_v13 }
 0x108   : > { %2321 = vmatmul.mubr.bf16.gmra.mrb[108].mxu0 %v4649_v46  ;;  %4291 = vmatmul.mubr.bf16.gmra.mrb[12].mxu1 %v6394_v19 }
 0x109   : > { %2328 = vmatprep.mubr.bf16.mxu0 %v5193_v35  ;;  %4310 = vmatprep.mubr.bf16.mxu1 %v5274_v15  ;;  %v4651_v35 = vld [vmem:[%s4836_s11 + $0x78] sm:$0xff]  }
 0x10b   : > { %v3812_v61 = vpop.f32.mrb[4].mxu0 }
 0x10c   : > { %v3813_v28 = vpop.f32.mrb[5].mxu0 }
 0x10d   : > { %v5420_v30 = vadd.f32 %v3813_v28, %v3812_v61  ;;  %v3815_v63 = vpop.f32.mrb[6].mxu0 }
 0x10e   : > { %v3816_v51 = vpop.f32.mrb[7].mxu0 }
 0x10f   : > { %v5423_v52 = vadd.f32 %v3816_v51, %v3815_v63 }
 0x110   : > { %2329 = vmatmul.mubr.bf16.gmra.mrb[112].mxu0 %v4650_v8  ;;  %4311 = vmatmul.mubr.bf16.vlgmr.msra.gmra.mrb[80].mxu1 %v5284_v48  ;;  %v4652_v48 = vld [vmem:[%s4836_s11 + $0x84] sm:$0xff]  }
 0x111   : > { %2336 = vmatprep.mubr.bf16.mxu0 %v5211_v53  ;;  %4314 = vmatprep.mubr.bf16.mxu1 %v5300_v23 }
 0x113   : > { %v3818_v24 = vpop.f32.mrb[8].mxu0 }
 0x114   : > { %v3819_v55 = vpop.f32.mrb[9].mxu0 }
 0x115   : > { %v5429_v57 = vadd.f32 %v3819_v55, %v3818_v24  ;;  %v3821_v2 = vpop.f32.mrb[10].mxu0 }
 0x116   : > { %v3822_v20 = vpop.f32.mrb[11].mxu0 }
 0x117   : > { %v5432_v26 = vadd.f32 %v3822_v20, %v3821_v2 }
 0x118   : > { %2337 = vmatmul.mubr.bf16.gmra.mrb[116].mxu0 %v4651_v35  ;;  %4315 = vmatmul.mubr.bf16.gmra.mrb[84].mxu1 %v5310_v22 }
 0x119   : > { %2344 = vmatprep.mubr.bf16.mxu0 %v5221_v44  ;;  %4318 = vmatprep.mubr.bf16.mxu1 %v5326_v50  ;;  %v530_v50 = vld [vmem:[%s431_s12] sm:$0xf] }
 0x11b   : > { %v3824_v15 = vpop.f32.mrb[12].mxu0 }
 0x11c   : > { %v3825_v40 = vpop.f32.mrb[13].mxu0 }
 0x11d   : > { %v5438_v54 = vadd.f32 %v3825_v40, %v3824_v15  ;;  %v3827_v18 = vpop.f32.mrb[14].mxu0  ;;  %v4655_v15 = vld [vmem:[%s4836_s11 + $0xa8] sm:$0xff]  }
 0x11e   : > { %v3828_v7 = vpop.f32.mrb[15].mxu0 }
 0x11f   : > { %v5441_v53 = vadd.f32 %v3828_v7, %v3827_v18 }
 0x120   : > { %2345 = vmatmul.mubr.bf16.gmra.mrb[120].mxu0 %v4652_v48  ;;  %4319 = vmatmul.mubr.bf16.gmra.mrb[88].mxu1 %v5336_v27  ;;  %v537_v27 = vmul.bf16 0.0, %v530_v50 }
 0x121   : > { %2352 = vmatprep.mubr.bf16.mxu0 %v5231_v34  ;;  %4322 = vmatprep.mubr.bf16.mxu1 %v5350_v43 }
 0x122   : > { %v5466_v6 = vcombine.low %v537_v27, %v538_v29 }
 0x123   : > { %v3830_v23 = vpop.f32.mrb[16].mxu0  ;;  %v3942_v34 = vpop.f32.mrb[16].mxu1 }
 0x124   : > { %v3831_v38 = vpop.f32.mrb[17].mxu0  ;;  %v3943_v14 = vpop.f32.mrb[17].mxu1  ;;  %v910_v61 = vshll.u32 %v5466_v6, 16 }
 0x125   : > { %v5451_v44 = vadd.f32 %v3831_v38, %v3830_v23  ;;  %v3833_v22 = vpop.f32.mrb[18].mxu0  ;;  %v5458_v21 = vadd.f32 %v3943_v14, %v3942_v34  ;;  %v3945_v59 = vpop.f32.mrb[18].mxu1  ;;  %v4656_v14 = vld [vmem:[%s4836_s11 + $0xb4] sm:$0xff]  }
 0x126   : > { %v3834_v25 = vpop.f32.mrb[19].mxu0  ;;  %v3946_v58 = vpop.f32.mrb[19].mxu1  ;;  %v912_v55 = vrot.slane %v910_v61, 1 }
 0x127   : > { %v5454_v60 = vadd.f32 %v3834_v25, %v3833_v22  ;;  %v5460_v43 = vadd.f32 %v3946_v58, %v3945_v59 }
 0x128   : > { %2353 = vmatmul.mubr.bf16.gmra.mrb[124].mxu0 %v4653_v56  ;;  %4323 = vmatmul.mubr.bf16.gmra.mrb[92].mxu1 %v4885_v41 }
 0x129   : > { %2360 = vmatprep.mubr.bf16.mxu0 %v5241_v5  ;;  %4326 = vmatprep.mubr.bf16.mxu1 %v4898_v45  ;;  %v539_v5 = vmul.bf16 0.0, %v532_v17 }
 0x12b   : > { %v3836_v1 = vpop.f32.mrb[20].mxu0  ;;  %v3948_v39 = vpop.f32.mrb[20].mxu1  ;;  %v3550_v42 = vcombine.low %v539_v5, %v539_v5  ;;  %v989_v5 = vrot.slane %v5466_v6, 1 }
 0x12c   : > { %v3837_v31 = vpop.f32.mrb[21].mxu0  ;;  %v3949_v12 = vpop.f32.mrb[21].mxu1 }
 0x12d   : > { %v5463_v3 = vadd.f32 %v3837_v31, %v3836_v1  ;;  %v3839_v47 = vpop.f32.mrb[22].mxu0  ;;  %v5472_v13 = vadd.f32 %v3949_v12, %v3948_v39  ;;  %v3951_v41 = vpop.f32.mrb[22].mxu1  ;;  %v915_v2 = vshll.u32 %v3550_v42, 16  ;;  %v990_v39 = vrot.slane %v3550_v42, 1 }
 0x12e   : > { %v3840_v36 = vpop.f32.mrb[23].mxu0  ;;  %v3952_v28 = vpop.f32.mrb[23].mxu1 }
 0x12f   : > { %v5468_v49 = vadd.f32 %v3840_v36, %v3839_v47  ;;  %v5475_v63 = vadd.f32 %v3952_v28, %v3951_v41  ;;  %v917_v48 = vrot.slane %v915_v2, 1  ;;  %v6395_v36 = vld [vmem:[#allocation3_spill] sm:$0xff] }
 0x130   : > { %2361 = vmatmul.mubr.bf16.gmra.mrb[128].mxu0 %v4654_v9  ;;  %4327 = vmatmul.mubr.bf16.gmra.mrb[0].mxu1 %v4940_v0 }
 0x131   : > { %2368 = vmatprep.mubr.bf16.mxu0 %v5251_v16  ;;  %4330 = vmatprep.mubr.bf16.mxu1 %v4952_v4  ;;  %v908_v16 = vshrl.u32 %v5466_v6, 16 }
 0x133   : > { %v3842_v45 = vpop.f32.mrb[24].mxu0  ;;  %v3954_v35 = vpop.f32.mrb[24].mxu1  ;;  %v913_v7 = vor.u32 %v912_v55, %v908_v16 }
 0x134   : > { %v3843_v46 = vpop.f32.mrb[25].mxu0  ;;  %v3955_v40 = vpop.f32.mrb[25].mxu1 }
 0x135   : > { %v5478_v51 = vadd.f32 %v3843_v46, %v3842_v45  ;;  %v3845_v24 = vpop.f32.mrb[26].mxu0  ;;  %v5486_v18 = vadd.f32 %v3955_v40, %v3954_v35  ;;  %v3957_v0 = vpop.f32.mrb[26].mxu1 }
 0x136   : > { %v3846_v8 = vpop.f32.mrb[27].mxu0  ;;  %v3958_v23 = vpop.f32.mrb[27].mxu1 }
 0x137   : > { %v5482_v20 = vadd.f32 %v3846_v8, %v3845_v24  ;;  %v5488_v38 = vadd.f32 %v3958_v23, %v3957_v0 }
 0x138   : > { %2369 = vmatmul.mubr.bf16.gmra.mrb[132].mxu0 %v4655_v15  ;;  %4331 = vmatmul.mubr.bf16.gmra.mrb[4].mxu1 %v4994_v33 }
 0x139   : > { %2376 = vmatprep.mubr.bf16.mxu0 %v5260_v32  ;;  %4334 = vmatprep.mubr.bf16.mxu1 %v5006_v10  ;;  %v918_v32 = vsel %vm702_vm1, %v913_v7, %v917_v48 }
 0x13b   : > { %v3848_v4 = vpop.f32.mrb[28].mxu0  ;;  %v3960_v56 = vpop.f32.mrb[28].mxu1 }
 0x13c   : > { %v3849_v22 = vpop.f32.mrb[29].mxu0  ;;  %v3961_v59 = vpop.f32.mrb[29].mxu1 }
 0x13d   : > { %v5491_v25 = vadd.f32 %v3849_v22, %v3848_v4  ;;  %v3851_v50 = vpop.f32.mrb[30].mxu0  ;;  %v5498_v27 = vadd.f32 %v3961_v59, %v3960_v56  ;;  %v3963_v29 = vpop.f32.mrb[30].mxu1 }
 0x13e   : > { %v3852_v37 = vpop.f32.mrb[31].mxu0  ;;  %v3964_v58 = vpop.f32.mrb[31].mxu1 }
 0x13f   : > { %v5495_v34 = vadd.f32 %v3852_v37, %v3851_v50  ;;  %v5500_v1 = vadd.f32 %v3964_v58, %v3963_v29 }
 0x140   : > { %2377 = vmatmul.mubr.bf16.gmra.mrb[136].mxu0 %v4656_v14  ;;  %4335 = vmatmul.mubr.bf16.gmra.mrb[8].mxu1 %v6394_v19  ;;  %v991_v19 = vsel %vm937_vm0, %v989_v5, %v990_v39 }
 0x141   : > { %2384 = vmatprep.mubr.bf16.mxu0 %v918_v32  ;;  %4338 = vmatprep.mubr.bf16.mxu1 %v6395_v36 }
 0x143   : > { %v3854_v33 = vpop.f32.mrb[32].mxu0  ;;  %v3966_v12 = vpop.f32.mrb[32].mxu1 }
 0x144   : > { %v3855_v17 = vpop.f32.mrb[33].mxu0  ;;  %v3967_v41 = vpop.f32.mrb[33].mxu1 }
 0x145   : > { %v5503_v10 = vadd.f32 %v3855_v17, %v3854_v33  ;;  %v3857_v31 = vpop.f32.mrb[34].mxu0  ;;  %v5510_v61 = vadd.f32 %v3967_v41, %v3966_v12  ;;  %v3969_v28 = vpop.f32.mrb[34].mxu1 }
 0x146   : > { %v3858_v47 = vpop.f32.mrb[35].mxu0  ;;  %v3970_v45 = vpop.f32.mrb[35].mxu1 }
 0x147   : > { %v5507_v9 = vadd.f32 %v3858_v47, %v3857_v31  ;;  %v5513_v24 = vadd.f32 %v3970_v45, %v3969_v28 }
 0x148   : > { %2385 = vmatmul.mubr.bf16.gmra.mrb[140].mxu0 %v5466_v6  ;;  %4339 = vmatmul.mubr.bf16.gmra.mrb[12].mxu1 %v991_v19 }
 0x14b   : > { %v3860_v46 = vpop.f32.mrb[36].mxu0  ;;  %v3972_v35 = vpop.f32.mrb[36].mxu1 }
 0x14c   : > { %v3861_v8 = vpop.f32.mrb[37].mxu0  ;;  %v3973_v6 = vpop.f32.mrb[37].mxu1 }
 0x14d   : > { %v5515_v16 = vadd.f32 %v3861_v8, %v3860_v46  ;;  %v3863_v42 = vpop.f32.mrb[38].mxu0  ;;  %v5519_v15 = vadd.f32 %v3973_v6, %v3972_v35  ;;  %v3975_v40 = vpop.f32.mrb[38].mxu1 }
 0x14e   : > { %v3864_v55 = vpop.f32.mrb[39].mxu0  ;;  %v3976_v0 = vpop.f32.mrb[39].mxu1 }
 0x14f   : > { %v5517_v2 = vadd.f32 %v3864_v55, %v3863_v42  ;;  %v5521_v48 = vadd.f32 %v3976_v0, %v3975_v40 }
 0x153   : > { %v3866_v7 = vpop.f32.mrb[40].mxu0  ;;  %v3978_v32 = vpop.f32.mrb[40].mxu1 }
 0x154   : > { %v3867_v23 = vpop.f32.mrb[41].mxu0  ;;  %v3979_v56 = vpop.f32.mrb[41].mxu1 }
 0x155   : > { %v5523_v4 = vadd.f32 %v3867_v23, %v3866_v7  ;;  %v3869_v22 = vpop.f32.mrb[42].mxu0  ;;  %v5527_v14 = vadd.f32 %v3979_v56, %v3978_v32  ;;  %v3981_v59 = vpop.f32.mrb[42].mxu1 }
 0x156   : > { %v3870_v50 = vpop.f32.mrb[43].mxu0  ;;  %v3982_v29 = vpop.f32.mrb[43].mxu1 }
 0x157   : > { %v5525_v37 = vadd.f32 %v3870_v50, %v3869_v22  ;;  %v5529_v33 = vadd.f32 %v3982_v29, %v3981_v59 }
 0x15b   : > { %v3872_v58 = vpop.f32.mrb[44].mxu0  ;;  %v3984_v39 = vpop.f32.mrb[44].mxu1 }
 0x15c   : > { %v3873_v17 = vpop.f32.mrb[45].mxu0  ;;  %v3985_v12 = vpop.f32.mrb[45].mxu1 }
 0x15d   : > { %v5531_v31 = vadd.f32 %v3873_v17, %v3872_v58  ;;  %v3875_v47 = vpop.f32.mrb[46].mxu0  ;;  %v5535_v41 = vadd.f32 %v3985_v12, %v3984_v39  ;;  %v3987_v28 = vpop.f32.mrb[46].mxu1 }
 0x15e   : > { %v3876_v36 = vpop.f32.mrb[47].mxu0  ;;  %v3988_v19 = vpop.f32.mrb[47].mxu1 }
 0x15f   : > { %v5533_v5 = vadd.f32 %v3876_v36, %v3875_v47  ;;  %v5537_v46 = vadd.f32 %v3988_v19, %v3987_v28  ;;  %v2757_v28 = vld [vmem:[%s5552_s14 + $0xc] sm:$0x1] }
 0x163   : > { %v3878_v45 = vpop.f32.mrb[48].mxu0  ;;  %v3990_v40 = vpop.f32.mrb[48].mxu1 }
 0x164   : > { %v3879_v8 = vpop.f32.mrb[49].mxu0  ;;  %v3991_v0 = vpop.f32.mrb[49].mxu1 }
 0x165   : > { %v5539_v42 = vadd.f32 %v3879_v8, %v3878_v45  ;;  %v3881_v55 = vpop.f32.mrb[50].mxu0  ;;  %v3992_v7 = vadd.f32 %v3991_v0, %v3990_v40  ;;  %v3993_v23 = vpop.f32.mrb[50].mxu1  ;;  %v2758_v45 = vsel %vm5560_vm4, 0, %v2757_v28 }
 0x166   : > { %v3882_v35 = vpop.f32.mrb[51].mxu0  ;;  %v3994_v22 = vpop.f32.mrb[51].mxu1  ;;  %2759 = vst [vmem:[%s5552_s14 + $0xc] sm:$0x1] %v2758_v45  ;;  %v2763_v45 = vld [vmem:[%s5552_s14 + $0x24] sm:$0x1] }
 0x167   : > { %v5541_v6 = vadd.f32 %v3882_v35, %v3881_v55  ;;  %v5544_v32 = vadd.f32 %v3992_v7, %v5503_v10  ;;  %v3995_v56 = vadd.f32 %v3994_v22, %v3993_v23  ;;  %v2754_v55 = vld [vmem:[%s5552_s14] sm:$0x1]  ;;  %v2807_v7 = vld [vmem:[%s5552_s14 + $0x14] sm:$0x1] }
 0x168   : > { %v2755_v0 = vsel %vm5560_vm4, 0, %v2754_v55 }
 0x169   : > { %v5555_v17 = vadd.f32 %v3995_v56, %v5507_v9  ;;  %2756 = vst [vmem:[%s5552_s14] sm:$0x1] %v2755_v0  ;;  %v2808_v56 = vsel %vm5568_vm6, 0, %v2807_v7  ;;  %v2760_v0 = vld [vmem:[%s5552_s14 + $0x18] sm:$0x1] }
 0x16a   : > { %2809 = vst [vmem:[%s5552_s14 + $0x14] sm:$0x1] %v2808_v56 }
 0x16b   : > { %v3884_v50 = vpop.f32.mrb[52].mxu0  ;;  %v3996_v10 = vpop.f32.mrb[52].mxu1 }
 0x16c   : > { %v3885_v59 = vpop.f32.mrb[53].mxu0  ;;  %v3997_v39 = vpop.f32.mrb[53].mxu1 }
 0x16d   : > { %v5546_v29 = vadd.f32 %v3885_v59, %v3884_v50  ;;  %v3887_v58 = vpop.f32.mrb[54].mxu0  ;;  %v3998_v9 = vadd.f32 %v3997_v39, %v3996_v10  ;;  %v3999_v19 = vpop.f32.mrb[54].mxu1  ;;  %v2804_v59 = vld [vmem:[%s5552_s14 + $0x8] sm:$0x1] }
 0x16e   : > { %v3888_v47 = vpop.f32.mrb[55].mxu0  ;;  %v4000_v35 = vpop.f32.mrb[55].mxu1  ;;  %v2805_v10 = vsel %vm5568_vm6, 0, %v2804_v59  ;;  %v2761_v59 = vsel %vm5560_vm4, 0, %v2760_v0 }
 0x16f   : > { %v5557_v36 = vadd.f32 %v3888_v47, %v3887_v58  ;;  %v5578_v23 = vadd.f32 %v3998_v9, %v5515_v16  ;;  %v4001_v22 = vadd.f32 %v4000_v35, %v3999_v19  ;;  %2806 = vst [vmem:[%s5552_s14 + $0x8] sm:$0x1] %v2805_v10  ;;  %2762 = vst [vmem:[%s5552_s14 + $0x18] sm:$0x1] %v2761_v59 }
 0x171   : > { %v5590_v16 = vadd.f32 %v4001_v22, %v5517_v2 }
 0x173   : > { %v3890_v40 = vpop.f32.mrb[56].mxu0  ;;  %v4002_v9 = vpop.f32.mrb[56].mxu1 }
 0x174   : > { %v3891_v50 = vpop.f32.mrb[57].mxu0  ;;  %v4003_v19 = vpop.f32.mrb[57].mxu1 }
 0x175   : > { %v5584_v58 = vadd.f32 %v3891_v50, %v3890_v40  ;;  %v3893_v47 = vpop.f32.mrb[58].mxu0  ;;  %v4004_v55 = vadd.f32 %v4003_v19, %v4002_v9  ;;  %v4005_v35 = vpop.f32.mrb[58].mxu1  ;;  %v2764_v40 = vsel %vm5560_vm4, 0, %v2763_v45 }
 0x176   : > { %v3894_v39 = vpop.f32.mrb[59].mxu0  ;;  %v4006_v7 = vpop.f32.mrb[59].mxu1  ;;  %2765 = vst [vmem:[%s5552_s14 + $0x24] sm:$0x1] %v2764_v40 }
 0x177   : > { %v5593_v28 = vadd.f32 %v3894_v39, %v3893_v47  ;;  %v5601_v2 = vadd.f32 %v4004_v55, %v5523_v4  ;;  %v4007_v22 = vadd.f32 %v4006_v7, %v4005_v35 }
 0x179   : > { %v5609_v39 = vadd.f32 %v4007_v22, %v5525_v37 }
 0x17b   : > { %v3896_v50 = vpop.f32.mrb[60].mxu0  ;;  %6400 = vst [vmem:[#allocation2_spill] sm:$0xff] %v5609_v39  ;;  %v4008_v45 = vpop.f32.mrb[60].mxu1 }
 0x17c   : > { %v3897_v56 = vpop.f32.mrb[61].mxu0  ;;  %v4009_v40 = vpop.f32.mrb[61].mxu1 }
 0x17d   : > { %v5605_v47 = vadd.f32 %v3897_v56, %v3896_v50  ;;  %v3899_v10 = vpop.f32.mrb[62].mxu0  ;;  %v4010_v4 = vadd.f32 %v4009_v40, %v4008_v45  ;;  %v4011_v55 = vpop.f32.mrb[62].mxu1 }
 0x17e   : > { %v3900_v9 = vpop.f32.mrb[63].mxu0  ;;  %v4012_v35 = vpop.f32.mrb[63].mxu1 }
 0x17f   : > { %v5611_v19 = vadd.f32 %v3900_v9, %v3899_v10  ;;  %v5614_v0 = vadd.f32 %v4010_v4, %v5531_v31  ;;  %v4013_v50 = vadd.f32 %v4012_v35, %v4011_v55  ;;  %v2813_v10 = vld [vmem:[%s5552_s14 + $0x2c] sm:$0x1] }
 0x180   : > { %v2814_v31 = vsel %vm5568_vm6, 0, %v2813_v10 }
 0x181   : > { %v5620_v9 = vadd.f32 %v4013_v50, %v5533_v5  ;;  %2815 = vst [vmem:[%s5552_s14 + $0x2c] sm:$0x1] %v2814_v31 }
 0x183   : > { %v4216_v7 = vpop.f32.mrb[64].mxu0 }
 0x184   : > { %v1455_v56 = vadd.f32 %v4216_v7, %v5420_v30  ;;  %v1446_v59 = vpop.f32.mrb[65].mxu0  ;;  %v2810_v30 = vld [vmem:[%s5552_s14 + $0x20] sm:$0x1] }
 0x185   : > { %v1447_v37 = vadd.f32 %v5411_v11, %v1446_v59  ;;  %v4217_v22 = vpop.f32.mrb[66].mxu0  ;;  %v2811_v5 = vsel %vm5568_vm6, 0, %v2810_v30  ;;  %v2819_v30 = vld [vmem:[%s5552_s14 + $0x44] sm:$0x1] }
 0x186   : > { %v5623_v45 = vadd.f32 %v5472_v13, %v1455_v56  ;;  %v1458_v40 = vadd.f32 %v4217_v22, %v5423_v52  ;;  %v1449_v39 = vpop.f32.mrb[67].mxu0  ;;  %v4014_v13 = vpop.f32.mrb[64].mxu1  ;;  %2812 = vst [vmem:[%s5552_s14 + $0x20] sm:$0x1] %v2811_v5 }
 0x187   : > { %v5630_v4 = vadd.f32 %v5458_v21, %v1447_v37  ;;  %v1450_v11 = vadd.f32 %v5414_v62, %v1449_v39  ;;  %v4015_v52 = vpop.f32.mrb[65].mxu1  ;;  %v2769_v39 = vld [vmem:[%s5552_s14 + $0x3c] sm:$0x1] }
 0x188   : > { %v5637_v55 = vadd.f32 %v5475_v63, %v1458_v40  ;;  %v4016_v21 = vadd.f32 %v4015_v52, %v4014_v13  ;;  %v4017_v7 = vpop.f32.mrb[66].mxu1  ;;  %v2770_v22 = vsel %vm5560_vm4, 0, %v2769_v39 }
 0x189   : > { %v5641_v35 = vadd.f32 %v5460_v43, %v1450_v11  ;;  %v4018_v50 = vpop.f32.mrb[67].mxu1  ;;  %v2766_v43 = vld [vmem:[%s5552_s14 + $0x30] sm:$0x1]  ;;  %2771 = vst [vmem:[%s5552_s14 + $0x3c] sm:$0x1] %v2770_v22 }
 0x18a   : > { %v5645_v56 = vadd.f32 %v4016_v21, %v5539_v42  ;;  %v4019_v59 = vadd.f32 %v4018_v50, %v4017_v7  ;;  %v2767_v31 = vsel %vm5560_vm4, 0, %v2766_v43 }
 0x18b   : > { %v4220_v62 = vpop.f32.mrb[68].mxu0  ;;  %2768 = vst [vmem:[%s5552_s14 + $0x30] sm:$0x1] %v2767_v31  ;;  %v4020_v21 = vpop.f32.mrb[68].mxu1  ;;  %v2775_v31 = vld [vmem:[%s5552_s14 + $0x54] sm:$0x1] }
 0x18c   : > { %v1471_v63 = vadd.f32 %v4220_v62, %v5438_v54  ;;  %v1462_v37 = vpop.f32.mrb[69].mxu0  ;;  %v5657_v42 = vadd.f32 %v4019_v59, %v5541_v6 }
 0x18d   : > { %v1463_v10 = vadd.f32 %v5429_v57, %v1462_v37  ;;  %v4221_v40 = vpop.f32.mrb[70].mxu0  ;;  %v2820_v57 = vsel %vm5568_vm6, 0, %v2819_v30 }
 0x18e   : > { %v5660_v54 = vadd.f32 %v5498_v27, %v1471_v63  ;;  %v1474_v11 = vadd.f32 %v4221_v40, %v5441_v53  ;;  %v1465_v5 = vpop.f32.mrb[71].mxu0  ;;  %2821 = vst [vmem:[%s5552_s14 + $0x44] sm:$0x1] %v2820_v57  ;;  %v4021_v27 = vpop.f32.mrb[69].mxu1  ;;  %v2816_v53 = vld [vmem:[%s5552_s14 + $0x38] sm:$0x1] }
 0x18f   : > { %v5667_v13 = vadd.f32 %v5486_v18, %v1463_v10  ;;  %v1466_v52 = vadd.f32 %v5432_v26, %v1465_v5  ;;  %v4022_v50 = vadd.f32 %v4021_v27, %v4020_v21  ;;  %v4023_v62 = vpop.f32.mrb[70].mxu1  ;;  %v2817_v39 = vsel %vm5568_vm6, 0, %v2816_v53 }
 0x190   : > { %v5672_v6 = vadd.f32 %v5500_v1, %v1474_v11  ;;  %v4024_v18 = vpop.f32.mrb[71].mxu1  ;;  %2818 = vst [vmem:[%s5552_s14 + $0x38] sm:$0x1] %v2817_v39  ;;  %v2772_v11 = vld [vmem:[%s5552_s14 + $0x48] sm:$0x1] }
 0x191   : > { %v5675_v7 = vadd.f32 %v5488_v38, %v1466_v52  ;;  %v5682_v26 = vadd.f32 %v4022_v50, %v5546_v29  ;;  %v4025_v1 = vadd.f32 %v4024_v18, %v4023_v62  ;;  %v2825_v52 = vld [vmem:[%s5552_s14 + $0x5c] sm:$0x1] }
 0x193   : > { %v4224_v59 = vpop.f32.mrb[72].mxu0  ;;  %v5687_v43 = vadd.f32 %v4025_v1, %v5557_v36  ;;  %v4026_v5 = vpop.f32.mrb[72].mxu1 }
 0x194   : > { %v1487_v63 = vadd.f32 %v4224_v59, %v5463_v3  ;;  %v1478_v38 = vpop.f32.mrb[73].mxu0  ;;  %v2822_v59 = vld [vmem:[%s5552_s14 + $0x50] sm:$0x1] }
 0x195   : > { %v1479_v37 = vadd.f32 %v5451_v44, %v1478_v38  ;;  %v4225_v22 = vpop.f32.mrb[74].mxu0  ;;  %v2776_v44 = vsel %vm5560_vm4, 0, %v2775_v31  ;;  %v2781_v31 = vld [vmem:[%s5552_s14 + $0x6c] sm:$0x1] }
 0x196   : > { %v5690_v10 = vadd.f32 %v5519_v15, %v1487_v63  ;;  %v1490_v40 = vadd.f32 %v4225_v22, %v5468_v49  ;;  %v1481_v29 = vpop.f32.mrb[75].mxu0  ;;  %2777 = vst [vmem:[%s5552_s14 + $0x54] sm:$0x1] %v2776_v44  ;;  %v2773_v49 = vsel %vm5560_vm4, 0, %v2772_v11  ;;  %v4027_v15 = vpop.f32.mrb[73].mxu1 }
 0x197   : > { %v5695_v30 = vadd.f32 %v5510_v61, %v1479_v37  ;;  %v1482_v3 = vadd.f32 %v5454_v60, %v1481_v29  ;;  %2774 = vst [vmem:[%s5552_s14 + $0x48] sm:$0x1] %v2773_v49  ;;  %v4028_v60 = vadd.f32 %v4027_v15, %v4026_v5  ;;  %v4029_v57 = vpop.f32.mrb[74].mxu1  ;;  %v2823_v37 = vsel %vm5568_vm6, 0, %v2822_v59 }
 0x198   : > { %v5702_v36 = vadd.f32 %v5521_v48, %v1490_v40  ;;  %v4030_v21 = vpop.f32.mrb[75].mxu1  ;;  %v2826_v48 = vsel %vm5568_vm6, 0, %v2825_v52  ;;  %2824 = vst [vmem:[%s5552_s14 + $0x50] sm:$0x1] %v2823_v37 }
 0x199   : > { %v5708_v61 = vadd.f32 %v5513_v24, %v1482_v3  ;;  %v5715_v53 = vadd.f32 %v4028_v60, %v5584_v58  ;;  %v4031_v50 = vadd.f32 %v4030_v21, %v4029_v57  ;;  %2827 = vst [vmem:[%s5552_s14 + $0x5c] sm:$0x1] %v2826_v48  ;;  %v2778_v60 = vld [vmem:[%s5552_s14 + $0x60] sm:$0x1]  ;;  %v2831_v21 = vld [vmem:[%s5552_s14 + $0x74] sm:$0x1] }
 0x19a   : > { %v2832_v48 = vsel %vm5568_vm6, 0, %v2831_v21 }
 0x19b   : > { %v4228_v27 = vpop.f32.mrb[76].mxu0  ;;  %6401 = vst [vmem:[#allocation3_spill] sm:$0xff] %v5715_v53  ;;  %v5722_v1 = vadd.f32 %v4031_v50, %v5593_v28  ;;  %v4032_v22 = vpop.f32.mrb[76].mxu1  ;;  %2833 = vst [vmem:[%s5552_s14 + $0x74] sm:$0x1] %v2832_v48 }
 0x19c   : > { %v1503_v62 = vadd.f32 %v4228_v27, %v5491_v25  ;;  %v1494_v39 = vpop.f32.mrb[77].mxu0  ;;  %v4033_v40 = vpop.f32.mrb[77].mxu1 }
 0x19d   : > { %v1495_v24 = vadd.f32 %v5478_v51, %v1494_v39  ;;  %v4229_v18 = vpop.f32.mrb[78].mxu0  ;;  %6402 = vst [vmem:[#allocation4_spill] sm:$0xff] %v5722_v1  ;;  %v4035_v29 = vpop.f32.mrb[78].mxu1 }
 0x19e   : > { %v5725_v63 = vadd.f32 %v5535_v41, %v1503_v62  ;;  %v1506_v38 = vadd.f32 %v4229_v18, %v5495_v34  ;;  %v1497_v58 = vpop.f32.mrb[79].mxu0  ;;  %v4034_v34 = vadd.f32 %v4033_v40, %v4032_v22  ;;  %v4036_v3 = vpop.f32.mrb[79].mxu1  ;;  %v2828_v62 = vld [vmem:[%s5552_s14 + $0x68] sm:$0x1] }
 0x19f   : > { %v5731_v25 = vadd.f32 %v5527_v14, %v1495_v24  ;;  %v1498_v51 = vadd.f32 %v5482_v20, %v1497_v58  ;;  %v2782_v20 = vsel %vm5560_vm4, 0, %v2781_v31  ;;  %v2787_v31 = vld [vmem:[%s5552_s14 + $0x84] sm:$0x1] }
 0x1a0   : > { %v5736_v28 = vadd.f32 %v5537_v46, %v1506_v38  ;;  %v5745_v44 = vadd.f32 %v4034_v34, %v5605_v47  ;;  %v4037_v46 = vadd.f32 %v4036_v3, %v4035_v29  ;;  %2783 = vst [vmem:[%s5552_s14 + $0x6c] sm:$0x1] %v2782_v20  ;;  %v2779_v47 = vsel %vm5560_vm4, 0, %v2778_v60  ;;  %v2784_v3 = vld [vmem:[%s5552_s14 + $0x78] sm:$0x1] }
 0x1a1   : > { %v5739_v41 = vadd.f32 %v5529_v33, %v1498_v51  ;;  %2780 = vst [vmem:[%s5552_s14 + $0x60] sm:$0x1] %v2779_v47  ;;  %v2785_v20 = vsel %vm5560_vm4, 0, %v2784_v3  ;;  %v2793_v47 = vld [vmem:[%s5552_s14 + $0x9c] sm:$0x1] }
 0x1a2   : > { %6403 = vst [vmem:[#allocation5_spill] sm:$0xff] %v5745_v44  ;;  %v5749_v49 = vadd.f32 %v4037_v46, %v5611_v19  ;;  %2786 = vst [vmem:[%s5552_s14 + $0x78] sm:$0x1] %v2785_v20  ;;  %v2794_v48 = vsel %vm5560_vm4, 0, %v2793_v47  ;;  %v2849_v47 = vld [vmem:[%s5552_s14 + $0xbc] sm:$0x1] }
 0x1a3   : > { %v4078_v14 = vpop.f32.mrb[80].mxu0  ;;  %2795 = vst [vmem:[%s5552_s14 + $0x9c] sm:$0x1] %v2794_v48 }
 0x1a4   : > { %v4079_v11 = vpop.f32.mrb[81].mxu0  ;;  %6404 = vst [vmem:[#allocation6_spill] sm:$0xff] %v5749_v49 }
 0x1a5   : > { %v4080_v33 = vadd.f32 %v4079_v11, %v4078_v14  ;;  %v4081_v5 = vpop.f32.mrb[82].mxu0 }
 0x1a6   : > { %v4082_v15 = vpop.f32.mrb[83].mxu0 }
 0x1a7   : > { %v4083_v57 = vadd.f32 %v4082_v15, %v4081_v5  ;;  %v5753_v52 = vadd.f32 %v4080_v33, %v5630_v4  ;;  %v2829_v4 = vsel %vm5568_vm6, 0, %v2828_v62  ;;  %v2837_v5 = vld [vmem:[%s5552_s14 + $0x8c] sm:$0x1] }
 0x1a8   : > { %2830 = vst [vmem:[%s5552_s14 + $0x68] sm:$0x1] %v2829_v4 }
 0x1a9   : > { %v5760_v27 = vadd.f32 %v4083_v57, %v5641_v35  ;;  %v2834_v57 = vld [vmem:[%s5552_s14 + $0x80] sm:$0x1] }
 0x1aa   : > { %v2835_v21 = vsel %vm5568_vm6, 0, %v2834_v57  ;;  %v2796_v57 = vld [vmem:[%s5552_s14 + $0xa8] sm:$0x1] }
 0x1ab   : > { %v4084_v19 = vpop.f32.mrb[84].mxu0  ;;  %2836 = vst [vmem:[%s5552_s14 + $0x80] sm:$0x1] %v2835_v21  ;;  %v2797_v48 = vsel %vm5560_vm4, 0, %v2796_v57 }
 0x1ac   : > { %v4085_v50 = vpop.f32.mrb[85].mxu0  ;;  %2798 = vst [vmem:[%s5552_s14 + $0xa8] sm:$0x1] %v2797_v48 }
 0x1ad   : > { %v4086_v39 = vadd.f32 %v4085_v50, %v4084_v19  ;;  %v4087_v24 = vpop.f32.mrb[86].mxu0 }
 0x1ae   : > { %v4088_v18 = vpop.f32.mrb[87].mxu0 }
 0x1af   : > { %v4089_v59 = vadd.f32 %v4088_v18, %v4087_v24  ;;  %v5770_v35 = vadd.f32 %v4086_v39, %v5623_v45  ;;  %v2788_v45 = vsel %vm5560_vm4, 0, %v2787_v31  ;;  %v2843_v31 = vld [vmem:[%s5552_s14 + $0xa4] sm:$0x1] }
 0x1b0   : > { %2789 = vst [vmem:[%s5552_s14 + $0x84] sm:$0x1] %v2788_v45 }
 0x1b1   : > { %v5773_v38 = vadd.f32 %v4089_v59, %v5637_v55 }
 0x1b3   : > { %v4090_v58 = vpop.f32.mrb[88].mxu0 }
 0x1b4   : > { %v4091_v37 = vpop.f32.mrb[89].mxu0 }
 0x1b5   : > { %v4092_v51 = vadd.f32 %v4091_v37, %v4090_v58  ;;  %v4093_v22 = vpop.f32.mrb[90].mxu0  ;;  %v2790_v58 = vld [vmem:[%s5552_s14 + $0x90] sm:$0x1] }
 0x1b6   : > { %v4094_v40 = vpop.f32.mrb[91].mxu0  ;;  %v2791_v37 = vsel %vm5560_vm4, 0, %v2790_v58 }
 0x1b7   : > { %v4095_v34 = vadd.f32 %v4094_v40, %v4093_v22  ;;  %v5776_v29 = vadd.f32 %v4092_v51, %v5667_v13  ;;  %2792 = vst [vmem:[%s5552_s14 + $0x90] sm:$0x1] %v2791_v37 }
 0x1b9   : > { %v5782_v55 = vadd.f32 %v4095_v34, %v5675_v7  ;;  %v2838_v7 = vsel %vm5568_vm6, 0, %v2837_v5 }
 0x1ba   : > { %2839 = vst [vmem:[%s5552_s14 + $0x8c] sm:$0x1] %v2838_v7 }
 0x1bb   : > { %v4096_v14 = vpop.f32.mrb[92].mxu0 }
 0x1bc   : > { %v4097_v46 = vpop.f32.mrb[93].mxu0 }
 0x1bd   : > { %v4098_v13 = vadd.f32 %v4097_v46, %v4096_v14  ;;  %v4099_v11 = vpop.f32.mrb[94].mxu0  ;;  %v2840_v14 = vld [vmem:[%s5552_s14 + $0x98] sm:$0x1] }
 0x1be   : > { %v4100_v33 = vpop.f32.mrb[95].mxu0  ;;  %v2841_v20 = vsel %vm5568_vm6, 0, %v2840_v14  ;;  %v5865_v14 = vld [vmem:[%s6385_s4] ss:$0 sm:$0xff] }
 0x1bf   : > { %v4101_v15 = vadd.f32 %v4100_v33, %v4099_v11  ;;  %v5791_v60 = vadd.f32 %v4098_v13, %v5660_v54  ;;  %2842 = vst [vmem:[%s5552_s14 + $0x98] sm:$0x1] %v2841_v20  ;;  %v2799_v33 = vld [vmem:[%s5552_s14 + $0xb4] sm:$0x1] }
 0x1c1   : > { %v5803_v19 = vadd.f32 %v4101_v15, %v5672_v6  ;;  %v2800_v15 = vsel %vm5560_vm4, 0, %v2799_v33 }
 0x1c2   : > { %2801 = vst [vmem:[%s5552_s14 + $0xb4] sm:$0x1] %v2800_v15 }
 0x1c3   : > { %v4102_v54 = vpop.f32.mrb[96].mxu0 }
 0x1c4   : > { %v4103_v50 = vpop.f32.mrb[97].mxu0 }
 0x1c5   : > { %v4104_v62 = vadd.f32 %v4103_v50, %v4102_v54  ;;  %v4105_v39 = vpop.f32.mrb[98].mxu0  ;;  %v2850_v54 = vsel %vm5568_vm6, 0, %v2849_v47  ;;  %v2846_v50 = vld [vmem:[%s5552_s14 + $0xb0] sm:$0x1] }
 0x1c6   : > { %v4106_v24 = vpop.f32.mrb[99].mxu0  ;;  %2851 = vst [vmem:[%s5552_s14 + $0xbc] sm:$0x1] %v2850_v54 }
 0x1c7   : > { %v4107_v4 = vadd.f32 %v4106_v24, %v4105_v39  ;;  %v5808_v18 = vadd.f32 %v4104_v62, %v5695_v30  ;;  %v2847_v62 = vsel %vm5568_vm6, 0, %v2846_v50 }
 0x1c8   : > { %2848 = vst [vmem:[%s5552_s14 + $0xb0] sm:$0x1] %v2847_v62 }
 0x1c9   : > { %v5811_v59 = vadd.f32 %v4107_v4, %v5708_v61  ;;  %v2844_v61 = vsel %vm5568_vm6, 0, %v2843_v31 }
 0x1ca   : > { %2845 = vst [vmem:[%s5552_s14 + $0xa4] sm:$0x1] %v2844_v61 }
 0x1cb   : > { %v4108_v6 = vpop.f32.mrb[100].mxu0 }
 0x1cc   : > { %v4109_v51 = vpop.f32.mrb[101].mxu0 }
 0x1cd   : > { %v4110_v22 = vadd.f32 %v4109_v51, %v4108_v6  ;;  %v4111_v40 = vpop.f32.mrb[102].mxu0 }
 0x1ce   : > { %v4112_v34 = vpop.f32.mrb[103].mxu0 }
 0x1cf   : > { %v4113_v45 = vadd.f32 %v4112_v34, %v4111_v40  ;;  %v5819_v30 = vadd.f32 %v4110_v22, %v5690_v10 }
 0x1d1   : > { %v5825_v3 = vadd.f32 %v4113_v45, %v5702_v36 }
 0x1d3   : > { %v4114_v46 = vpop.f32.mrb[104].mxu0 }
 0x1d4   : > { %v4115_v10 = vpop.f32.mrb[105].mxu0 }
 0x1d5   : > { %v4116_v13 = vadd.f32 %v4115_v10, %v4114_v46  ;;  %v4117_v11 = vpop.f32.mrb[106].mxu0 }
 0x1d6   : > { %v4118_v5 = vpop.f32.mrb[107].mxu0 }
 0x1d7   : > { %v4119_v36 = vadd.f32 %v4118_v5, %v4117_v11  ;;  %v5835_v7 = vadd.f32 %v4116_v13, %v5731_v25  ;;  %v5877_v5 = vld [vmem:[%s6386_s5] ss:$0 sm:$0xff] }
 0x1d9   : > { %v5841_v21 = vadd.f32 %v4119_v36, %v5739_v41 }
 0x1db   : > { %v4120_v25 = vpop.f32.mrb[108].mxu0 }
 0x1dc   : > { %v4121_v39 = vpop.f32.mrb[109].mxu0 }
 0x1dd   : > { %v4122_v24 = vadd.f32 %v4121_v39, %v4120_v25  ;;  %v4123_v4 = vpop.f32.mrb[110].mxu0 }
 0x1de   : > { %v4124_v58 = vpop.f32.mrb[111].mxu0 }
 0x1df   : > { %v4125_v41 = vadd.f32 %v4124_v58, %v4123_v4  ;;  %v5854_v6 = vadd.f32 %v4122_v24, %v5725_v63 }
 0x1e1   : > { %v5857_v37 = vadd.f32 %v4125_v41, %v5736_v28 }
 0x1e3   : > { %v4126_v51 = vpop.f32.mrb[112].mxu0  ;;  %v4312_v61 = vpop.f32.mrb[80].mxu1 }
 0x1e4   : > { %v4127_v22 = vpop.f32.mrb[113].mxu0  ;;  %v4361_v63 = vadd.f32 %v5770_v35, %v4312_v61  ;;  %v2427_v20 = vpop.f32.mrb[81].mxu1 }
 0x1e5   : > { %v4128_v40 = vadd.f32 %v4127_v22, %v4126_v51  ;;  %v4129_v34 = vpop.f32.mrb[114].mxu0  ;;  %v4365_v46 = vadd.f32 %v5753_v52, %v2427_v20  ;;  %v4313_v10 = vpop.f32.mrb[82].mxu1 }
 0x1e6   : > { %v4130_v31 = vpop.f32.mrb[115].mxu0  ;;  %v2595_v13 = vadd.f32 %v4361_v63, %v5865_v14  ;;  %v2430_v11 = vpop.f32.mrb[83].mxu1 }
 0x1e7   : > { %v4131_v8 = vadd.f32 %v4130_v31, %v4129_v34  ;;  %v5860_v45 = vadd.f32 %v5544_v32, %v4128_v40  ;;  %v4369_v32 = vadd.f32 %v5773_v38, %v4313_v10  ;;  %v2593_v35 = vadd.f32 %v4365_v46, %v5865_v14  ;;  %v5885_v38 = vld [vmem:[%s6387_s6] ss:$0 sm:$0xff] }
 0x1e8   : > { %v4373_v15 = vadd.f32 %v5760_v27, %v2430_v11  ;;  %v2627_v36 = vmax.f32 %v2595_v13, 0.0 }
 0x1e9   : > { %v5869_v28 = vadd.f32 %v5555_v17, %v4131_v8  ;;  %v2596_v52 = vadd.f32 %v4369_v32, %v5865_v14  ;;  %v2625_v48 = vmax.f32 %v2593_v35, 0.0 }
 0x1ea   : > { %v2594_v54 = vadd.f32 %v4373_v15, %v5865_v14  ;;  %v2666_v62 = vmul.f32 %v5877_v5, %v2627_v36 }
 0x1eb   : > { %v4132_v33 = vpop.f32.mrb[116].mxu0  ;;  %v2628_v25 = vmax.f32 %v2596_v52, 0.0  ;;  %v2664_v24 = vmul.f32 %v5877_v5, %v2625_v48  ;;  %v4316_v58 = vpop.f32.mrb[84].mxu1 }
 0x1ec   : > { %v4133_v17 = vpop.f32.mrb[117].mxu0  ;;  %v2626_v4 = vmax.f32 %v2594_v54, 0.0  ;;  %v2705_v41 = vadd.f32 %v5885_v38, %v2666_v62  ;;  %v4377_v22 = vadd.f32 %v5791_v60, %v4316_v58  ;;  %v2443_v40 = vpop.f32.mrb[85].mxu1 }
 0x1ed   : > { %v4134_v57 = vadd.f32 %v4133_v17, %v4132_v33  ;;  %v4135_v47 = vpop.f32.mrb[118].mxu0  ;;  %v2667_v51 = vmul.f32 %v5877_v5, %v2628_v25  ;;  %v2703_v31 = vadd.f32 %v5885_v38, %v2664_v24  ;;  %v4381_v8 = vadd.f32 %v5776_v29, %v2443_v40  ;;  %v4317_v61 = vpop.f32.mrb[86].mxu1  ;;  %v3263_v24 = vld [vmem:[%s5552_s14 + $0xc] sm:$0xf] }
 0x1ee   : > { %v4136_v50 = vpop.f32.mrb[119].mxu0  ;;  %v3760_v63 = vpack.c.bf16 %v2705_v41, %v2705_v41  ;;  %v2599_v46 = vadd.f32 %v4377_v22, %v5865_v14  ;;  %v5905_v10 = vadd.f32 %v5803_v19, %v4317_v61  ;;  %v2446_v60 = vpop.f32.mrb[87].mxu1 }
 0x1ef   : > { %v4137_v39 = vadd.f32 %v4136_v50, %v4135_v47  ;;  %v5890_v27 = vadd.f32 %v5578_v23, %v4134_v57  ;;  %v2665_v23 = vmul.f32 %v5877_v5, %v2626_v4  ;;  %v2706_v20 = vadd.f32 %v5885_v38, %v2667_v51 }
 0x1f0   : > { %v2597_v11 = vadd.f32 %v4381_v8, %v5865_v14  ;;  %v5912_v33 = vadd.f32 %v5782_v55, %v2446_v60  ;;  %v2952_v35 = vshrl.u32 %v3760_v63, 16  ;;  %v2955_v15 = vshll.u32 %v3760_v63, 16 }
 0x1f1   : > { %v5897_v34 = vadd.f32 %v5590_v16, %v4137_v39  ;;  %v3758_v16 = vpack.c.bf16 %v2703_v31, %v2703_v31  ;;  %v2704_v32 = vadd.f32 %v5885_v38, %v2665_v23  ;;  %v3761_v17 = vpack.c.bf16 %v2706_v20, %v2706_v20  ;;  %v3256_v23 = vld [vmem:[%s5552_s14] sm:$0xf] }
 0x1f2   : > { %v2631_v36 = vmax.f32 %v2599_v46, 0.0  ;;  %v2629_v48 = vmax.f32 %v2597_v11, 0.0  ;;  %v2954_v50 = vrot.slane %v2952_v35, 7 }
 0x1f3   : > { %v5907_v13 = vpop.f32.mrb[120].mxu0  ;;  %v2935_v52 = vshrl.u32 %v3758_v16, 16  ;;  %v2938_v57 = vshll.u32 %v3758_v16, 16  ;;  %v3759_v47 = vpack.c.bf16 %v2704_v32, %v2704_v32  ;;  %v2960_v62 = vshrl.u32 %v3761_v17, 16  ;;  %v4320_v22 = vpop.f32.mrb[88].mxu1 }
 0x1f4   : > { %v5914_v29 = vpop.f32.mrb[121].mxu0  ;;  %v2963_v55 = vshll.u32 %v3761_v17, 16  ;;  %v2670_v25 = vmul.f32 %v5877_v5, %v2631_v36  ;;  %v2668_v51 = vmul.f32 %v5877_v5, %v2629_v48  ;;  %v2957_v40 = vor.u32 %v2955_v15, %v2954_v50  ;;  %v2459_v63 = vpop.f32.mrb[89].mxu1  ;;  %v3267_v16 = vld [vmem:[%s5552_s14 + $0x14] sm:$0x1] }
 0x1f5   : > { %v5916_v19 = vpop.f32.mrb[122].mxu0  ;;  %v2937_v4 = vrot.slane %v2935_v52, 7  ;;  %v2943_v58 = vshrl.u32 %v3759_v47, 16  ;;  %v2946_v41 = vshll.u32 %v3759_v47, 16  ;;  %v2958_v31 = vrot.slane %v2954_v50, 4  ;;  %v4321_v35 = vpop.f32.mrb[90].mxu1 }
 0x1f6   : > { %v5918_v54 = vpop.f32.mrb[123].mxu0  ;;  %v2962_v8 = vrot.slane %v2960_v62, 7  ;;  %v2709_v61 = vadd.f32 %v5885_v38, %v2670_v25  ;;  %v2707_v11 = vadd.f32 %v5885_v38, %v2668_v51  ;;  %v3264_v15 = vsel %vm5923_vm9, %v2957_v40, %v3263_v24  ;;  %v3260_v52 = vld [vmem:[%s5552_s14 + $0x8] sm:$0x1]  ;;  %v2462_v47 = vpop.f32.mrb[91].mxu1 }
 0x1f7   : > { %v2940_v20 = vor.u32 %v2938_v57, %v2937_v4  ;;  %v2941_v46 = vrot.slane %v2937_v4, 4  ;;  %v2945_v32 = vrot.slane %v2943_v58, 7  ;;  %3265 = vst [vmem:[%s5552_s14 + $0xc] sm:$0xf] %v3264_v15  ;;  %v3277_v15 = vld [vmem:[%s5552_s14 + $0x24] sm:$0xf] }
 0x1f8   : > { %v2965_v17 = vor.u32 %v2963_v55, %v2962_v8  ;;  %v2967_v36 = vrot.slane %v2962_v8, 4  ;;  %v3764_v57 = vpack.c.bf16 %v2709_v61, %v2709_v61  ;;  %v3762_v4 = vpack.c.bf16 %v2707_v11, %v2707_v11 }
 0x1f9   : > { %v3257_v50 = vsel %vm5923_vm9, %v2940_v20, %v3256_v23  ;;  %v2948_v62 = vor.u32 %v2946_v41, %v2945_v32  ;;  %v2950_v25 = vrot.slane %v2945_v32, 4  ;;  %v2600_v32 = vadd.f32 %v5905_v10, %v5865_v14 }
 0x1fa   : > { %3258 = vst [vmem:[%s5552_s14] sm:$0xf] %v3257_v50  ;;  %v2966_v55 = vsel %vm5933_vm10, %v2958_v31, %v2965_v17  ;;  %v3268_v24 = vsel %vm5560_vm4, %v2967_v36, %v3267_v16  ;;  %v2986_v51 = vshrl.u32 %v3764_v57, 16  ;;  %v2989_v40 = vshll.u32 %v3764_v57, 16 }
 0x1fb   : > { %v5942_v48 = vpop.f32.mrb[124].mxu0  ;;  %3266 = vst [vmem:[%s5552_s14 + $0x10] sm:$0xf] %v2966_v55  ;;  %3269 = vst [vmem:[%s5552_s14 + $0x14] sm:$0x1] %v3268_v24  ;;  %v2949_v41 = vsel %vm5933_vm10, %v2941_v46, %v2948_v62  ;;  %v3261_v23 = vsel %vm5560_vm4, %v2950_v25, %v3260_v52  ;;  %v2969_v61 = vshrl.u32 %v3762_v4, 16  ;;  %v2598_v11 = vadd.f32 %v5912_v33, %v5865_v14 }
 0x1fc   : > { %v4145_v58 = vpop.f32.mrb[125].mxu0  ;;  %v2972_v20 = vshll.u32 %v3762_v4, 16  ;;  %3259 = vst [vmem:[%s5552_s14 + $0x4] sm:$0xf] %v2949_v41  ;;  %3262 = vst [vmem:[%s5552_s14 + $0x8] sm:$0x1] %v3261_v23  ;;  %v4393_v46 = vadd.f32 %v5819_v30, %v4320_v22  ;;  %v5976_v36 = vadd.f32 %v5914_v29, %v5907_v13  ;;  %v4397_v52 = vadd.f32 %v5808_v18, %v2459_v63 }
 0x1fd   : > { %v5952_v8 = vpop.f32.mrb[126].mxu0  ;;  %v5964_v16 = vrot.slane %v2986_v51, 7  ;;  %v5972_v17 = vrot.slane %v2969_v61, 7  ;;  %v4401_v57 = vadd.f32 %v5825_v3, %v4321_v35  ;;  %v4324_v50 = vpop.f32.mrb[92].mxu1  ;;  %v3270_v33 = vld [vmem:[%s5552_s14 + $0x18] sm:$0xf] }
 0x1fe   : > { %v5960_v31 = vpop.f32.mrb[127].mxu0  ;;  %v2632_v25 = vmax.f32 %v2600_v32, 0.0  ;;  %v2630_v30 = vmax.f32 %v2598_v11, 0.0  ;;  %v2475_v22 = vpop.f32.mrb[93].mxu1  ;;  %v2603_v13 = vadd.f32 %v4393_v46, %v5865_v14  ;;  %v2601_v18 = vadd.f32 %v4397_v52, %v5865_v14 }
 0x1ff   : > { %v2991_v62 = vor.u32 %v2989_v40, %v5964_v16  ;;  %v2974_v4 = vor.u32 %v2972_v20, %v5972_v17  ;;  %v5987_v3 = vpop.f32.mrb[94].mxu1  ;;  %v2604_v24 = vadd.f32 %v4401_v57, %v5865_v14  ;;  %v6003_v20 = vadd.f32 %v5918_v54, %v5916_v19 }
 0x200   : > { %v2671_v63 = vmul.f32 %v5877_v5, %v2632_v25  ;;  %v2669_v35 = vmul.f32 %v5877_v5, %v2630_v30  ;;  %v5994_v51 = vpop.f32.mrb[95].mxu1  ;;  %v2635_v23 = vmax.f32 %v2603_v13, 0.0  ;;  %v2633_v61 = vmax.f32 %v2601_v18, 0.0 }
 0x201   : > { %v3278_v29 = vsel %vm5923_vm9, %v2991_v62, %v3277_v15  ;;  %v3271_v41 = vsel %vm5923_vm9, %v2974_v4, %v3270_v33  ;;  %v2636_v15 = vmax.f32 %v2604_v24, 0.0  ;;  %v4405_v52 = vadd.f32 %v5811_v59, %v2462_v47 }
 0x202   : > { %3279 = vst [vmem:[%s5552_s14 + $0x24] sm:$0xf] %v3278_v29  ;;  %3272 = vst [vmem:[%s5552_s14 + $0x18] sm:$0xf] %v3271_v41  ;;  %v2710_v11 = vadd.f32 %v5885_v38, %v2671_v63  ;;  %v2708_v46 = vadd.f32 %v5885_v38, %v2669_v35  ;;  %v2674_v62 = vmul.f32 %v5877_v5, %v2635_v23  ;;  %v3281_v41 = vld [vmem:[%s5552_s14 + $0x2c] sm:$0x1] }
 0x203   : > { %v5996_v40 = vpop.f32.mrb[128].mxu0  ;;  %v2672_v33 = vmul.f32 %v5877_v5, %v2633_v61  ;;  %v4409_v25 = vadd.f32 %v5854_v6, %v4324_v50  ;;  %v6017_v19 = vadd.f32 %v4145_v58, %v5942_v48  ;;  %v2675_v13 = vmul.f32 %v5877_v5, %v2636_v15  ;;  %v6027_v48 = vpop.f32.mrb[0].mxu1  ;;  %v3274_v23 = vld [vmem:[%s5552_s14 + $0x20] sm:$0x1] }
 0x204   : > { %v6005_v32 = vpop.f32.mrb[129].mxu0  ;;  %v3765_v30 = vpack.c.bf16 %v2710_v11, %v2710_v11  ;;  %v3763_v4 = vpack.c.bf16 %v2708_v46, %v2708_v46  ;;  %v2602_v59 = vadd.f32 %v4405_v52, %v5865_v14  ;;  %v2713_v47 = vadd.f32 %v5885_v38, %v2674_v62  ;;  %v6029_v24 = vpop.f32.mrb[1].mxu1 }
 0x205   : > { %v6011_v57 = vpop.f32.mrb[130].mxu0  ;;  %v2711_v18 = vadd.f32 %v5885_v38, %v2672_v33  ;;  %v2607_v29 = vadd.f32 %v4409_v25, %v5865_v14  ;;  %v4413_v6 = vadd.f32 %v5835_v7, %v2475_v22  ;;  %v2714_v46 = vadd.f32 %v5885_v38, %v2675_v13  ;;  %v6034_v52 = vpop.f32.mrb[2].mxu1 }
 0x206   : > { %v6019_v54 = vpop.f32.mrb[131].mxu0  ;;  %v2994_v58 = vshrl.u32 %v3765_v30, 16  ;;  %v2997_v50 = vshll.u32 %v3765_v30, 16  ;;  %v2977_v63 = vshrl.u32 %v3763_v4, 16  ;;  %v2980_v35 = vshll.u32 %v3763_v4, 16  ;;  %v6037_v25 = vpop.f32.mrb[3].mxu1 }
 0x207   : > { %v3768_v61 = vpack.c.bf16 %v2713_v47, %v2713_v47  ;;  %v3766_v11 = vpack.c.bf16 %v2711_v18, %v2711_v18  ;;  %v2634_v15 = vmax.f32 %v2602_v59, 0.0  ;;  %v2639_v7 = vmax.f32 %v2607_v29, 0.0 }
 0x208   : > { %v2996_v62 = vrot.slane %v2994_v58, 7  ;;  %v2979_v33 = vrot.slane %v2977_v63, 7  ;;  %v2605_v22 = vadd.f32 %v4413_v6, %v5865_v14  ;;  %v6409_v1 = vrot.slane %v5964_v16, 4 }
 0x209   : > { %v3020_v4 = vshrl.u32 %v3768_v61, 16  ;;  %v3023_v55 = vshll.u32 %v3768_v61, 16  ;;  %v3003_v10 = vshrl.u32 %v3766_v11, 16  ;;  %v3006_v49 = vshll.u32 %v3766_v11, 16 }
 0x20a   : > { %v2999_v13 = vor.u32 %v2997_v50, %v2996_v62  ;;  %v3001_v59 = vrot.slane %v2996_v62, 4  ;;  %v2982_v18 = vor.u32 %v2980_v35, %v2979_v33  ;;  %v2984_v29 = vrot.slane %v2979_v33, 4 }
 0x20b   : > { %v6039_v30 = vpop.f32.mrb[132].mxu0  ;;  %v3022_v58 = vrot.slane %v3020_v4, 7  ;;  %v6045_v63 = vrot.slane %v3003_v10, 7  ;;  %v3769_v61 = vpack.c.bf16 %v2714_v46, %v2714_v46  ;;  %v2673_v11 = vmul.f32 %v5877_v5, %v2634_v15  ;;  %v3291_v46 = vld [vmem:[%s5552_s14 + $0x3c] sm:$0xf]  ;;  %v6070_v4 = vpop.f32.mrb[4].mxu1 }
 0x20c   : > { %v6041_v47 = vpop.f32.mrb[133].mxu0  ;;  %v3000_v50 = vsel %vm5933_vm10, %v6409_v1, %v2999_v13  ;;  %v3282_v35 = vsel %vm5560_vm4, %v3001_v59, %v3281_v41  ;;  %v6410_v62 = vrot.slane %v5972_v17, 4  ;;  %v3275_v10 = vsel %vm5560_vm4, %v2984_v29, %v3274_v23  ;;  %v3284_v15 = vld [vmem:[%s5552_s14 + $0x30] sm:$0xf]  ;;  %v6074_v29 = vpop.f32.mrb[5].mxu1 }
 0x20d   : > { %v6043_v6 = vpop.f32.mrb[134].mxu0  ;;  %3280 = vst [vmem:[%s5552_s14 + $0x28] sm:$0xf] %v3000_v50  ;;  %3283 = vst [vmem:[%s5552_s14 + $0x2c] sm:$0x1] %v3282_v35  ;;  %v3025_v16 = vor.u32 %v3023_v55, %v3022_v58  ;;  %v3026_v1 = vrot.slane %v3022_v58, 4  ;;  %v3008_v41 = vor.u32 %v3006_v49, %v6045_v63  ;;  %v2712_v23 = vadd.f32 %v5885_v38, %v2673_v11 }
 0x20e   : > { %v6048_v44 = vpop.f32.mrb[135].mxu0  ;;  %v2983_v33 = vsel %vm5933_vm10, %v6410_v62, %v2982_v18  ;;  %3276 = vst [vmem:[%s5552_s14 + $0x20] sm:$0x1] %v3275_v10  ;;  %v3009_v17 = vrot.slane %v6045_v63, 4  ;;  %v3028_v13 = vshrl.u32 %v3769_v61, 16  ;;  %v3031_v59 = vshll.u32 %v3769_v61, 16 }
 0x20f   : > { %3273 = vst [vmem:[%s5552_s14 + $0x1c] sm:$0xf] %v2983_v33  ;;  %v2678_v18 = vmul.f32 %v5877_v5, %v2639_v7  ;;  %v3292_v55 = vsel %vm5923_vm9, %v3025_v16, %v3291_v46  ;;  %v3285_v58 = vsel %vm5923_vm9, %v3008_v41, %v3284_v15  ;;  %v2637_v49 = vmax.f32 %v2605_v22, 0.0  ;;  %v6082_v50 = vpop.f32.mrb[6].mxu1  ;;  %v3295_v22 = vld [vmem:[%s5552_s14 + $0x44] sm:$0x1] }
 0x210   : > { %v4417_v63 = vadd.f32 %v5857_v37, %v5987_v3  ;;  %3293 = vst [vmem:[%s5552_s14 + $0x3c] sm:$0xf] %v3292_v55  ;;  %3286 = vst [vmem:[%s5552_s14 + $0x30] sm:$0xf] %v3285_v58  ;;  %v3030_v61 = vrot.slane %v3028_v13, 7  ;;  %v3767_v11 = vpack.c.bf16 %v2712_v23, %v2712_v23  ;;  %v6089_v35 = vadd.f32 %v5960_v31, %v5952_v8  ;;  %v6091_v62 = vpop.f32.mrb[7].mxu1 }
 0x211   : > { %v2717_v7 = vadd.f32 %v5885_v38, %v2678_v18  ;;  %v2676_v10 = vmul.f32 %v5877_v5, %v2637_v49  ;;  %v4421_v3 = vadd.f32 %v5841_v21, %v5994_v51  ;;  %v4424_v46 = vadd.f32 %v5890_v27, %v6027_v48  ;;  %v3288_v49 = vld [vmem:[%s5552_s14 + $0x38] sm:$0x1] }
 0x212   : > { %v2608_v37 = vadd.f32 %v4417_v63, %v5865_v14  ;;  %v3033_v8 = vor.u32 %v3031_v59, %v3030_v61  ;;  %v3035_v31 = vrot.slane %v3030_v61, 4  ;;  %v3011_v16 = vshrl.u32 %v3767_v11, 16 }
 0x213   : > { %v6093_v33 = vpop.f32.mrb[136].mxu0  ;;  %v3014_v41 = vshll.u32 %v3767_v11, 16  ;;  %v3772_v23 = vpack.c.bf16 %v2717_v7, %v2717_v7  ;;  %v2715_v18 = vadd.f32 %v5885_v38, %v2676_v10  ;;  %v2606_v21 = vadd.f32 %v4421_v3, %v5865_v14  ;;  %v6119_v10 = vpop.f32.mrb[8].mxu1 }
 0x214   : > { %v6102_v15 = vpop.f32.mrb[137].mxu0  ;;  %v2640_v55 = vmax.f32 %v2608_v37, 0.0  ;;  %v3034_v27 = vsel %vm5933_vm10, %v3026_v1, %v3033_v8  ;;  %v3296_v48 = vsel %vm5560_vm4, %v3035_v31, %v3295_v22  ;;  %v3013_v59 = vrot.slane %v3011_v16, 7  ;;  %v6121_v8 = vpop.f32.mrb[9].mxu1 }
 0x215   : > { %v6104_v13 = vpop.f32.mrb[138].mxu0  ;;  %v2611_v58 = vadd.f32 %v4424_v46, %v5865_v14  ;;  %3294 = vst [vmem:[%s5552_s14 + $0x40] sm:$0xf] %v3034_v27  ;;  %3297 = vst [vmem:[%s5552_s14 + $0x44] sm:$0x1] %v3296_v48  ;;  %v3054_v63 = vshrl.u32 %v3772_v23, 16  ;;  %v3770_v11 = vpack.c.bf16 %v2715_v18, %v2715_v18 }
 0x216   : > { %v6108_v51 = vpop.f32.mrb[139].mxu0  ;;  %v3057_v61 = vshll.u32 %v3772_v23, 16  ;;  %v2679_v7 = vmul.f32 %v5877_v5, %v2640_v55  ;;  %v3016_v37 = vor.u32 %v3014_v41, %v3013_v59  ;;  %v3018_v3 = vrot.slane %v3013_v59, 4  ;;  %v6124_v23 = vpop.f32.mrb[10].mxu1  ;;  %v3305_v55 = vld [vmem:[%s5552_s14 + $0x54] sm:$0xf] }
 0x217   : > { %v2638_v1 = vmax.f32 %v2606_v21, 0.0  ;;  %v2643_v22 = vmax.f32 %v2611_v58, 0.0  ;;  %v3056_v46 = vrot.slane %v3054_v63, 7  ;;  %v3037_v31 = vshrl.u32 %v3770_v11, 16  ;;  %v6133_v59 = vpop.f32.mrb[11].mxu1 }
 0x218   : > { %v3040_v16 = vshll.u32 %v3770_v11, 16  ;;  %v2718_v27 = vadd.f32 %v5885_v38, %v2679_v7  ;;  %v3017_v18 = vsel %vm5933_vm10, %v3009_v17, %v3016_v37  ;;  %v3289_v41 = vsel %vm5560_vm4, %v3018_v3, %v3288_v49  ;;  %6411 = vst [vmem:[#allocation7_spill] sm:$0xff] %v6133_v59  ;;  %v3298_v37 = vld [vmem:[%s5552_s14 + $0x48] sm:$0xf] }
 0x219   : > { %v2677_v21 = vmul.f32 %v5877_v5, %v2638_v1  ;;  %v2682_v48 = vmul.f32 %v5877_v5, %v2643_v22  ;;  %3287 = vst [vmem:[%s5552_s14 + $0x34] sm:$0xf] %v3017_v18  ;;  %3290 = vst [vmem:[%s5552_s14 + $0x38] sm:$0x1] %v3289_v41  ;;  %v3059_v63 = vor.u32 %v3057_v61, %v3056_v46  ;;  %v3060_v11 = vrot.slane %v3056_v46, 4 }
 0x21a   : > { %v3039_v7 = vrot.slane %v3037_v31, 7  ;;  %v3773_v53 = vpack.c.bf16 %v2718_v27, %v2718_v27  ;;  %v6146_v1 = vadd.f32 %v6005_v32, %v5996_v40  ;;  %v4427_v22 = vadd.f32 %v5860_v45, %v6029_v24  ;;  %v3309_v24 = vld [vmem:[%s5552_s14 + $0x5c] sm:$0x1] }
 0x21b   : > { %v6135_v58 = vpop.f32.mrb[140].mxu0  ;;  %v2716_v49 = vadd.f32 %v5885_v38, %v2677_v21  ;;  %v2721_v3 = vadd.f32 %v5885_v38, %v2682_v48  ;;  %v3306_v46 = vsel %vm5923_vm9, %v3059_v63, %v3305_v55  ;;  %v4430_v55 = vadd.f32 %v5897_v34, %v6034_v52  ;;  %v6167_v63 = vpop.f32.mrb[12].mxu1 }
 0x21c   : > { %v6139_v17 = vpop.f32.mrb[141].mxu0  ;;  %v3042_v31 = vor.u32 %v3040_v16, %v3039_v7  ;;  %v3043_v27 = vrot.slane %v3039_v7, 4  ;;  %v3062_v18 = vshrl.u32 %v3773_v53, 16  ;;  %3307 = vst [vmem:[%s5552_s14 + $0x54] sm:$0xf] %v3306_v46  ;;  %v3065_v21 = vshll.u32 %v3773_v53, 16 }
 0x21d   : > { %v6150_v61 = vpop.f32.mrb[142].mxu0  ;;  %v3771_v48 = vpack.c.bf16 %v2716_v49, %v2716_v49  ;;  %v3776_v59 = vpack.c.bf16 %v2721_v3, %v2721_v3  ;;  %v2609_v40 = vadd.f32 %v4427_v22, %v5865_v14  ;;  %v6165_v16 = vadd.f32 %v6019_v54, %v6011_v57  ;;  %v6170_v22 = vpop.f32.mrb[13].mxu1 }
 0x21e   : > { %v6154_v41 = vpop.f32.mrb[143].mxu0  ;;  %v3299_v45 = vsel %vm5923_vm9, %v3042_v31, %v3298_v37  ;;  %v3064_v32 = vrot.slane %v3062_v18, 7  ;;  %v2612_v52 = vadd.f32 %v4430_v55, %v5865_v14  ;;  %v6173_v57 = vpop.f32.mrb[14].mxu1  ;;  %v4433_v18 = vadd.f32 %v5869_v28, %v6037_v25 }
 0x21f   : > { %3300 = vst [vmem:[%s5552_s14 + $0x48] sm:$0xf] %v3299_v45  ;;  %v3045_v53 = vshrl.u32 %v3771_v48, 16  ;;  %v3048_v7 = vshll.u32 %v3771_v48, 16  ;;  %v3088_v49 = vshrl.u32 %v3776_v59, 16  ;;  %v3091_v3 = vshll.u32 %v3776_v59, 16 }
 0x220   : > { %v3067_v37 = vor.u32 %v3065_v21, %v3064_v32  ;;  %v3069_v46 = vrot.slane %v3064_v32, 4  ;;  %v2641_v34 = vmax.f32 %v2609_v40, 0.0  ;;  %v4435_v59 = vadd.f32 %v5614_v0, %v6017_v19  ;;  %v6181_v48 = vpop.f32.mrb[15].mxu1  ;;  %v3302_v45 = vld [vmem:[%s5552_s14 + $0x50] sm:$0x1] }
 0x221   : > { %v3047_v54 = vrot.slane %v3045_v53, 7  ;;  %v6175_v31 = vrot.slane %v3088_v49, 7  ;;  %v3319_v32 = vld [vmem:[%s5552_s14 + $0x6c] sm:$0xf]  ;;  %v2644_v53 = vmax.f32 %v2612_v52, 0.0  ;;  %v2610_v49 = vadd.f32 %v4433_v18, %v5865_v14 }
 0x222   : > { %v3068_v21 = vsel %vm5933_vm10, %v3060_v11, %v3067_v37  ;;  %v3310_v40 = vsel %vm5560_vm4, %v3069_v46, %v3309_v24  ;;  %v2680_v55 = vmul.f32 %v5877_v5, %v2641_v34  ;;  %v4436_v37 = vadd.f32 %v4435_v59, %v6070_v4 }
 0x223   : > { %3308 = vst [vmem:[%s5552_s14 + $0x58] sm:$0xf] %v3068_v21  ;;  %3311 = vst [vmem:[%s5552_s14 + $0x5c] sm:$0x1] %v3310_v40  ;;  %v3050_v28 = vor.u32 %v3048_v7, %v3047_v54  ;;  %v3052_v0 = vrot.slane %v3047_v54, 4  ;;  %v3093_v19 = vor.u32 %v3091_v3, %v6175_v31  ;;  %v3094_v25 = vrot.slane %v6175_v31, 4 }
 0x224   : > { %v2719_v11 = vadd.f32 %v5885_v38, %v2680_v55  ;;  %v2683_v24 = vmul.f32 %v5877_v5, %v2644_v53  ;;  %v4158_v3 = vadd.f32 %v6041_v47, %v6039_v30  ;;  %v2642_v31 = vmax.f32 %v2610_v49, 0.0  ;;  %v6412_v30 = vld [vmem:[#allocation2_spill] sm:$0xff] }
 0x225   : > { %v3051_v46 = vsel %vm5933_vm10, %v3043_v27, %v3050_v28  ;;  %v3303_v34 = vsel %vm5560_vm4, %v3052_v0, %v3302_v45  ;;  %v3320_v7 = vsel %vm5923_vm9, %v3093_v19, %v3319_v32  ;;  %v2615_v4 = vadd.f32 %v4436_v37, %v5865_v14  ;;  %v3312_v28 = vld [vmem:[%s5552_s14 + $0x60] sm:$0xf] }
 0x226   : > { %3301 = vst [vmem:[%s5552_s14 + $0x4c] sm:$0xf] %v3051_v46  ;;  %3304 = vst [vmem:[%s5552_s14 + $0x50] sm:$0x1] %v3303_v34  ;;  %v3774_v52 = vpack.c.bf16 %v2719_v11, %v2719_v11  ;;  %v2722_v54 = vadd.f32 %v5885_v38, %v2683_v24  ;;  %v4438_v27 = vadd.f32 %v5601_v2, %v5976_v36 }
 0x227   : > { %3321 = vst [vmem:[%s5552_s14 + $0x6c] sm:$0xf] %v3320_v7  ;;  %v4441_v18 = vadd.f32 %v5620_v9, %v6089_v35  ;;  %v6217_v59 = vadd.f32 %v6048_v44, %v6043_v6  ;;  %v4444_v47 = vadd.f32 %v6412_v30, %v6003_v20  ;;  %v2681_v32 = vmul.f32 %v5877_v5, %v2642_v31 }
 0x228   : > { %v3071_v21 = vshrl.u32 %v3774_v52, 16  ;;  %v3074_v40 = vshll.u32 %v3774_v52, 16  ;;  %v3777_v45 = vpack.c.bf16 %v2722_v54, %v2722_v54  ;;  %v2647_v55 = vmax.f32 %v2615_v4, 0.0 }
 0x229   : > { %v4439_v53 = vadd.f32 %v4438_v27, %v6074_v29  ;;  %v4442_v2 = vadd.f32 %v4441_v18, %v6082_v50  ;;  %v4445_v9 = vadd.f32 %v4444_v47, %v6091_v62  ;;  %v2720_v6 = vadd.f32 %v5885_v38, %v2681_v32  ;;  %v3323_v62 = vld [vmem:[%s5552_s14 + $0x74] sm:$0x1] }
 0x22a   : > { %v3073_v36 = vrot.slane %v3071_v21, 7  ;;  %v3096_v35 = vshrl.u32 %v3777_v45, 16  ;;  %v3099_v44 = vshll.u32 %v3777_v45, 16  ;;  %v2686_v20 = vmul.f32 %v5877_v5, %v2647_v55  ;;  %v3316_v55 = vld [vmem:[%s5552_s14 + $0x68] sm:$0x1] }
 0x22b   : > { %v2613_v0 = vadd.f32 %v4439_v53, %v5865_v14  ;;  %v2616_v19 = vadd.f32 %v4442_v2, %v5865_v14  ;;  %v2614_v29 = vadd.f32 %v4445_v9, %v5865_v14  ;;  %v3775_v49 = vpack.c.bf16 %v2720_v6, %v2720_v6 }
 0x22c   : > { %v3076_v11 = vor.u32 %v3074_v40, %v3073_v36  ;;  %v3077_v24 = vrot.slane %v3073_v36, 4  ;;  %v3098_v50 = vrot.slane %v3096_v35, 7  ;;  %v2725_v37 = vadd.f32 %v5885_v38, %v2686_v20 }
 0x22d   : > { %v2645_v46 = vmax.f32 %v2613_v0, 0.0  ;;  %v2648_v34 = vmax.f32 %v2616_v19, 0.0  ;;  %v2646_v7 = vmax.f32 %v2614_v29, 0.0  ;;  %v3079_v4 = vshrl.u32 %v3775_v49, 16 }
 0x22e   : > { %v3313_v52 = vsel %vm5923_vm9, %v3076_v11, %v3312_v28  ;;  %v3101_v54 = vor.u32 %v3099_v44, %v3098_v50  ;;  %v3103_v31 = vrot.slane %v3098_v50, 4  ;;  %v3082_v27 = vshll.u32 %v3775_v49, 16  ;;  %v3333_v50 = vld [vmem:[%s5552_s14 + $0x84] sm:$0xf] }
 0x22f   : > { %3314 = vst [vmem:[%s5552_s14 + $0x60] sm:$0xf] %v3313_v52  ;;  %v3780_v18 = vpack.c.bf16 %v2725_v37, %v2725_v37  ;;  %v2684_v30 = vmul.f32 %v5877_v5, %v2645_v46  ;;  %v2687_v47 = vmul.f32 %v5877_v5, %v2648_v34  ;;  %v3081_v45 = vrot.slane %v3079_v4, 7 }
 0x230   : > { %v3102_v21 = vsel %vm5933_vm10, %v3094_v25, %v3101_v54  ;;  %v3324_v40 = vsel %vm5560_vm4, %v3103_v31, %v3323_v62  ;;  %v2685_v32 = vmul.f32 %v5877_v5, %v2646_v7  ;;  %v4447_v6 = vadd.f32 %v5682_v26, %v4158_v3  ;;  %v3326_v31 = vld [vmem:[%s5552_s14 + $0x78] sm:$0xf] }
 0x231   : > { %3322 = vst [vmem:[%s5552_s14 + $0x70] sm:$0xf] %v3102_v21  ;;  %3325 = vst [vmem:[%s5552_s14 + $0x74] sm:$0x1] %v3324_v40  ;;  %v3122_v53 = vshrl.u32 %v3780_v18, 16  ;;  %v3125_v2 = vshll.u32 %v3780_v18, 16  ;;  %v2723_v9 = vadd.f32 %v5885_v38, %v2684_v30  ;;  %v2726_v36 = vadd.f32 %v5885_v38, %v2687_v47 }
 0x232   : > { %v3084_v35 = vor.u32 %v3082_v27, %v3081_v45  ;;  %v3086_v25 = vrot.slane %v3081_v45, 4  ;;  %v2724_v44 = vadd.f32 %v5885_v38, %v2685_v32  ;;  %v4164_v19 = vadd.f32 %v6102_v15, %v6093_v33  ;;  %v3337_v40 = vld [vmem:[%s5552_s14 + $0x8c] sm:$0x1]  ;;  %v3330_v45 = vld [vmem:[%s5552_s14 + $0x80] sm:$0x1] }
 0x233   : > { %v3124_v28 = vrot.slane %v3122_v53, 7  ;;  %v3778_v20 = vpack.c.bf16 %v2723_v9, %v2723_v9  ;;  %v3781_v0 = vpack.c.bf16 %v2726_v36, %v2726_v36  ;;  %v4448_v62 = vadd.f32 %v4447_v6, %v6119_v10 }
 0x234   : > { %v3085_v29 = vsel %vm5933_vm10, %v3077_v24, %v3084_v35  ;;  %v3317_v11 = vsel %vm5560_vm4, %v3086_v25, %v3316_v55  ;;  %v3779_v49 = vpack.c.bf16 %v2724_v44, %v2724_v44  ;;  %v4450_v10 = vadd.f32 %v5645_v56, %v6146_v1 }
 0x235   : > { %3315 = vst [vmem:[%s5552_s14 + $0x64] sm:$0xf] %v3085_v29  ;;  %3318 = vst [vmem:[%s5552_s14 + $0x68] sm:$0x1] %v3317_v11  ;;  %v3127_v26 = vor.u32 %v3125_v2, %v3124_v28  ;;  %v3128_v3 = vrot.slane %v3124_v28, 4  ;;  %v3105_v37 = vshrl.u32 %v3778_v20, 16  ;;  %v2619_v54 = vadd.f32 %v4448_v62, %v5865_v14 }
 0x236   : > { %v3108_v46 = vshll.u32 %v3778_v20, 16  ;;  %v3130_v34 = vshrl.u32 %v3781_v0, 16  ;;  %v3133_v33 = vshll.u32 %v3781_v0, 16  ;;  %v3113_v15 = vshrl.u32 %v3779_v49, 16  ;;  %v6413_v20 = vld [vmem:[#allocation3_spill] sm:$0xff]  ;;  %v6414_v11 = vld [vmem:[#allocation4_spill] sm:$0xff] }
 0x237   : > { %v3116_v24 = vshll.u32 %v3779_v49, 16  ;;  %v3334_v7 = vsel %vm5923_vm9, %v3127_v26, %v3333_v50  ;;  %v3107_v52 = vrot.slane %v3105_v37, 7  ;;  %v4453_v18 = vadd.f32 %v5687_v43, %v6217_v59 }
 0x238   : > { %3335 = vst [vmem:[%s5552_s14 + $0x84] sm:$0xf] %v3334_v7  ;;  %v3132_v4 = vrot.slane %v3130_v34, 7  ;;  %v3115_v27 = vrot.slane %v3113_v15, 7  ;;  %v4167_v30 = vadd.f32 %v6108_v51, %v6104_v13  ;;  %v2651_v32 = vmax.f32 %v2619_v54, 0.0 }
 0x239   : > { %v3110_v47 = vor.u32 %v3108_v46, %v3107_v52  ;;  %v3111_v21 = vrot.slane %v3107_v52, 4  ;;  %v4451_v56 = vadd.f32 %v4450_v10, %v6121_v8  ;;  %v4454_v59 = vadd.f32 %v4453_v18, %v6124_v23  ;;  %v6416_v46 = vld [vmem:[#allocation5_spill] sm:$0xff] }
 0x23a   : > { %v3135_v1 = vor.u32 %v3133_v33, %v3132_v4  ;;  %v3137_v55 = vrot.slane %v3132_v4, 4  ;;  %v3118_v53 = vor.u32 %v3116_v24, %v3115_v27  ;;  %v3120_v2 = vrot.slane %v3115_v27, 4 }
 0x23b   : > { %v3327_v43 = vsel %vm5923_vm9, %v3110_v47, %v3326_v31  ;;  %v2690_v13 = vmul.f32 %v5877_v5, %v2651_v32  ;;  %v2617_v51 = vadd.f32 %v4451_v56, %v5865_v14  ;;  %v2620_v44 = vadd.f32 %v4454_v59, %v5865_v14  ;;  %v3347_v31 = vld [vmem:[%s5552_s14 + $0x9c] sm:$0xf] }
 0x23c   : > { %3328 = vst [vmem:[%s5552_s14 + $0x78] sm:$0xf] %v3327_v43  ;;  %v3136_v9 = vsel %vm5933_vm10, %v3128_v3, %v3135_v1  ;;  %v3338_v8 = vsel %vm5560_vm4, %v3137_v55, %v3337_v40  ;;  %v3119_v36 = vsel %vm5933_vm10, %v3111_v21, %v3118_v53  ;;  %v3331_v35 = vsel %vm5560_vm4, %v3120_v2, %v3330_v45  ;;  %v6415_v3 = vld [vmem:[#allocation7_spill] sm:$0xff]  ;;  %v3340_v2 = vld [vmem:[%s5552_s14 + $0x90] sm:$0xf] }
 0x23d   : > { %3336 = vst [vmem:[%s5552_s14 + $0x88] sm:$0xf] %v3136_v9  ;;  %3339 = vst [vmem:[%s5552_s14 + $0x8c] sm:$0x1] %v3338_v8  ;;  %v2729_v25 = vadd.f32 %v5885_v38, %v2690_v13  ;;  %v2649_v23 = vmax.f32 %v2617_v51, 0.0  ;;  %v4456_v6 = vadd.f32 %v5657_v42, %v6165_v16  ;;  %v4170_v28 = vadd.f32 %v6139_v17, %v6135_v58  ;;  %v6417_v16 = vld [vmem:[#allocation6_spill] sm:$0xff] }
 0x23e   : > { %3329 = vst [vmem:[%s5552_s14 + $0x7c] sm:$0xf] %v3119_v36  ;;  %3332 = vst [vmem:[%s5552_s14 + $0x80] sm:$0x1] %v3331_v35  ;;  %v4462_v0 = vadd.f32 %v6413_v20, %v4164_v19  ;;  %v4173_v29 = vadd.f32 %v6154_v41, %v6150_v61  ;;  %v4468_v50 = vadd.f32 %v6414_v11, %v4167_v30  ;;  %v2652_v26 = vmax.f32 %v2620_v44, 0.0 }
 0x23f   : > { %v3784_v49 = vpack.c.bf16 %v2729_v25, %v2729_v25  ;;  %v2688_v62 = vmul.f32 %v5877_v5, %v2649_v23  ;;  %v4457_v37 = vadd.f32 %v4456_v6, %v6415_v3  ;;  %v4459_v34 = vadd.f32 %v6416_v46, %v4170_v28  ;;  %v3351_v28 = vld [vmem:[%s5552_s14 + $0xa4] sm:$0x1] }
 0x240   : > { %v4463_v42 = vadd.f32 %v4462_v0, %v6170_v22  ;;  %v4465_v58 = vadd.f32 %v6417_v16, %v4173_v29  ;;  %v4469_v17 = vadd.f32 %v4468_v50, %v6181_v48  ;;  %v2691_v41 = vmul.f32 %v5877_v5, %v2652_v26  ;;  %v3344_v16 = vld [vmem:[%s5552_s14 + $0x98] sm:$0x1] }
 0x241   : > { %v3156_v19 = vshrl.u32 %v3784_v49, 16  ;;  %v3159_v33 = vshll.u32 %v3784_v49, 16  ;;  %v2727_v61 = vadd.f32 %v5885_v38, %v2688_v62  ;;  %v2618_v15 = vadd.f32 %v4457_v37, %v5865_v14 }
 0x242   : > { %v4460_v24 = vadd.f32 %v4459_v34, %v6167_v63  ;;  %v2621_v7 = vadd.f32 %v4463_v42, %v5865_v14  ;;  %v4466_v52 = vadd.f32 %v4465_v58, %v6173_v57  ;;  %v2730_v10 = vadd.f32 %v5885_v38, %v2691_v41 }
 0x243   : > { %v3158_v54 = vrot.slane %v3156_v19, 7  ;;  %v3782_v22 = vpack.c.bf16 %v2727_v61, %v2727_v61  ;;  %v2622_v48 = vadd.f32 %v4469_v17, %v5865_v14  ;;  %v2650_v4 = vmax.f32 %v2618_v15, 0.0 }
 0x244   : > { %v2623_v27 = vadd.f32 %v4460_v24, %v5865_v14  ;;  %v2653_v18 = vmax.f32 %v2621_v7, 0.0  ;;  %v2624_v30 = vadd.f32 %v4466_v52, %v5865_v14  ;;  %v3785_v40 = vpack.c.bf16 %v2730_v10, %v2730_v10  ;;  %v3354_v24 = vld [vmem:[%s5552_s14 + $0xa8] sm:$0xf] }
 0x245   : > { %v3161_v63 = vor.u32 %v3159_v33, %v3158_v54  ;;  %v3139_v47 = vshrl.u32 %v3782_v22, 16  ;;  %v3142_v21 = vshll.u32 %v3782_v22, 16  ;;  %v2689_v57 = vmul.f32 %v5877_v5, %v2650_v4 }
 0x246   : > { %v2655_v45 = vmax.f32 %v2623_v27, 0.0  ;;  %v2692_v32 = vmul.f32 %v5877_v5, %v2653_v18  ;;  %v2656_v55 = vmax.f32 %v2624_v30, 0.0  ;;  %v2654_v53 = vmax.f32 %v2622_v48, 0.0 }
 0x247   : > { %v3348_v56 = vsel %vm5923_vm9, %v3161_v63, %v3347_v31  ;;  %v3141_v1 = vrot.slane %v3139_v47, 7  ;;  %v3164_v43 = vshrl.u32 %v3785_v40, 16  ;;  %v2728_v14 = vadd.f32 %v5885_v38, %v2689_v57  ;;  %v3361_v31 = vld [vmem:[%s5552_s14 + $0xb4] sm:$0xf]  ;;  %v3365_v47 = vld [vmem:[%s5552_s14 + $0xbc] sm:$0x1] }
 0x248   : > { %3349 = vst [vmem:[%s5552_s14 + $0x9c] sm:$0xf] %v3348_v56  ;;  %v2694_v13 = vmul.f32 %v5877_v5, %v2655_v45  ;;  %v3167_v59 = vshll.u32 %v3785_v40, 16  ;;  %v2731_v9 = vadd.f32 %v5885_v38, %v2692_v32  ;;  %v2695_v8 = vmul.f32 %v5877_v5, %v2656_v55  ;;  %v3358_v56 = vld [vmem:[%s5552_s14 + $0xb0] sm:$0x1] }
 0x249   : > { %v3144_v51 = vor.u32 %v3142_v21, %v3141_v1  ;;  %v3166_v36 = vrot.slane %v3164_v43, 7  ;;  %v3783_v35 = vpack.c.bf16 %v2728_v14, %v2728_v14  ;;  %v2693_v23 = vmul.f32 %v5877_v5, %v2654_v53 }
 0x24a   : > { %v2733_v25 = vadd.f32 %v5885_v38, %v2694_v13  ;;  %v3162_v44 = vrot.slane %v3158_v54, 4  ;;  %v3786_v20 = vpack.c.bf16 %v2731_v9, %v2731_v9  ;;  %v2734_v0 = vadd.f32 %v5885_v38, %v2695_v8 }
 0x24b   : > { %v3341_v6 = vsel %vm5923_vm9, %v3144_v51, %v3340_v2  ;;  %v3145_v29 = vrot.slane %v3141_v1, 4  ;;  %v3169_v11 = vor.u32 %v3167_v59, %v3166_v36  ;;  %v3171_v50 = vrot.slane %v3166_v36, 4 }
 0x24c   : > { %3342 = vst [vmem:[%s5552_s14 + $0x90] sm:$0xf] %v3341_v6  ;;  %v3147_v49 = vshrl.u32 %v3783_v35, 16  ;;  %v3150_v62 = vshll.u32 %v3783_v35, 16  ;;  %v3788_v26 = vpack.c.bf16 %v2733_v25, %v2733_v25  ;;  %v3173_v3 = vshrl.u32 %v3786_v20, 16 }
 0x24d   : > { %v3789_v5 = vpack.c.bf16 %v2734_v0, %v2734_v0  ;;  %v3170_v37 = vsel %vm5933_vm10, %v3162_v44, %v3169_v11  ;;  %v3352_v46 = vsel %vm5560_vm4, %v3171_v50, %v3351_v28  ;;  %v2732_v42 = vadd.f32 %v5885_v38, %v2693_v23 }
 0x24e   : > { %v3149_v34 = vrot.slane %v3147_v49, 7  ;;  %3350 = vst [vmem:[%s5552_s14 + $0xa0] sm:$0xf] %v3170_v37  ;;  %3353 = vst [vmem:[%s5552_s14 + $0xa4] sm:$0x1] %v3352_v46  ;;  %v3190_v58 = vshrl.u32 %v3788_v26, 16 }
 0x24f   : > { %v3175_v17 = vrot.slane %v3173_v3, 7  ;;  %v3176_v19 = vshll.u32 %v3786_v20, 16  ;;  %v3198_v33 = vshrl.u32 %v3789_v5, 16  ;;  %v3193_v15 = vshll.u32 %v3788_v26, 16 }
 0x250   : > { %v3152_v61 = vor.u32 %v3150_v62, %v3149_v34  ;;  %v3154_v41 = vrot.slane %v3149_v34, 4  ;;  %v3787_v7 = vpack.c.bf16 %v2732_v42, %v2732_v42  ;;  %v3192_v52 = vrot.slane %v3190_v58, 7 }
 0x251   : > { %v3178_v54 = vor.u32 %v3176_v19, %v3175_v17  ;;  %v3200_v38 = vrot.slane %v3198_v33, 7  ;;  %v3201_v22 = vshll.u32 %v3789_v5, 16  ;;  %v3179_v1 = vrot.slane %v3175_v17, 4 }
 0x252   : > { %v3153_v10 = vsel %vm5933_vm10, %v3145_v29, %v3152_v61  ;;  %v3345_v48 = vsel %vm5560_vm4, %v3154_v41, %v3344_v16  ;;  %v3181_v4 = vshrl.u32 %v3787_v7, 16  ;;  %v3195_v27 = vor.u32 %v3193_v15, %v3192_v52 }
 0x253   : > { %3343 = vst [vmem:[%s5552_s14 + $0x94] sm:$0xf] %v3153_v10  ;;  %3346 = vst [vmem:[%s5552_s14 + $0x98] sm:$0x1] %v3345_v48  ;;  %v3196_v18 = vrot.slane %v3192_v52, 4  ;;  %v3355_v30 = vsel %vm5923_vm9, %v3178_v54, %v3354_v24  ;;  %v3203_v63 = vor.u32 %v3201_v22, %v3200_v38  ;;  %v3205_v21 = vrot.slane %v3200_v38, 4 }
 0x254   : > { %3356 = vst [vmem:[%s5552_s14 + $0xa8] sm:$0xf] %v3355_v30  ;;  %v3183_v40 = vrot.slane %v3181_v4, 7  ;;  %v3184_v57 = vshll.u32 %v3787_v7, 16  ;;  %v3362_v45 = vsel %vm5923_vm9, %v3195_v27, %v3361_v31 }
 0x255   : > { %v3204_v32 = vsel %vm5933_vm10, %v3196_v18, %v3203_v63  ;;  %3363 = vst [vmem:[%s5552_s14 + $0xb4] sm:$0xf] %v3362_v45  ;;  %v3366_v55 = vsel %vm5560_vm4, %v3205_v21, %v3365_v47 }
 0x256   : > { %3364 = vst [vmem:[%s5552_s14 + $0xb8] sm:$0xf] %v3204_v32  ;;  %v3186_v53 = vor.u32 %v3184_v57, %v3183_v40  ;;  %v3188_v2 = vrot.slane %v3183_v40, 4  ;;  %3367 = vst [vmem:[%s5552_s14 + $0xbc] sm:$0x1] %v3366_v55 }
 0x258   : > { %v3187_v43 = vsel %vm5933_vm10, %v3179_v1, %v3186_v53  ;;  %v3359_v39 = vsel %vm5560_vm4, %v3188_v2, %v3358_v56 }
 0x259   : > { %3357 = vst [vmem:[%s5552_s14 + $0xac] sm:$0xf] %v3187_v43  ;;  %3360 = vst [vmem:[%s5552_s14 + $0xb0] sm:$0x1] %v3359_v39 }
 0x25a PF: > { %s17_s26 = sadd.s32 1, %s4679_s26   ;;  %s6418_s24 = smov %s4675_s25 }
 0x25b   : > { %p14_p5 = scmp.ge.s32.totalorder %s17_s26, 4   ;;  %s6419_s25 = smov %s6421_s27 }
 0x25d   :  { %16 = sbr.rel (!%p14_p5) target bundleno = 2 (0x2), region = 86 }

</bundles_post_ra>
